<compile_context>
chip_gen: v7x
topology: tpu7x:2x2x1
jax: 0.10.0
libtpu: 0.0.40
codegen_flags: <defaults>
</compile_context>

<pallas_src>
import functools

import jax
import jax.numpy as jnp
from jax.experimental import pallas as pl
from jax.experimental.pallas import tpu as pltpu

# ---- scaled-down, structure-preserving sizes -------------------------------
B = 2              # batch
CIN = 3            # RGB input channels
H = W = 32         # input spatial size (chosen so HP*WP = 256 is lane-dense)
COUT = 8           # backbone conv channels (stands in for VGG's 512)
HP, WP = H // 2, W // 2
HPWP = HP * WP               # 256 — pooled spatial, multiple of 128
F = COUT * HPWP              # per-view flattened feature (stands in for 512*6*6)
HID = 128                    # MLP hidden width (stands in for 4096)
NVIEW = 7                    # views used by the test=True path (xir is unused)
K_RAW = 9 * CIN              # im2col K = 27
KP = 32                      # K padded up for clean sublane tiling


# =============================================================================
# Backbone: one gridless pallas_call.  conv3x3 + bias + ReLU + 2x2 maxpool +
# NCHW flatten + bf16 cast, for all 7 views.  Outputs are already in the
# layouts the MLPs consume (only free reshapes outside).
# TODO(synk): stands in for the full torchvision vgg16().features stack
# (13 conv layers); one representative conv3x3+ReLU+maxpool2x2 VGG block.
# =============================================================================
def _conv_pool_kernel(w_ref, p_ref, b_ref, ov_ref, oa_ref):
    # w_ref: (7, COUT, KP) bf16
    # p_ref: (7, KP, B*4*HPWP) bf16, lane = b*4*HPWP + pool_pos*HPWP + hp*WP + wp
    # b_ref: (7, COUT, 1) f32
    # ov_ref: (3, B, COUT, HPWP) bf16   (views f, r, t  -> mlp1 input)
    # oa_ref: (4, B, COUT, HPWP) bf16   (the 4 'i' views -> mlp2 input)
    for v in range(NVIEW):
        y = jnp.dot(w_ref[v], p_ref[v], preferred_element_type=jnp.float32)
        y = jnp.maximum(y + b_ref[v], 0.0)            # conv + bias + ReLU, f32
        for b in range(B):
            base = b * 4 * HPWP
            # 2x2 maxpool = max over four lane-aligned 256-wide chunks
            c00 = y[:, base + 0 * HPWP: base + 1 * HPWP]
            c01 = y[:, base + 1 * HPWP: base + 2 * HPWP]
            c10 = y[:, base + 2 * HPWP: base + 3 * HPWP]
            c11 = y[:, base + 3 * HPWP: base + 4 * HPWP]
            pooled = jnp.maximum(jnp.maximum(c00, c01),
                                 jnp.maximum(c10, c11))        # (COUT, HPWP)
            if v < 3:
                ov_ref[v, b] = pooled.astype(ov_ref.dtype)     # bf16 emitted here
            else:
                oa_ref[v - 3, b] = pooled.astype(oa_ref.dtype)


def conv_backbone(conv_w, patches, conv_b):
    # ~1 MiB of inputs / 56 KiB of outputs: trivially VMEM resident, one shot.
    return pl.pallas_call(
        _conv_pool_kernel,
        out_shape=(jax.ShapeDtypeStruct((3, B, COUT, HPWP), jnp.bfloat16),
                   jax.ShapeDtypeStruct((4, B, COUT, HPWP), jnp.bfloat16)),
    )(conv_w, patches, conv_b)


def build_patches(x):
    """im2col: (V, B, CIN, H, W) -> (V, KP, B*4*HPWP) bf16.

    Lane order = (b, pool_pos=(dy,dx), hp, wp) so that the 2x2 maxpool inside
    the kernel is a max over four lane-aligned chunks.
    TODO(synk): at real VGG sizes im2col should move in-kernel (halo BlockSpecs
    / shifted accumulating dots) to avoid the 9x HBM expansion; kept as wrapper
    glue at toy size.
    """
    v = x.shape[0]
    xp = jnp.pad(x, ((0, 0), (0, 0), (0, 0), (1, 1), (1, 1)))
    cols = [xp[:, :, :, ky:ky + H, kx:kx + W]
            for ky in range(3) for kx in range(3)]             # each (V,B,CIN,H,W)
    p = jnp.stack(cols, axis=2)                                # (V, B, 9, CIN, H, W)
    p = p.reshape(v, B, K_RAW, H, W)                           # k = (ky, kx, ci)
    p = p.reshape(v, B, K_RAW, HP, 2, WP, 2)                   # h=(hp,dy), w=(wp,dx)
    p = p.transpose(0, 2, 1, 4, 6, 3, 5)                       # (V, K, B, dy, dx, HP, WP)
    p = p.reshape(v, K_RAW, B * 4 * HPWP)
    p = jnp.pad(p, ((0, 0), (0, KP - K_RAW), (0, 0)))          # pad K 27 -> 32
    return p.astype(jnp.bfloat16)


# =============================================================================
# mlp1 (+ hoisted yv @ W3v): K-tiled streaming dense.
#   grid = (3,)  — one view's F = 2048 rows of w1 (a 512 KiB bf16 tile) per
#   step; the "cat(yf, yr, yt)" is realized purely by the K-grid iteration over
#   the (3, B, F) feature slab, so no concat/transpose ever touches HBM.
#   Epilogue: yv = relu(acc + b1)  (kept f32), hv = yv @ W3v computed ONCE and
#   broadcast to the 4 fusion branches.
# TODO(synk): at production (HID=4096, F=512*6*6) w1 needs cdiv/ragged K tiles,
# tn < N so the N axis splits across v7x's two TensorCores, and W3v needs its
# own tiling; at HID=128 it is trivially VMEM-resident.
# =============================================================================
def _mlp1_kernel(x_ref, w1_ref, b1_ref, w3v_ref, o_ref, acc_ref):
    k = pl.program_id(0)

    @pl.when(k == 0)
    def _():
        acc_ref[...] = jnp.zeros_like(acc_ref)

    acc_ref[...] += jnp.dot(x_ref[0], w1_ref[...],
                            preferred_element_type=jnp.float32)

    @pl.when(k == pl.num_programs(0) - 1)
    def _():
        yv = jnp.maximum(acc_ref[...] + b1_ref[...], 0.0)      # (B, HID) f32 mlp1
        hv = jnp.dot(yv, w3v_ref[...],
                     preferred_element_type=jnp.float32)       # yv @ W3v, once, f32
        for br in range(4):                                    # broadcast to branches
            o_ref[br] = hv


def mlp1_w3v(x_views, w1, b1, w3v):
    # x_views: (3, B, F) bf16  ->  hv4: (4, B, HID) f32
    return pl.pallas_call(
        _mlp1_kernel,
        out_shape=jax.ShapeDtypeStruct((4, B, HID), jnp.float32),
        grid_spec=pltpu.PrefetchScalarGridSpec(
            num_scalar_prefetch=0,
            grid=(3,),
            in_specs=[
                pl.BlockSpec((1, B, F), lambda k: (k, 0, 0)),
                pl.BlockSpec((F, HID), lambda k: (k, 0)),
                pl.BlockSpec((1, HID), lambda k: (0, 0)),
                pl.BlockSpec((HID, HID), lambda k: (0, 0)),
            ],
            out_specs=pl.BlockSpec((4, B, HID), lambda k: (0, 0, 0)),
            scratch_shapes=[pltpu.VMEM((B, HID), jnp.float32)],
        ),
        compiler_params=pltpu.CompilerParams(
            dimension_semantics=("arbitrary",),
        ),
    )(x_views, w1, b1, w3v)


# =============================================================================
# mlp2 + fusion head, fused into one K-tiled call:
#   grid = (F // tk,)  streams w2; epilogue (k == last) does
#   a = relu(acc + b2); h = relu(a @ W3a + hv + b3); out = h @ w4 + b4
#   with f32 intermediates and the final Linear(HID, 1) as a VPU lane reduce.
#   The 4 branches are stacked row-wise (one (4*B, F) matmul), so w2 is
#   streamed exactly once.
# =============================================================================
def _mlp2_head_kernel(x_ref, w2_ref, hv4_ref, b2_ref, w3a_ref, b3_ref,
                      w4_ref, b4_ref, o_ref, acc_ref):
    k = pl.program_id(0)

    @pl.when(k == 0)
    def _():
        acc_ref[...] = jnp.zeros_like(acc_ref)

    acc_ref[...] += jnp.dot(x_ref[...], w2_ref[...],
                            preferred_element_type=jnp.float32)

    @pl.when(k == pl.num_programs(0) - 1)
    def _():
        a = jnp.maximum(acc_ref[...] + b2_ref[...], 0.0)        # mlp2, (4B, HID) f32
        ha = jnp.dot(a, w3a_ref[...],
                     preferred_element_type=jnp.float32)        # ya @ W3a, f32
        h = jnp.maximum(ha + hv4_ref[...] + b3_ref[...], 0.0)   # mlp3[0] + ReLU
        o_ref[...] = (jnp.sum(h * w4_ref[...], axis=-1, keepdims=True)
                      + b4_ref[...])                            # mlp3[2] as lane reduce


def mlp2_head(x_a, w2, hv4, b2, w3a, b3, w4_row, b4, *, tk=1024):
    m, k_dim = x_a.shape
    assert k_dim % tk == 0  # TODO(synk): cdiv/ragged K tiles at production shapes
    return pl.pallas_call(
        _mlp2_head_kernel,
        out_shape=jax.ShapeDtypeStruct((m, 1), jnp.float32),
        grid_spec=pltpu.PrefetchScalarGridSpec(
            num_scalar_prefetch=0,
            grid=(k_dim // tk,),
            in_specs=[
                pl.BlockSpec((m, tk), lambda k: (0, k)),
                pl.BlockSpec((tk, HID), lambda k: (k, 0)),
                pl.BlockSpec((m, HID), lambda k: (0, 0)),
                pl.BlockSpec((1, HID), lambda k: (0, 0)),
                pl.BlockSpec((HID, HID), lambda k: (0, 0)),
                pl.BlockSpec((1, HID), lambda k: (0, 0)),
                pl.BlockSpec((1, HID), lambda k: (0, 0)),
                pl.BlockSpec((1, 1), lambda k: (0, 0)),
            ],
            out_specs=pl.BlockSpec((m, 1), lambda k: (0, 0)),
            scratch_shapes=[pltpu.VMEM((m, HID), jnp.float32)],
        ),
        compiler_params=pltpu.CompilerParams(
            dimension_semantics=("arbitrary",),
        ),
    )(x_a, w2, hv4, b2, w3a, b3, w4_row, b4)


# =============================================================================
# Full forward (test=True semantics of Three2I_self) — 3 pallas_calls total.
# =============================================================================
def three2i_forward(kp, xfl, xrl, xtl, xil, xfr, xrr, xtr, xir):
    del xir  # unused in the test=True path (matches the PyTorch module)
    # view order: [f, r, t, i(xil), i(xfr), i(xrr), i(xtr)]
    views = jnp.stack([xfl, xrl, xtl, xil, xfr, xrr, xtr], axis=0)

    patches = build_patches(views)                              # (7, KP, B*4*HPWP) bf16
    ov, oa = conv_backbone(kp['conv_w'], patches, kp['conv_b'])  # bf16 feats

    # Free (metadata-only) reshapes: (c, hp, wp) ordering already matches the
    # torch flatten, so no transpose / concat passes over HBM.
    xv = ov.reshape(3, B, F)                                    # mlp1 input slab
    xa = oa.reshape(4 * B, F)                                   # mlp2: 4 branches stacked

    hv4 = mlp1_w3v(xv, kp['w1'], kp['b1'], kp['w3v'])           # (4, B, HID) f32
    out = mlp2_head(xa, kp['w2'], hv4.reshape(4 * B, HID),
                    kp['b2'], kp['w3a'], kp['b3'],
                    kp['w4_row'], kp['b4'])                     # (4*B, 1) f32

    out4 = out.reshape(4, B, 1)
    return out4[0], out4[1], out4[2], out4[3]


# =============================================================================
# Parameters (natural layouts) + packing into kernel layouts.
# NOTE: the module zero-inits the MLP biases; here all biases are non-zero so
# the bias-add paths in every kernel are numerically exercised by the check.
# =============================================================================
def init_params(key):
    ks = jax.random.split(key, 16)
    conv_w = lambda k: (jax.random.normal(k, (COUT, K_RAW)) * 0.05).astype(jnp.float32)
    conv_b = lambda k: (jax.random.normal(k, (COUT,)) * 0.1).astype(jnp.float32)
    vec_b = lambda k, n: (jax.random.normal(k, (n,)) * 0.05).astype(jnp.float32)
    return {
        'wf': conv_w(ks[0]), 'bf': conv_b(ks[1]),
        'wr': conv_w(ks[2]), 'br': conv_b(ks[3]),
        'wt': conv_w(ks[4]), 'bt': conv_b(ks[5]),
        'wi': conv_w(ks[6]), 'bi': conv_b(ks[7]),
        # mlp1 = Linear(3*F, HID) + ReLU
        'w1': (jax.random.normal(ks[8], (3 * F, HID)) * 0.01).astype(jnp.float32),
        'b1': vec_b(ks[9], HID),
        # mlp2 = Linear(F, HID) + ReLU
        'w2': (jax.random.normal(ks[10], (F, HID)) * 0.01).astype(jnp.float32),
        'b2': vec_b(ks[11], HID),
        # mlp3 = Linear(2*HID, HID) + ReLU + Linear(HID, 1)
        'w3': (jax.random.normal(ks[12], (2 * HID, HID)) * 0.01).astype(jnp.float32),
        'b3': vec_b(ks[13], HID),
        'w4': (jax.random.normal(ks[14], (HID, 1)) * 0.01).astype(jnp.float32),
        'b4': vec_b(ks[15], 1),
    }


def prepare_kernel_params(p):
    """Pack weights into the layouts/dtypes the Pallas kernels consume."""
    conv_w = jnp.stack([p['wf'], p['wr'], p['wt'],
                        p['wi'], p['wi'], p['wi'], p['wi']], axis=0)   # (7, COUT, 27)
    conv_w = jnp.pad(conv_w, ((0, 0), (0, 0), (0, KP - K_RAW)))
    conv_b = jnp.stack([p['bf'], p['br'], p['bt'],
                        p['bi'], p['bi'], p['bi'], p['bi']], axis=0)[..., None]
    return {
        'conv_w': conv_w.astype(jnp.bfloat16),         # (7, COUT, KP) bf16
        'conv_b': conv_b.astype(jnp.float32),          # (7, COUT, 1)  f32
        # big streamed MLP weights: bf16 MXU operands
        # TODO(synk): int8 (v5e/v6e) or fp8 (v7x) weight quant at production size.
        'w1': p['w1'].astype(jnp.bfloat16),
        'b1': p['b1'][None, :].astype(jnp.float32),
        'w2': p['w2'].astype(jnp.bfloat16),
        'b2': p['b2'][None, :].astype(jnp.float32),
        # small head weights stay f32 (exact cat-then-matmul split of w3)
        'w3v': p['w3'][:HID].astype(jnp.float32),
        'w3a': p['w3'][HID:].astype(jnp.float32),
        'b3': p['b3'][None, :].astype(jnp.float32),
        'w4_row': p['w4'].T.astype(jnp.float32),       # (1, HID) f32 for VPU reduce
        'b4': p['b4'].reshape(1, 1).astype(jnp.float32),
    }


# =============================================================================
# Pure-JAX float32 reference (mirrors the PyTorch forward, test=True).
# =============================================================================
def reference_forward(p, xfl, xrl, xtl, xil, xfr, xrr, xtr, xir):
    del xir

    def backbone_ref(x, w, b):
        xp = jnp.pad(x, ((0, 0), (0, 0), (1, 1), (1, 1)))
        cols = [xp[:, :, ky:ky + H, kx:kx + W]
                for ky in range(3) for kx in range(3)]
        pat = jnp.stack(cols, axis=1).reshape(x.shape[0], K_RAW, H * W)
        y = jnp.einsum('ok,bkp->bop', w, pat) + b[None, :, None]
        y = jnp.maximum(y, 0.0).reshape(-1, COUT, H, W)
        y = y.reshape(-1, COUT, HP, 2, WP, 2).max(axis=(3, 5))
        return y.reshape(-1, F)

    yf = backbone_ref(xfl, p['wf'], p['bf'])
    yr = backbone_ref(xrl, p['wr'], p['br'])
    yt = backbone_ref(xtl, p['wt'], p['bt'])
    yas = [backbone_ref(x, p['wi'], p['bi']) for x in (xil, xfr, xrr, xtr)]

    yv = jnp.concatenate([yf, yr, yt], axis=1)
    yv = jnp.maximum(yv @ p['w1'] + p['b1'], 0.0)
    outs = []
    for ya in yas:
        ya = jnp.maximum(ya @ p['w2'] + p['b2'], 0.0)
        h = jnp.maximum(jnp.concatenate([yv, ya], axis=1) @ p['w3'] + p['b3'], 0.0)
        outs.append(h @ p['w4'] + p['b4'])
    return tuple(outs)


if __name__ == "__main__":
    key = jax.random.PRNGKey(0)
    pkey, xkey = jax.random.split(key)
    params = init_params(pkey)
    kparams = prepare_kernel_params(params)

    # 8 views, each NCHW like the PyTorch module: (B, 3, 32, 32)
    xs = jax.random.normal(xkey, (8, B, CIN, H, W), jnp.float32)
    views = [xs[i] for i in range(8)]

    fwd = jax.jit(functools.partial(three2i_forward, kparams))
    y1, y2, y3, y4 = fwd(*views)
    jax.block_until_ready((y1, y2, y3, y4))

    out = jnp.stack([y1, y2, y3, y4])
    assert out.shape == (4, B, 1)

    r1, r2, r3, r4 = reference_forward(params, *views)
    ref = jnp.stack([r1, r2, r3, r4])
    err = float(jnp.max(jnp.abs(out - ref)))
    scale = float(jnp.max(jnp.abs(ref))) + 1e-6
    assert err / scale < 0.1, f"relative error too large: {err / scale}"

    print("KERNEL_OK")
</pallas_src>

<mosaic_0001>
module attributes {stable_mosaic.version = 11 : i64} {
  func.func @_conv_pool_kernel(%arg0: memref<7x8x32xbf16, #tpu.memory_space<vmem>>, %arg1: memref<7x32x2048xbf16, #tpu.memory_space<vmem>>, %arg2: memref<7x8x1xf32, #tpu.memory_space<vmem>>, %arg3: memref<3x2x8x256xbf16, #tpu.memory_space<vmem>>, %arg4: memref<4x2x8x256xbf16, #tpu.memory_space<vmem>>) attributes {dimension_semantics = [], scalar_prefetch = 0 : i64, scratch_operands = 0 : i64, tpu.core_type = #tpu.core_type<tc>} {
    %c0 = arith.constant 0 : index
    %c0_0 = arith.constant 0 : index
    %c0_1 = arith.constant 0 : index
    %0 = vector.load %arg0[%c0, %c0_0, %c0_1] : memref<7x8x32xbf16, #tpu.memory_space<vmem>>, vector<1x8x32xbf16>
    %1 = vector.shape_cast %0 : vector<1x8x32xbf16> to vector<8x32xbf16>
    %c0_2 = arith.constant 0 : index
    %c0_3 = arith.constant 0 : index
    %c0_4 = arith.constant 0 : index
    %2 = vector.load %arg1[%c0_2, %c0_3, %c0_4] : memref<7x32x2048xbf16, #tpu.memory_space<vmem>>, vector<1x32x2048xbf16>
    %3 = vector.shape_cast %2 : vector<1x32x2048xbf16> to vector<32x2048xbf16>
    %cst = arith.constant dense<0.000000e+00> : vector<8x2048xf32>
    %4 = tpu.matmul %1, %3, %cst {dimension_numbers = #tpu.dot_dimension_numbers<[1], [0], [0], [1], [0, 0, 1, 1], [], []>} : vector<8x32xbf16>, vector<32x2048xbf16>, vector<8x2048xf32> -> vector<8x2048xf32>
    %c0_5 = arith.constant 0 : index
    %c0_6 = arith.constant 0 : index
    %c0_7 = arith.constant 0 : index
    %5 = vector.load %arg2[%c0_5, %c0_6, %c0_7] : memref<7x8x1xf32, #tpu.memory_space<vmem>>, vector<1x8x1xf32>
    %6 = vector.shape_cast %5 : vector<1x8x1xf32> to vector<8x1xf32>
    %7 = vector.broadcast %6 : vector<8x1xf32> to vector<8x2048xf32>
    %8 = arith.addf %4, %7 : vector<8x2048xf32>
    %cst_8 = arith.constant 0.000000e+00 : f32
    %9 = vector.broadcast %cst_8 : f32 to vector<8x2048xf32>
    %10 = arith.maximumf %8, %9 : vector<8x2048xf32>
    %11 = vector.extract_strided_slice %10 {offsets = [0, 0], sizes = [8, 256], strides = [1, 1]} : vector<8x2048xf32> to vector<8x256xf32>
    %12 = vector.extract_strided_slice %10 {offsets = [0, 256], sizes = [8, 256], strides = [1, 1]} : vector<8x2048xf32> to vector<8x256xf32>
    %13 = vector.extract_strided_slice %10 {offsets = [0, 512], sizes = [8, 256], strides = [1, 1]} : vector<8x2048xf32> to vector<8x256xf32>
    %14 = vector.extract_strided_slice %10 {offsets = [0, 768], sizes = [8, 256], strides = [1, 1]} : vector<8x2048xf32> to vector<8x256xf32>
    %15 = arith.maximumf %11, %12 : vector<8x256xf32>
    %16 = arith.maximumf %13, %14 : vector<8x256xf32>
    %17 = arith.maximumf %15, %16 : vector<8x256xf32>
    %18 = arith.truncf %17 : vector<8x256xf32> to vector<8x256xbf16>
    %c0_9 = arith.constant 0 : index
    %c0_10 = arith.constant 0 : index
    %c0_11 = arith.constant 0 : index
    %c0_12 = arith.constant 0 : index
    %19 = vector.load %arg3[%c0_9, %c0_10, %c0_11, %c0_12] : memref<3x2x8x256xbf16, #tpu.memory_space<vmem>>, vector<1x1x8x256xbf16>
    %20 = vector.shape_cast %19 : vector<1x1x8x256xbf16> to vector<8x256xbf16>
    %21 = vector.shape_cast %18 : vector<8x256xbf16> to vector<1x1x8x256xbf16>
    tpu.vector_store %arg3[%c0_9, %c0_10, %c0_11, %c0_12], %21 {strides = array<i32>} : memref<3x2x8x256xbf16, #tpu.memory_space<vmem>>, vector<1x1x8x256xbf16>,
    %22 = vector.extract_strided_slice %10 {offsets = [0, 1024], sizes = [8, 256], strides = [1, 1]} : vector<8x2048xf32> to vector<8x256xf32>
    %23 = vector.extract_strided_slice %10 {offsets = [0, 1280], sizes = [8, 256], strides = [1, 1]} : vector<8x2048xf32> to vector<8x256xf32>
    %24 = vector.extract_strided_slice %10 {offsets = [0, 1536], sizes = [8, 256], strides = [1, 1]} : vector<8x2048xf32> to vector<8x256xf32>
    %25 = vector.extract_strided_slice %10 {offsets = [0, 1792], sizes = [8, 256], strides = [1, 1]} : vector<8x2048xf32> to vector<8x256xf32>
    %26 = arith.maximumf %22, %23 : vector<8x256xf32>
    %27 = arith.maximumf %24, %25 : vector<8x256xf32>
    %28 = arith.maximumf %26, %27 : vector<8x256xf32>
    %29 = arith.truncf %28 : vector<8x256xf32> to vector<8x256xbf16>
    %c0_13 = arith.constant 0 : index
    %c1 = arith.constant 1 : index
    %c0_14 = arith.constant 0 : index
    %c0_15 = arith.constant 0 : index
    %30 = vector.load %arg3[%c0_13, %c1, %c0_14, %c0_15] : memref<3x2x8x256xbf16, #tpu.memory_space<vmem>>, vector<1x1x8x256xbf16>
    %31 = vector.shape_cast %30 : vector<1x1x8x256xbf16> to vector<8x256xbf16>
    %32 = vector.shape_cast %29 : vector<8x256xbf16> to vector<1x1x8x256xbf16>
    tpu.vector_store %arg3[%c0_13, %c1, %c0_14, %c0_15], %32 {strides = array<i32>} : memref<3x2x8x256xbf16, #tpu.memory_space<vmem>>, vector<1x1x8x256xbf16>,
    %c1_16 = arith.constant 1 : index
    %c0_17 = arith.constant 0 : index
    %c0_18 = arith.constant 0 : index
    %33 = vector.load %arg0[%c1_16, %c0_17, %c0_18] : memref<7x8x32xbf16, #tpu.memory_space<vmem>>, vector<1x8x32xbf16>
    %34 = vector.shape_cast %33 : vector<1x8x32xbf16> to vector<8x32xbf16>
    %c1_19 = arith.constant 1 : index
    %c0_20 = arith.constant 0 : index
    %c0_21 = arith.constant 0 : index
    %35 = vector.load %arg1[%c1_19, %c0_20, %c0_21] : memref<7x32x2048xbf16, #tpu.memory_space<vmem>>, vector<1x32x2048xbf16>
    %36 = vector.shape_cast %35 : vector<1x32x2048xbf16> to vector<32x2048xbf16>
    %cst_22 = arith.constant dense<0.000000e+00> : vector<8x2048xf32>
    %37 = tpu.matmul %34, %36, %cst_22 {dimension_numbers = #tpu.dot_dimension_numbers<[1], [0], [0], [1], [0, 0, 1, 1], [], []>} : vector<8x32xbf16>, vector<32x2048xbf16>, vector<8x2048xf32> -> vector<8x2048xf32>
    %c1_23 = arith.constant 1 : index
    %c0_24 = arith.constant 0 : index
    %c0_25 = arith.constant 0 : index
    %38 = vector.load %arg2[%c1_23, %c0_24, %c0_25] : memref<7x8x1xf32, #tpu.memory_space<vmem>>, vector<1x8x1xf32>
    %39 = vector.shape_cast %38 : vector<1x8x1xf32> to vector<8x1xf32>
    %40 = vector.broadcast %39 : vector<8x1xf32> to vector<8x2048xf32>
    %41 = arith.addf %37, %40 : vector<8x2048xf32>
    %cst_26 = arith.constant 0.000000e+00 : f32
    %42 = vector.broadcast %cst_26 : f32 to vector<8x2048xf32>
    %43 = arith.maximumf %41, %42 : vector<8x2048xf32>
    %44 = vector.extract_strided_slice %43 {offsets = [0, 0], sizes = [8, 256], strides = [1, 1]} : vector<8x2048xf32> to vector<8x256xf32>
    %45 = vector.extract_strided_slice %43 {offsets = [0, 256], sizes = [8, 256], strides = [1, 1]} : vector<8x2048xf32> to vector<8x256xf32>
    %46 = vector.extract_strided_slice %43 {offsets = [0, 512], sizes = [8, 256], strides = [1, 1]} : vector<8x2048xf32> to vector<8x256xf32>
    %47 = vector.extract_strided_slice %43 {offsets = [0, 768], sizes = [8, 256], strides = [1, 1]} : vector<8x2048xf32> to vector<8x256xf32>
    %48 = arith.maximumf %44, %45 : vector<8x256xf32>
    %49 = arith.maximumf %46, %47 : vector<8x256xf32>
    %50 = arith.maximumf %48, %49 : vector<8x256xf32>
    %51 = arith.truncf %50 : vector<8x256xf32> to vector<8x256xbf16>
    %c1_27 = arith.constant 1 : index
    %c0_28 = arith.constant 0 : index
    %c0_29 = arith.constant 0 : index
    %c0_30 = arith.constant 0 : index
    %52 = vector.load %arg3[%c1_27, %c0_28, %c0_29, %c0_30] : memref<3x2x8x256xbf16, #tpu.memory_space<vmem>>, vector<1x1x8x256xbf16>
    %53 = vector.shape_cast %52 : vector<1x1x8x256xbf16> to vector<8x256xbf16>
    %54 = vector.shape_cast %51 : vector<8x256xbf16> to vector<1x1x8x256xbf16>
    tpu.vector_store %arg3[%c1_27, %c0_28, %c0_29, %c0_30], %54 {strides = array<i32>} : memref<3x2x8x256xbf16, #tpu.memory_space<vmem>>, vector<1x1x8x256xbf16>,
    %55 = vector.extract_strided_slice %43 {offsets = [0, 1024], sizes = [8, 256], strides = [1, 1]} : vector<8x2048xf32> to vector<8x256xf32>
    %56 = vector.extract_strided_slice %43 {offsets = [0, 1280], sizes = [8, 256], strides = [1, 1]} : vector<8x2048xf32> to vector<8x256xf32>
    %57 = vector.extract_strided_slice %43 {offsets = [0, 1536], sizes = [8, 256], strides = [1, 1]} : vector<8x2048xf32> to vector<8x256xf32>
    %58 = vector.extract_strided_slice %43 {offsets = [0, 1792], sizes = [8, 256], strides = [1, 1]} : vector<8x2048xf32> to vector<8x256xf32>
    %59 = arith.maximumf %55, %56 : vector<8x256xf32>
    %60 = arith.maximumf %57, %58 : vector<8x256xf32>
    %61 = arith.maximumf %59, %60 : vector<8x256xf32>
    %62 = arith.truncf %61 : vector<8x256xf32> to vector<8x256xbf16>
    %c1_31 = arith.constant 1 : index
    %c1_32 = arith.constant 1 : index
    %c0_33 = arith.constant 0 : index
    %c0_34 = arith.constant 0 : index
    %63 = vector.load %arg3[%c1_31, %c1_32, %c0_33, %c0_34] : memref<3x2x8x256xbf16, #tpu.memory_space<vmem>>, vector<1x1x8x256xbf16>
    %64 = vector.shape_cast %63 : vector<1x1x8x256xbf16> to vector<8x256xbf16>
    %65 = vector.shape_cast %62 : vector<8x256xbf16> to vector<1x1x8x256xbf16>
    tpu.vector_store %arg3[%c1_31, %c1_32, %c0_33, %c0_34], %65 {strides = array<i32>} : memref<3x2x8x256xbf16, #tpu.memory_space<vmem>>, vector<1x1x8x256xbf16>,
    %c2 = arith.constant 2 : index
    %c0_35 = arith.constant 0 : index
    %c0_36 = arith.constant 0 : index
    %66 = vector.load %arg0[%c2, %c0_35, %c0_36] : memref<7x8x32xbf16, #tpu.memory_space<vmem>>, vector<1x8x32xbf16>
    %67 = vector.shape_cast %66 : vector<1x8x32xbf16> to vector<8x32xbf16>
    %c2_37 = arith.constant 2 : index
    %c0_38 = arith.constant 0 : index
    %c0_39 = arith.constant 0 : index
    %68 = vector.load %arg1[%c2_37, %c0_38, %c0_39] : memref<7x32x2048xbf16, #tpu.memory_space<vmem>>, vector<1x32x2048xbf16>
    %69 = vector.shape_cast %68 : vector<1x32x2048xbf16> to vector<32x2048xbf16>
    %cst_40 = arith.constant dense<0.000000e+00> : vector<8x2048xf32>
    %70 = tpu.matmul %67, %69, %cst_40 {dimension_numbers = #tpu.dot_dimension_numbers<[1], [0], [0], [1], [0, 0, 1, 1], [], []>} : vector<8x32xbf16>, vector<32x2048xbf16>, vector<8x2048xf32> -> vector<8x2048xf32>
    %c2_41 = arith.constant 2 : index
    %c0_42 = arith.constant 0 : index
    %c0_43 = arith.constant 0 : index
    %71 = vector.load %arg2[%c2_41, %c0_42, %c0_43] : memref<7x8x1xf32, #tpu.memory_space<vmem>>, vector<1x8x1xf32>
    %72 = vector.shape_cast %71 : vector<1x8x1xf32> to vector<8x1xf32>
    %73 = vector.broadcast %72 : vector<8x1xf32> to vector<8x2048xf32>
    %74 = arith.addf %70, %73 : vector<8x2048xf32>
    %cst_44 = arith.constant 0.000000e+00 : f32
    %75 = vector.broadcast %cst_44 : f32 to vector<8x2048xf32>
    %76 = arith.maximumf %74, %75 : vector<8x2048xf32>
    %77 = vector.extract_strided_slice %76 {offsets = [0, 0], sizes = [8, 256], strides = [1, 1]} : vector<8x2048xf32> to vector<8x256xf32>
    %78 = vector.extract_strided_slice %76 {offsets = [0, 256], sizes = [8, 256], strides = [1, 1]} : vector<8x2048xf32> to vector<8x256xf32>
    %79 = vector.extract_strided_slice %76 {offsets = [0, 512], sizes = [8, 256], strides = [1, 1]} : vector<8x2048xf32> to vector<8x256xf32>
    %80 = vector.extract_strided_slice %76 {offsets = [0, 768], sizes = [8, 256], strides = [1, 1]} : vector<8x2048xf32> to vector<8x256xf32>
    %81 = arith.maximumf %77, %78 : vector<8x256xf32>
    %82 = arith.maximumf %79, %80 : vector<8x256xf32>
    %83 = arith.maximumf %81, %82 : vector<8x256xf32>
    %84 = arith.truncf %83 : vector<8x256xf32> to vector<8x256xbf16>
    %c2_45 = arith.constant 2 : index
    %c0_46 = arith.constant 0 : index
    %c0_47 = arith.constant 0 : index
    %c0_48 = arith.constant 0 : index
    %85 = vector.load %arg3[%c2_45, %c0_46, %c0_47, %c0_48] : memref<3x2x8x256xbf16, #tpu.memory_space<vmem>>, vector<1x1x8x256xbf16>
    %86 = vector.shape_cast %85 : vector<1x1x8x256xbf16> to vector<8x256xbf16>
    %87 = vector.shape_cast %84 : vector<8x256xbf16> to vector<1x1x8x256xbf16>
    tpu.vector_store %arg3[%c2_45, %c0_46, %c0_47, %c0_48], %87 {strides = array<i32>} : memref<3x2x8x256xbf16, #tpu.memory_space<vmem>>, vector<1x1x8x256xbf16>,
    %88 = vector.extract_strided_slice %76 {offsets = [0, 1024], sizes = [8, 256], strides = [1, 1]} : vector<8x2048xf32> to vector<8x256xf32>
    %89 = vector.extract_strided_slice %76 {offsets = [0, 1280], sizes = [8, 256], strides = [1, 1]} : vector<8x2048xf32> to vector<8x256xf32>
    %90 = vector.extract_strided_slice %76 {offsets = [0, 1536], sizes = [8, 256], strides = [1, 1]} : vector<8x2048xf32> to vector<8x256xf32>
    %91 = vector.extract_strided_slice %76 {offsets = [0, 1792], sizes = [8, 256], strides = [1, 1]} : vector<8x2048xf32> to vector<8x256xf32>
    %92 = arith.maximumf %88, %89 : vector<8x256xf32>
    %93 = arith.maximumf %90, %91 : vector<8x256xf32>
    %94 = arith.maximumf %92, %93 : vector<8x256xf32>
    %95 = arith.truncf %94 : vector<8x256xf32> to vector<8x256xbf16>
    %c2_49 = arith.constant 2 : index
    %c1_50 = arith.constant 1 : index
    %c0_51 = arith.constant 0 : index
    %c0_52 = arith.constant 0 : index
    %96 = vector.load %arg3[%c2_49, %c1_50, %c0_51, %c0_52] : memref<3x2x8x256xbf16, #tpu.memory_space<vmem>>, vector<1x1x8x256xbf16>
    %97 = vector.shape_cast %96 : vector<1x1x8x256xbf16> to vector<8x256xbf16>
    %98 = vector.shape_cast %95 : vector<8x256xbf16> to vector<1x1x8x256xbf16>
    tpu.vector_store %arg3[%c2_49, %c1_50, %c0_51, %c0_52], %98 {strides = array<i32>} : memref<3x2x8x256xbf16, #tpu.memory_space<vmem>>, vector<1x1x8x256xbf16>,
    %c3 = arith.constant 3 : index
    %c0_53 = arith.constant 0 : index
    %c0_54 = arith.constant 0 : index
    %99 = vector.load %arg0[%c3, %c0_53, %c0_54] : memref<7x8x32xbf16, #tpu.memory_space<vmem>>, vector<1x8x32xbf16>
    %100 = vector.shape_cast %99 : vector<1x8x32xbf16> to vector<8x32xbf16>
    %c3_55 = arith.constant 3 : index
    %c0_56 = arith.constant 0 : index
    %c0_57 = arith.constant 0 : index
    %101 = vector.load %arg1[%c3_55, %c0_56, %c0_57] : memref<7x32x2048xbf16, #tpu.memory_space<vmem>>, vector<1x32x2048xbf16>
    %102 = vector.shape_cast %101 : vector<1x32x2048xbf16> to vector<32x2048xbf16>
    %cst_58 = arith.constant dense<0.000000e+00> : vector<8x2048xf32>
    %103 = tpu.matmul %100, %102, %cst_58 {dimension_numbers = #tpu.dot_dimension_numbers<[1], [0], [0], [1], [0, 0, 1, 1], [], []>} : vector<8x32xbf16>, vector<32x2048xbf16>, vector<8x2048xf32> -> vector<8x2048xf32>
    %c3_59 = arith.constant 3 : index
    %c0_60 = arith.constant 0 : index
    %c0_61 = arith.constant 0 : index
    %104 = vector.load %arg2[%c3_59, %c0_60, %c0_61] : memref<7x8x1xf32, #tpu.memory_space<vmem>>, vector<1x8x1xf32>
    %105 = vector.shape_cast %104 : vector<1x8x1xf32> to vector<8x1xf32>
    %106 = vector.broadcast %105 : vector<8x1xf32> to vector<8x2048xf32>
    %107 = arith.addf %103, %106 : vector<8x2048xf32>
    %cst_62 = arith.constant 0.000000e+00 : f32
    %108 = vector.broadcast %cst_62 : f32 to vector<8x2048xf32>
    %109 = arith.maximumf %107, %108 : vector<8x2048xf32>
    %110 = vector.extract_strided_slice %109 {offsets = [0, 0], sizes = [8, 256], strides = [1, 1]} : vector<8x2048xf32> to vector<8x256xf32>
    %111 = vector.extract_strided_slice %109 {offsets = [0, 256], sizes = [8, 256], strides = [1, 1]} : vector<8x2048xf32> to vector<8x256xf32>
    %112 = vector.extract_strided_slice %109 {offsets = [0, 512], sizes = [8, 256], strides = [1, 1]} : vector<8x2048xf32> to vector<8x256xf32>
    %113 = vector.extract_strided_slice %109 {offsets = [0, 768], sizes = [8, 256], strides = [1, 1]} : vector<8x2048xf32> to vector<8x256xf32>
    %114 = arith.maximumf %110, %111 : vector<8x256xf32>
    %115 = arith.maximumf %112, %113 : vector<8x256xf32>
    %116 = arith.maximumf %114, %115 : vector<8x256xf32>
    %117 = arith.truncf %116 : vector<8x256xf32> to vector<8x256xbf16>
    %c0_63 = arith.constant 0 : index
    %c0_64 = arith.constant 0 : index
    %c0_65 = arith.constant 0 : index
    %c0_66 = arith.constant 0 : index
    %118 = vector.load %arg4[%c0_63, %c0_64, %c0_65, %c0_66] : memref<4x2x8x256xbf16, #tpu.memory_space<vmem>>, vector<1x1x8x256xbf16>
    %119 = vector.shape_cast %118 : vector<1x1x8x256xbf16> to vector<8x256xbf16>
    %120 = vector.shape_cast %117 : vector<8x256xbf16> to vector<1x1x8x256xbf16>
    tpu.vector_store %arg4[%c0_63, %c0_64, %c0_65, %c0_66], %120 {strides = array<i32>} : memref<4x2x8x256xbf16, #tpu.memory_space<vmem>>, vector<1x1x8x256xbf16>,
    %121 = vector.extract_strided_slice %109 {offsets = [0, 1024], sizes = [8, 256], strides = [1, 1]} : vector<8x2048xf32> to vector<8x256xf32>
    %122 = vector.extract_strided_slice %109 {offsets = [0, 1280], sizes = [8, 256], strides = [1, 1]} : vector<8x2048xf32> to vector<8x256xf32>
    %123 = vector.extract_strided_slice %109 {offsets = [0, 1536], sizes = [8, 256], strides = [1, 1]} : vector<8x2048xf32> to vector<8x256xf32>
    %124 = vector.extract_strided_slice %109 {offsets = [0, 1792], sizes = [8, 256], strides = [1, 1]} : vector<8x2048xf32> to vector<8x256xf32>
    %125 = arith.maximumf %121, %122 : vector<8x256xf32>
    %126 = arith.maximumf %123, %124 : vector<8x256xf32>
    %127 = arith.maximumf %125, %126 : vector<8x256xf32>
    %128 = arith.truncf %127 : vector<8x256xf32> to vector<8x256xbf16>
    %c0_67 = arith.constant 0 : index
    %c1_68 = arith.constant 1 : index
    %c0_69 = arith.constant 0 : index
    %c0_70 = arith.constant 0 : index
    %129 = vector.load %arg4[%c0_67, %c1_68, %c0_69, %c0_70] : memref<4x2x8x256xbf16, #tpu.memory_space<vmem>>, vector<1x1x8x256xbf16>
    %130 = vector.shape_cast %129 : vector<1x1x8x256xbf16> to vector<8x256xbf16>
    %131 = vector.shape_cast %128 : vector<8x256xbf16> to vector<1x1x8x256xbf16>
    tpu.vector_store %arg4[%c0_67, %c1_68, %c0_69, %c0_70], %131 {strides = array<i32>} : memref<4x2x8x256xbf16, #tpu.memory_space<vmem>>, vector<1x1x8x256xbf16>,
    %c4 = arith.constant 4 : index
    %c0_71 = arith.constant 0 : index
    %c0_72 = arith.constant 0 : index
    %132 = vector.load %arg0[%c4, %c0_71, %c0_72] : memref<7x8x32xbf16, #tpu.memory_space<vmem>>, vector<1x8x32xbf16>
    %133 = vector.shape_cast %132 : vector<1x8x32xbf16> to vector<8x32xbf16>
    %c4_73 = arith.constant 4 : index
    %c0_74 = arith.constant 0 : index
    %c0_75 = arith.constant 0 : index
    %134 = vector.load %arg1[%c4_73, %c0_74, %c0_75] : memref<7x32x2048xbf16, #tpu.memory_space<vmem>>, vector<1x32x2048xbf16>
    %135 = vector.shape_cast %134 : vector<1x32x2048xbf16> to vector<32x2048xbf16>
    %cst_76 = arith.constant dense<0.000000e+00> : vector<8x2048xf32>
    %136 = tpu.matmul %133, %135, %cst_76 {dimension_numbers = #tpu.dot_dimension_numbers<[1], [0], [0], [1], [0, 0, 1, 1], [], []>} : vector<8x32xbf16>, vector<32x2048xbf16>, vector<8x2048xf32> -> vector<8x2048xf32>
    %c4_77 = arith.constant 4 : index
    %c0_78 = arith.constant 0 : index
    %c0_79 = arith.constant 0 : index
    %137 = vector.load %arg2[%c4_77, %c0_78, %c0_79] : memref<7x8x1xf32, #tpu.memory_space<vmem>>, vector<1x8x1xf32>
    %138 = vector.shape_cast %137 : vector<1x8x1xf32> to vector<8x1xf32>
    %139 = vector.broadcast %138 : vector<8x1xf32> to vector<8x2048xf32>
    %140 = arith.addf %136, %139 : vector<8x2048xf32>
    %cst_80 = arith.constant 0.000000e+00 : f32
    %141 = vector.broadcast %cst_80 : f32 to vector<8x2048xf32>
    %142 = arith.maximumf %140, %141 : vector<8x2048xf32>
    %143 = vector.extract_strided_slice %142 {offsets = [0, 0], sizes = [8, 256], strides = [1, 1]} : vector<8x2048xf32> to vector<8x256xf32>
    %144 = vector.extract_strided_slice %142 {offsets = [0, 256], sizes = [8, 256], strides = [1, 1]} : vector<8x2048xf32> to vector<8x256xf32>
    %145 = vector.extract_strided_slice %142 {offsets = [0, 512], sizes = [8, 256], strides = [1, 1]} : vector<8x2048xf32> to vector<8x256xf32>
    %146 = vector.extract_strided_slice %142 {offsets = [0, 768], sizes = [8, 256], strides = [1, 1]} : vector<8x2048xf32> to vector<8x256xf32>
    %147 = arith.maximumf %143, %144 : vector<8x256xf32>
    %148 = arith.maximumf %145, %146 : vector<8x256xf32>
    %149 = arith.maximumf %147, %148 : vector<8x256xf32>
    %150 = arith.truncf %149 : vector<8x256xf32> to vector<8x256xbf16>
    %c1_81 = arith.constant 1 : index
    %c0_82 = arith.constant 0 : index
    %c0_83 = arith.constant 0 : index
    %c0_84 = arith.constant 0 : index
    %151 = vector.load %arg4[%c1_81, %c0_82, %c0_83, %c0_84] : memref<4x2x8x256xbf16, #tpu.memory_space<vmem>>, vector<1x1x8x256xbf16>
    %152 = vector.shape_cast %151 : vector<1x1x8x256xbf16> to vector<8x256xbf16>
    %153 = vector.shape_cast %150 : vector<8x256xbf16> to vector<1x1x8x256xbf16>
    tpu.vector_store %arg4[%c1_81, %c0_82, %c0_83, %c0_84], %153 {strides = array<i32>} : memref<4x2x8x256xbf16, #tpu.memory_space<vmem>>, vector<1x1x8x256xbf16>,
    %154 = vector.extract_strided_slice %142 {offsets = [0, 1024], sizes = [8, 256], strides = [1, 1]} : vector<8x2048xf32> to vector<8x256xf32>
    %155 = vector.extract_strided_slice %142 {offsets = [0, 1280], sizes = [8, 256], strides = [1, 1]} : vector<8x2048xf32> to vector<8x256xf32>
    %156 = vector.extract_strided_slice %142 {offsets = [0, 1536], sizes = [8, 256], strides = [1, 1]} : vector<8x2048xf32> to vector<8x256xf32>
    %157 = vector.extract_strided_slice %142 {offsets = [0, 1792], sizes = [8, 256], strides = [1, 1]} : vector<8x2048xf32> to vector<8x256xf32>
    %158 = arith.maximumf %154, %155 : vector<8x256xf32>
    %159 = arith.maximumf %156, %157 : vector<8x256xf32>
    %160 = arith.maximumf %158, %159 : vector<8x256xf32>
    %161 = arith.truncf %160 : vector<8x256xf32> to vector<8x256xbf16>
    %c1_85 = arith.constant 1 : index
    %c1_86 = arith.constant 1 : index
    %c0_87 = arith.constant 0 : index
    %c0_88 = arith.constant 0 : index
    %162 = vector.load %arg4[%c1_85, %c1_86, %c0_87, %c0_88] : memref<4x2x8x256xbf16, #tpu.memory_space<vmem>>, vector<1x1x8x256xbf16>
    %163 = vector.shape_cast %162 : vector<1x1x8x256xbf16> to vector<8x256xbf16>
    %164 = vector.shape_cast %161 : vector<8x256xbf16> to vector<1x1x8x256xbf16>
    tpu.vector_store %arg4[%c1_85, %c1_86, %c0_87, %c0_88], %164 {strides = array<i32>} : memref<4x2x8x256xbf16, #tpu.memory_space<vmem>>, vector<1x1x8x256xbf16>,
    %c5 = arith.constant 5 : index
    %c0_89 = arith.constant 0 : index
    %c0_90 = arith.constant 0 : index
    %165 = vector.load %arg0[%c5, %c0_89, %c0_90] : memref<7x8x32xbf16, #tpu.memory_space<vmem>>, vector<1x8x32xbf16>
    %166 = vector.shape_cast %165 : vector<1x8x32xbf16> to vector<8x32xbf16>
    %c5_91 = arith.constant 5 : index
    %c0_92 = arith.constant 0 : index
    %c0_93 = arith.constant 0 : index
    %167 = vector.load %arg1[%c5_91, %c0_92, %c0_93] : memref<7x32x2048xbf16, #tpu.memory_space<vmem>>, vector<1x32x2048xbf16>
    %168 = vector.shape_cast %167 : vector<1x32x2048xbf16> to vector<32x2048xbf16>
    %cst_94 = arith.constant dense<0.000000e+00> : vector<8x2048xf32>
    %169 = tpu.matmul %166, %168, %cst_94 {dimension_numbers = #tpu.dot_dimension_numbers<[1], [0], [0], [1], [0, 0, 1, 1], [], []>} : vector<8x32xbf16>, vector<32x2048xbf16>, vector<8x2048xf32> -> vector<8x2048xf32>
    %c5_95 = arith.constant 5 : index
    %c0_96 = arith.constant 0 : index
    %c0_97 = arith.constant 0 : index
    %170 = vector.load %arg2[%c5_95, %c0_96, %c0_97] : memref<7x8x1xf32, #tpu.memory_space<vmem>>, vector<1x8x1xf32>
    %171 = vector.shape_cast %170 : vector<1x8x1xf32> to vector<8x1xf32>
    %172 = vector.broadcast %171 : vector<8x1xf32> to vector<8x2048xf32>
    %173 = arith.addf %169, %172 : vector<8x2048xf32>
    %cst_98 = arith.constant 0.000000e+00 : f32
    %174 = vector.broadcast %cst_98 : f32 to vector<8x2048xf32>
    %175 = arith.maximumf %173, %174 : vector<8x2048xf32>
    %176 = vector.extract_strided_slice %175 {offsets = [0, 0], sizes = [8, 256], strides = [1, 1]} : vector<8x2048xf32> to vector<8x256xf32>
    %177 = vector.extract_strided_slice %175 {offsets = [0, 256], sizes = [8, 256], strides = [1, 1]} : vector<8x2048xf32> to vector<8x256xf32>
    %178 = vector.extract_strided_slice %175 {offsets = [0, 512], sizes = [8, 256], strides = [1, 1]} : vector<8x2048xf32> to vector<8x256xf32>
    %179 = vector.extract_strided_slice %175 {offsets = [0, 768], sizes = [8, 256], strides = [1, 1]} : vector<8x2048xf32> to vector<8x256xf32>
    %180 = arith.maximumf %176, %177 : vector<8x256xf32>
    %181 = arith.maximumf %178, %179 : vector<8x256xf32>
    %182 = arith.maximumf %180, %181 : vector<8x256xf32>
    %183 = arith.truncf %182 : vector<8x256xf32> to vector<8x256xbf16>
    %c2_99 = arith.constant 2 : index
    %c0_100 = arith.constant 0 : index
    %c0_101 = arith.constant 0 : index
    %c0_102 = arith.constant 0 : index
    %184 = vector.load %arg4[%c2_99, %c0_100, %c0_101, %c0_102] : memref<4x2x8x256xbf16, #tpu.memory_space<vmem>>, vector<1x1x8x256xbf16>
    %185 = vector.shape_cast %184 : vector<1x1x8x256xbf16> to vector<8x256xbf16>
    %186 = vector.shape_cast %183 : vector<8x256xbf16> to vector<1x1x8x256xbf16>
    tpu.vector_store %arg4[%c2_99, %c0_100, %c0_101, %c0_102], %186 {strides = array<i32>} : memref<4x2x8x256xbf16, #tpu.memory_space<vmem>>, vector<1x1x8x256xbf16>,
    %187 = vector.extract_strided_slice %175 {offsets = [0, 1024], sizes = [8, 256], strides = [1, 1]} : vector<8x2048xf32> to vector<8x256xf32>
    %188 = vector.extract_strided_slice %175 {offsets = [0, 1280], sizes = [8, 256], strides = [1, 1]} : vector<8x2048xf32> to vector<8x256xf32>
    %189 = vector.extract_strided_slice %175 {offsets = [0, 1536], sizes = [8, 256], strides = [1, 1]} : vector<8x2048xf32> to vector<8x256xf32>
    %190 = vector.extract_strided_slice %175 {offsets = [0, 1792], sizes = [8, 256], strides = [1, 1]} : vector<8x2048xf32> to vector<8x256xf32>
    %191 = arith.maximumf %187, %188 : vector<8x256xf32>
    %192 = arith.maximumf %189, %190 : vector<8x256xf32>
    %193 = arith.maximumf %191, %192 : vector<8x256xf32>
    %194 = arith.truncf %193 : vector<8x256xf32> to vector<8x256xbf16>
    %c2_103 = arith.constant 2 : index
    %c1_104 = arith.constant 1 : index
    %c0_105 = arith.constant 0 : index
    %c0_106 = arith.constant 0 : index
    %195 = vector.load %arg4[%c2_103, %c1_104, %c0_105, %c0_106] : memref<4x2x8x256xbf16, #tpu.memory_space<vmem>>, vector<1x1x8x256xbf16>
    %196 = vector.shape_cast %195 : vector<1x1x8x256xbf16> to vector<8x256xbf16>
    %197 = vector.shape_cast %194 : vector<8x256xbf16> to vector<1x1x8x256xbf16>
    tpu.vector_store %arg4[%c2_103, %c1_104, %c0_105, %c0_106], %197 {strides = array<i32>} : memref<4x2x8x256xbf16, #tpu.memory_space<vmem>>, vector<1x1x8x256xbf16>,
    %c6 = arith.constant 6 : index
    %c0_107 = arith.constant 0 : index
    %c0_108 = arith.constant 0 : index
    %198 = vector.load %arg0[%c6, %c0_107, %c0_108] : memref<7x8x32xbf16, #tpu.memory_space<vmem>>, vector<1x8x32xbf16>
    %199 = vector.shape_cast %198 : vector<1x8x32xbf16> to vector<8x32xbf16>
    %c6_109 = arith.constant 6 : index
    %c0_110 = arith.constant 0 : index
    %c0_111 = arith.constant 0 : index
    %200 = vector.load %arg1[%c6_109, %c0_110, %c0_111] : memref<7x32x2048xbf16, #tpu.memory_space<vmem>>, vector<1x32x2048xbf16>
    %201 = vector.shape_cast %200 : vector<1x32x2048xbf16> to vector<32x2048xbf16>
    %cst_112 = arith.constant dense<0.000000e+00> : vector<8x2048xf32>
    %202 = tpu.matmul %199, %201, %cst_112 {dimension_numbers = #tpu.dot_dimension_numbers<[1], [0], [0], [1], [0, 0, 1, 1], [], []>} : vector<8x32xbf16>, vector<32x2048xbf16>, vector<8x2048xf32> -> vector<8x2048xf32>
    %c6_113 = arith.constant 6 : index
    %c0_114 = arith.constant 0 : index
    %c0_115 = arith.constant 0 : index
    %203 = vector.load %arg2[%c6_113, %c0_114, %c0_115] : memref<7x8x1xf32, #tpu.memory_space<vmem>>, vector<1x8x1xf32>
    %204 = vector.shape_cast %203 : vector<1x8x1xf32> to vector<8x1xf32>
    %205 = vector.broadcast %204 : vector<8x1xf32> to vector<8x2048xf32>
    %206 = arith.addf %202, %205 : vector<8x2048xf32>
    %cst_116 = arith.constant 0.000000e+00 : f32
    %207 = vector.broadcast %cst_116 : f32 to vector<8x2048xf32>
    %208 = arith.maximumf %206, %207 : vector<8x2048xf32>
    %209 = vector.extract_strided_slice %208 {offsets = [0, 0], sizes = [8, 256], strides = [1, 1]} : vector<8x2048xf32> to vector<8x256xf32>
    %210 = vector.extract_strided_slice %208 {offsets = [0, 256], sizes = [8, 256], strides = [1, 1]} : vector<8x2048xf32> to vector<8x256xf32>
    %211 = vector.extract_strided_slice %208 {offsets = [0, 512], sizes = [8, 256], strides = [1, 1]} : vector<8x2048xf32> to vector<8x256xf32>
    %212 = vector.extract_strided_slice %208 {offsets = [0, 768], sizes = [8, 256], strides = [1, 1]} : vector<8x2048xf32> to vector<8x256xf32>
    %213 = arith.maximumf %209, %210 : vector<8x256xf32>
    %214 = arith.maximumf %211, %212 : vector<8x256xf32>
    %215 = arith.maximumf %213, %214 : vector<8x256xf32>
    %216 = arith.truncf %215 : vector<8x256xf32> to vector<8x256xbf16>
    %c3_117 = arith.constant 3 : index
    %c0_118 = arith.constant 0 : index
    %c0_119 = arith.constant 0 : index
    %c0_120 = arith.constant 0 : index
    %217 = vector.load %arg4[%c3_117, %c0_118, %c0_119, %c0_120] : memref<4x2x8x256xbf16, #tpu.memory_space<vmem>>, vector<1x1x8x256xbf16>
    %218 = vector.shape_cast %217 : vector<1x1x8x256xbf16> to vector<8x256xbf16>
    %219 = vector.shape_cast %216 : vector<8x256xbf16> to vector<1x1x8x256xbf16>
    tpu.vector_store %arg4[%c3_117, %c0_118, %c0_119, %c0_120], %219 {strides = array<i32>} : memref<4x2x8x256xbf16, #tpu.memory_space<vmem>>, vector<1x1x8x256xbf16>,
    %220 = vector.extract_strided_slice %208 {offsets = [0, 1024], sizes = [8, 256], strides = [1, 1]} : vector<8x2048xf32> to vector<8x256xf32>
    %221 = vector.extract_strided_slice %208 {offsets = [0, 1280], sizes = [8, 256], strides = [1, 1]} : vector<8x2048xf32> to vector<8x256xf32>
    %222 = vector.extract_strided_slice %208 {offsets = [0, 1536], sizes = [8, 256], strides = [1, 1]} : vector<8x2048xf32> to vector<8x256xf32>
    %223 = vector.extract_strided_slice %208 {offsets = [0, 1792], sizes = [8, 256], strides = [1, 1]} : vector<8x2048xf32> to vector<8x256xf32>
    %224 = arith.maximumf %220, %221 : vector<8x256xf32>
    %225 = arith.maximumf %222, %223 : vector<8x256xf32>
    %226 = arith.maximumf %224, %225 : vector<8x256xf32>
    %227 = arith.truncf %226 : vector<8x256xf32> to vector<8x256xbf16>
    %c3_121 = arith.constant 3 : index
    %c1_122 = arith.constant 1 : index
    %c0_123 = arith.constant 0 : index
    %c0_124 = arith.constant 0 : index
    %228 = vector.load %arg4[%c3_121, %c1_122, %c0_123, %c0_124] : memref<4x2x8x256xbf16, #tpu.memory_space<vmem>>, vector<1x1x8x256xbf16>
    %229 = vector.shape_cast %228 : vector<1x1x8x256xbf16> to vector<8x256xbf16>
    %230 = vector.shape_cast %227 : vector<8x256xbf16> to vector<1x1x8x256xbf16>
    tpu.vector_store %arg4[%c3_121, %c1_122, %c0_123, %c0_124], %230 {strides = array<i32>} : memref<4x2x8x256xbf16, #tpu.memory_space<vmem>>, vector<1x1x8x256xbf16>,
    return
  }
}

module attributes {stable_mosaic.version = 11 : i64} {
  func.func @_mlp1_kernel(%arg0: i32, %arg1: memref<1x2x2048xbf16, #tpu.memory_space<vmem>>, %arg2: memref<2048x128xbf16, #tpu.memory_space<vmem>>, %arg3: memref<1x128xf32, #tpu.memory_space<vmem>>, %arg4: memref<128x128xf32, #tpu.memory_space<vmem>>, %arg5: memref<4x2x128xf32, #tpu.memory_space<vmem>>, %arg6: memref<2x128xf32, #tpu.memory_space<vmem>>) attributes {dimension_semantics = [#tpu.dimension_semantics<arbitrary>], iteration_bounds = array<i64: 3>, scalar_prefetch = 0 : i64, scratch_operands = 1 : i64, tpu.core_type = #tpu.core_type<tc>, window_params = [{transform_indices = @transform_0, window_bounds = array<i64: 1, 2, 2048>}, {transform_indices = @transform_1, window_bounds = array<i64: 2048, 128>}, {pipeline_mode = #tpu.pipeline_mode<synchronous>, transform_indices = @transform_2, window_bounds = array<i64: 1, 128>}, {pipeline_mode = #tpu.pipeline_mode<synchronous>, transform_indices = @transform_3, window_bounds = array<i64: 128, 128>}, {pipeline_mode = #tpu.pipeline_mode<synchronous>, transform_indices = @transform_4, window_bounds = array<i64: 4, 2, 128>}]} {
    %c0_i32 = arith.constant 0 : i32
    %0 = arith.cmpi eq, %arg0, %c0_i32 : i32
    %1 = arith.extui %0 : i1 to i32
    %c0_i32_0 = arith.constant 0 : i32
    %2 = arith.cmpi ne, %1, %c0_i32_0 : i32
    scf.if %2 {
      %cst_10 = arith.constant 0.000000e+00 : f32
      %13 = vector.broadcast %cst_10 : f32 to vector<2x128xf32>
      %c0_11 = arith.constant 0 : index
      %c0_12 = arith.constant 0 : index
      %14 = vector.load %arg6[%c0_11, %c0_12] : memref<2x128xf32, #tpu.memory_space<vmem>>, vector<2x128xf32>
      tpu.vector_store %arg6[%c0_11, %c0_12], %13 {strides = array<i32>} : memref<2x128xf32, #tpu.memory_space<vmem>>, vector<2x128xf32>,
    } else {
    }
    %c0 = arith.constant 0 : index
    %c0_1 = arith.constant 0 : index
    %3 = vector.load %arg6[%c0, %c0_1] : memref<2x128xf32, #tpu.memory_space<vmem>>, vector<2x128xf32>
    %c0_2 = arith.constant 0 : index
    %c0_3 = arith.constant 0 : index
    %c0_4 = arith.constant 0 : index
    %4 = vector.load %arg1[%c0_2, %c0_3, %c0_4] : memref<1x2x2048xbf16, #tpu.memory_space<vmem>>, vector<1x2x2048xbf16>
    %5 = vector.shape_cast %4 : vector<1x2x2048xbf16> to vector<2x2048xbf16>
    %c0_5 = arith.constant 0 : index
    %c0_6 = arith.constant 0 : index
    %6 = vector.load %arg2[%c0_5, %c0_6] : memref<2048x128xbf16, #tpu.memory_space<vmem>>, vector<2048x128xbf16>
    %cst = arith.constant dense<0.000000e+00> : vector<2x128xf32>
    %7 = tpu.matmul %5, %6, %cst {dimension_numbers = #tpu.dot_dimension_numbers<[1], [0], [0], [1], [0, 0, 1, 1], [], []>} : vector<2x2048xbf16>, vector<2048x128xbf16>, vector<2x128xf32> -> vector<2x128xf32>
    %8 = arith.addf %3, %7 : vector<2x128xf32>
    %c0_7 = arith.constant 0 : index
    %c0_8 = arith.constant 0 : index
    %9 = vector.load %arg6[%c0_7, %c0_8] : memref<2x128xf32, #tpu.memory_space<vmem>>, vector<2x128xf32>
    tpu.vector_store %arg6[%c0_7, %c0_8], %8 {strides = array<i32>} : memref<2x128xf32, #tpu.memory_space<vmem>>, vector<2x128xf32>,
    %c2_i32 = arith.constant 2 : i32
    %10 = arith.cmpi eq, %arg0, %c2_i32 : i32
    %11 = arith.extui %10 : i1 to i32
    %c0_i32_9 = arith.constant 0 : i32
    %12 = arith.cmpi ne, %11, %c0_i32_9 : i32
    scf.if %12 {
      %c0_10 = arith.constant 0 : index
      %c0_11 = arith.constant 0 : index
      %13 = vector.load %arg6[%c0_10, %c0_11] : memref<2x128xf32, #tpu.memory_space<vmem>>, vector<2x128xf32>
      %c0_12 = arith.constant 0 : index
      %c0_13 = arith.constant 0 : index
      %14 = vector.load %arg3[%c0_12, %c0_13] : memref<1x128xf32, #tpu.memory_space<vmem>>, vector<1x128xf32>
      %15 = vector.broadcast %14 : vector<1x128xf32> to vector<2x128xf32>
      %16 = arith.addf %13, %15 : vector<2x128xf32>
      %cst_14 = arith.constant 0.000000e+00 : f32
      %17 = vector.broadcast %cst_14 : f32 to vector<2x128xf32>
      %18 = arith.maximumf %16, %17 : vector<2x128xf32>
      %c0_15 = arith.constant 0 : index
      %c0_16 = arith.constant 0 : index
      %19 = vector.load %arg4[%c0_15, %c0_16] : memref<128x128xf32, #tpu.memory_space<vmem>>, vector<128x128xf32>
      %cst_17 = arith.constant dense<0.000000e+00> : vector<2x128xf32>
      %20 = tpu.matmul %18, %19, %cst_17 {dimension_numbers = #tpu.dot_dimension_numbers<[1], [0], [0], [1], [0, 0, 1, 1], [], []>} : vector<2x128xf32>, vector<128x128xf32>, vector<2x128xf32> -> vector<2x128xf32>
      %c0_18 = arith.constant 0 : index
      %c0_19 = arith.constant 0 : index
      %c0_20 = arith.constant 0 : index
      %21 = vector.load %arg5[%c0_18, %c0_19, %c0_20] : memref<4x2x128xf32, #tpu.memory_space<vmem>>, vector<1x2x128xf32>
      %22 = vector.shape_cast %21 : vector<1x2x128xf32> to vector<2x128xf32>
      %23 = vector.shape_cast %20 : vector<2x128xf32> to vector<1x2x128xf32>
      tpu.vector_store %arg5[%c0_18, %c0_19, %c0_20], %23 {strides = array<i32>} : memref<4x2x128xf32, #tpu.memory_space<vmem>>, vector<1x2x128xf32>,
      %c1 = arith.constant 1 : index
      %c0_21 = arith.constant 0 : index
      %c0_22 = arith.constant 0 : index
      %24 = vector.load %arg5[%c1, %c0_21, %c0_22] : memref<4x2x128xf32, #tpu.memory_space<vmem>>, vector<1x2x128xf32>
      %25 = vector.shape_cast %24 : vector<1x2x128xf32> to vector<2x128xf32>
      %26 = vector.shape_cast %20 : vector<2x128xf32> to vector<1x2x128xf32>
      tpu.vector_store %arg5[%c1, %c0_21, %c0_22], %26 {strides = array<i32>} : memref<4x2x128xf32, #tpu.memory_space<vmem>>, vector<1x2x128xf32>,
      %c2 = arith.constant 2 : index
      %c0_23 = arith.constant 0 : index
      %c0_24 = arith.constant 0 : index
      %27 = vector.load %arg5[%c2, %c0_23, %c0_24] : memref<4x2x128xf32, #tpu.memory_space<vmem>>, vector<1x2x128xf32>
      %28 = vector.shape_cast %27 : vector<1x2x128xf32> to vector<2x128xf32>
      %29 = vector.shape_cast %20 : vector<2x128xf32> to vector<1x2x128xf32>
      tpu.vector_store %arg5[%c2, %c0_23, %c0_24], %29 {strides = array<i32>} : memref<4x2x128xf32, #tpu.memory_space<vmem>>, vector<1x2x128xf32>,
      %c3 = arith.constant 3 : index
      %c0_25 = arith.constant 0 : index
      %c0_26 = arith.constant 0 : index
      %30 = vector.load %arg5[%c3, %c0_25, %c0_26] : memref<4x2x128xf32, #tpu.memory_space<vmem>>, vector<1x2x128xf32>
      %31 = vector.shape_cast %30 : vector<1x2x128xf32> to vector<2x128xf32>
      %32 = vector.shape_cast %20 : vector<2x128xf32> to vector<1x2x128xf32>
      tpu.vector_store %arg5[%c3, %c0_25, %c0_26], %32 {strides = array<i32>} : memref<4x2x128xf32, #tpu.memory_space<vmem>>, vector<1x2x128xf32>,
    } else {
    }
    return
  }
  func.func @transform_0(%arg0: i32) -> (i32, i32, i32) {
    %c0_i32 = arith.constant 0 : i32
    %c0_i32_0 = arith.constant 0 : i32
    %c0_i32_1 = arith.constant 0 : i32
    return %arg0, %c0_i32, %c0_i32_0 : i32, i32, i32
  }
  func.func @transform_1(%arg0: i32) -> (i32, i32) {
    %c0_i32 = arith.constant 0 : i32
    %c0_i32_0 = arith.constant 0 : i32
    return %arg0, %c0_i32 : i32, i32
  }
  func.func @transform_2(%arg0: i32) -> (i32, i32) {
    %c0_i32 = arith.constant 0 : i32
    %c0_i32_0 = arith.constant 0 : i32
    %c0_i32_1 = arith.constant 0 : i32
    return %c0_i32, %c0_i32_0 : i32, i32
  }
  func.func @transform_3(%arg0: i32) -> (i32, i32) {
    %c0_i32 = arith.constant 0 : i32
    %c0_i32_0 = arith.constant 0 : i32
    %c0_i32_1 = arith.constant 0 : i32
    return %c0_i32, %c0_i32_0 : i32, i32
  }
  func.func @transform_4(%arg0: i32) -> (i32, i32, i32) {
    %c0_i32 = arith.constant 0 : i32
    %c0_i32_0 = arith.constant 0 : i32
    %c0_i32_1 = arith.constant 0 : i32
    %c0_i32_2 = arith.constant 0 : i32
    return %c0_i32, %c0_i32_0, %c0_i32_1 : i32, i32, i32
  }
}

module attributes {stable_mosaic.version = 11 : i64} {
  func.func @_mlp2_head_kernel(%arg0: i32, %arg1: memref<8x1024xbf16, #tpu.memory_space<vmem>>, %arg2: memref<1024x128xbf16, #tpu.memory_space<vmem>>, %arg3: memref<8x128xf32, #tpu.memory_space<vmem>>, %arg4: memref<1x128xf32, #tpu.memory_space<vmem>>, %arg5: memref<128x128xf32, #tpu.memory_space<vmem>>, %arg6: memref<1x128xf32, #tpu.memory_space<vmem>>, %arg7: memref<1x128xf32, #tpu.memory_space<vmem>>, %arg8: memref<1x1xf32, #tpu.memory_space<vmem>>, %arg9: memref<8x1xf32, #tpu.memory_space<vmem>>, %arg10: memref<8x128xf32, #tpu.memory_space<vmem>>) attributes {dimension_semantics = [#tpu.dimension_semantics<arbitrary>], iteration_bounds = array<i64: 2>, scalar_prefetch = 0 : i64, scratch_operands = 1 : i64, tpu.core_type = #tpu.core_type<tc>, window_params = [{transform_indices = @transform_0, window_bounds = array<i64: 8, 1024>}, {transform_indices = @transform_1, window_bounds = array<i64: 1024, 128>}, {pipeline_mode = #tpu.pipeline_mode<synchronous>, transform_indices = @transform_2, window_bounds = array<i64: 8, 128>}, {pipeline_mode = #tpu.pipeline_mode<synchronous>, transform_indices = @transform_3, window_bounds = array<i64: 1, 128>}, {pipeline_mode = #tpu.pipeline_mode<synchronous>, transform_indices = @transform_4, window_bounds = array<i64: 128, 128>}, {pipeline_mode = #tpu.pipeline_mode<synchronous>, transform_indices = @transform_5, window_bounds = array<i64: 1, 128>}, {pipeline_mode = #tpu.pipeline_mode<synchronous>, transform_indices = @transform_6, window_bounds = array<i64: 1, 128>}, {pipeline_mode = #tpu.pipeline_mode<synchronous>, transform_indices = @transform_7, window_bounds = array<i64: 1, 1>}, {pipeline_mode = #tpu.pipeline_mode<synchronous>, transform_indices = @transform_8, window_bounds = array<i64: 8, 1>}]} {
    %c0_i32 = arith.constant 0 : i32
    %0 = arith.cmpi eq, %arg0, %c0_i32 : i32
    %1 = arith.extui %0 : i1 to i32
    %c0_i32_0 = arith.constant 0 : i32
    %2 = arith.cmpi ne, %1, %c0_i32_0 : i32
    scf.if %2 {
      %cst_9 = arith.constant 0.000000e+00 : f32
      %12 = vector.broadcast %cst_9 : f32 to vector<8x128xf32>
      %c0_10 = arith.constant 0 : index
      %c0_11 = arith.constant 0 : index
      %13 = vector.load %arg10[%c0_10, %c0_11] : memref<8x128xf32, #tpu.memory_space<vmem>>, vector<8x128xf32>
      tpu.vector_store %arg10[%c0_10, %c0_11], %12 {strides = array<i32>} : memref<8x128xf32, #tpu.memory_space<vmem>>, vector<8x128xf32>,
    } else {
    }
    %c0 = arith.constant 0 : index
    %c0_1 = arith.constant 0 : index
    %3 = vector.load %arg10[%c0, %c0_1] : memref<8x128xf32, #tpu.memory_space<vmem>>, vector<8x128xf32>
    %c0_2 = arith.constant 0 : index
    %c0_3 = arith.constant 0 : index
    %4 = vector.load %arg1[%c0_2, %c0_3] : memref<8x1024xbf16, #tpu.memory_space<vmem>>, vector<8x1024xbf16>
    %c0_4 = arith.constant 0 : index
    %c0_5 = arith.constant 0 : index
    %5 = vector.load %arg2[%c0_4, %c0_5] : memref<1024x128xbf16, #tpu.memory_space<vmem>>, vector<1024x128xbf16>
    %cst = arith.constant dense<0.000000e+00> : vector<8x128xf32>
    %6 = tpu.matmul %4, %5, %cst {dimension_numbers = #tpu.dot_dimension_numbers<[1], [0], [0], [1], [0, 0, 1, 1], [], []>} : vector<8x1024xbf16>, vector<1024x128xbf16>, vector<8x128xf32> -> vector<8x128xf32>
    %7 = arith.addf %3, %6 : vector<8x128xf32>
    %c0_6 = arith.constant 0 : index
    %c0_7 = arith.constant 0 : index
    %8 = vector.load %arg10[%c0_6, %c0_7] : memref<8x128xf32, #tpu.memory_space<vmem>>, vector<8x128xf32>
    tpu.vector_store %arg10[%c0_6, %c0_7], %7 {strides = array<i32>} : memref<8x128xf32, #tpu.memory_space<vmem>>, vector<8x128xf32>,
    %c1_i32 = arith.constant 1 : i32
    %9 = arith.cmpi eq, %arg0, %c1_i32 : i32
    %10 = arith.extui %9 : i1 to i32
    %c0_i32_8 = arith.constant 0 : i32
    %11 = arith.cmpi ne, %10, %c0_i32_8 : i32
    scf.if %11 {
      %c0_9 = arith.constant 0 : index
      %c0_10 = arith.constant 0 : index
      %12 = vector.load %arg10[%c0_9, %c0_10] : memref<8x128xf32, #tpu.memory_space<vmem>>, vector<8x128xf32>
      %c0_11 = arith.constant 0 : index
      %c0_12 = arith.constant 0 : index
      %13 = vector.load %arg4[%c0_11, %c0_12] : memref<1x128xf32, #tpu.memory_space<vmem>>, vector<1x128xf32>
      %14 = vector.broadcast %13 : vector<1x128xf32> to vector<8x128xf32>
      %15 = arith.addf %12, %14 : vector<8x128xf32>
      %cst_13 = arith.constant 0.000000e+00 : f32
      %16 = vector.broadcast %cst_13 : f32 to vector<8x128xf32>
      %17 = arith.maximumf %15, %16 : vector<8x128xf32>
      %c0_14 = arith.constant 0 : index
      %c0_15 = arith.constant 0 : index
      %18 = vector.load %arg5[%c0_14, %c0_15] : memref<128x128xf32, #tpu.memory_space<vmem>>, vector<128x128xf32>
      %cst_16 = arith.constant dense<0.000000e+00> : vector<8x128xf32>
      %19 = tpu.matmul %17, %18, %cst_16 {dimension_numbers = #tpu.dot_dimension_numbers<[1], [0], [0], [1], [0, 0, 1, 1], [], []>} : vector<8x128xf32>, vector<128x128xf32>, vector<8x128xf32> -> vector<8x128xf32>
      %c0_17 = arith.constant 0 : index
      %c0_18 = arith.constant 0 : index
      %20 = vector.load %arg3[%c0_17, %c0_18] : memref<8x128xf32, #tpu.memory_space<vmem>>, vector<8x128xf32>
      %21 = arith.addf %19, %20 : vector<8x128xf32>
      %c0_19 = arith.constant 0 : index
      %c0_20 = arith.constant 0 : index
      %22 = vector.load %arg6[%c0_19, %c0_20] : memref<1x128xf32, #tpu.memory_space<vmem>>, vector<1x128xf32>
      %23 = vector.broadcast %22 : vector<1x128xf32> to vector<8x128xf32>
      %24 = arith.addf %21, %23 : vector<8x128xf32>
      %cst_21 = arith.constant 0.000000e+00 : f32
      %25 = vector.broadcast %cst_21 : f32 to vector<8x128xf32>
      %26 = arith.maximumf %24, %25 : vector<8x128xf32>
      %c0_22 = arith.constant 0 : index
      %c0_23 = arith.constant 0 : index
      %27 = vector.load %arg7[%c0_22, %c0_23] : memref<1x128xf32, #tpu.memory_space<vmem>>, vector<1x128xf32>
      %28 = vector.broadcast %27 : vector<1x128xf32> to vector<8x128xf32>
      %29 = arith.mulf %26, %28 : vector<8x128xf32>
      %cst_24 = arith.constant dense<0.000000e+00> : vector<8xf32>
      %30 = vector.multi_reduction <add>, %29, %cst_24 [1] : vector<8x128xf32> to vector<8xf32>
      %31 = vector.shape_cast %30 : vector<8xf32> to vector<8x1xf32>
      %c0_25 = arith.constant 0 : index
      %c0_26 = arith.constant 0 : index
      %32 = vector.load %arg8[%c0_25, %c0_26] : memref<1x1xf32, #tpu.memory_space<vmem>>, vector<1x1xf32>
      %33 = vector.broadcast %32 : vector<1x1xf32> to vector<8x1xf32>
      %34 = arith.addf %31, %33 : vector<8x1xf32>
      %c0_27 = arith.constant 0 : index
      %c0_28 = arith.constant 0 : index
      %35 = vector.load %arg9[%c0_27, %c0_28] : memref<8x1xf32, #tpu.memory_space<vmem>>, vector<8x1xf32>
      tpu.vector_store %arg9[%c0_27, %c0_28], %34 {strides = array<i32>} : memref<8x1xf32, #tpu.memory_space<vmem>>, vector<8x1xf32>,
    } else {
    }
    return
  }
  func.func @transform_0(%arg0: i32) -> (i32, i32) {
    %c0_i32 = arith.constant 0 : i32
    %c0_i32_0 = arith.constant 0 : i32
    return %c0_i32, %arg0 : i32, i32
  }
  func.func @transform_1(%arg0: i32) -> (i32, i32) {
    %c0_i32 = arith.constant 0 : i32
    %c0_i32_0 = arith.constant 0 : i32
    return %arg0, %c0_i32 : i32, i32
  }
  func.func @transform_2(%arg0: i32) -> (i32, i32) {
    %c0_i32 = arith.constant 0 : i32
    %c0_i32_0 = arith.constant 0 : i32
    %c0_i32_1 = arith.constant 0 : i32
    return %c0_i32, %c0_i32_0 : i32, i32
  }
  func.func @transform_3(%arg0: i32) -> (i32, i32) {
    %c0_i32 = arith.constant 0 : i32
    %c0_i32_0 = arith.constant 0 : i32
    %c0_i32_1 = arith.constant 0 : i32
    return %c0_i32, %c0_i32_0 : i32, i32
  }
  func.func @transform_4(%arg0: i32) -> (i32, i32) {
    %c0_i32 = arith.constant 0 : i32
    %c0_i32_0 = arith.constant 0 : i32
    %c0_i32_1 = arith.constant 0 : i32
    return %c0_i32, %c0_i32_0 : i32, i32
  }
  func.func @transform_5(%arg0: i32) -> (i32, i32) {
    %c0_i32 = arith.constant 0 : i32
    %c0_i32_0 = arith.constant 0 : i32
    %c0_i32_1 = arith.constant 0 : i32
    return %c0_i32, %c0_i32_0 : i32, i32
  }
  func.func @transform_6(%arg0: i32) -> (i32, i32) {
    %c0_i32 = arith.constant 0 : i32
    %c0_i32_0 = arith.constant 0 : i32
    %c0_i32_1 = arith.constant 0 : i32
    return %c0_i32, %c0_i32_0 : i32, i32
  }
  func.func @transform_7(%arg0: i32) -> (i32, i32) {
    %c0_i32 = arith.constant 0 : i32
    %c0_i32_0 = arith.constant 0 : i32
    %c0_i32_1 = arith.constant 0 : i32
    return %c0_i32, %c0_i32_0 : i32, i32
  }
  func.func @transform_8(%arg0: i32) -> (i32, i32) {
    %c0_i32 = arith.constant 0 : i32
    %c0_i32_0 = arith.constant 0 : i32
    %c0_i32_1 = arith.constant 0 : i32
    return %c0_i32, %c0_i32_0 : i32, i32
  }
}

</mosaic_0001>

<bundles_post_ra>
// kernel: three2i_forward.4
= control target key start
LH: loop header
LB: loop body
LE: loop exit
PB: predicated region body
PF: predicated region fallthrough
CT: control target
= control target key end

     0   :  { %s2396_s15 = smov 0   ;;  %s2641_s0 = inlined_call_operand.vmem [shape: bf16[3,2,2048], index: 0, kind: input, shape index: {}]   ;;  %s2642_s1 = inlined_call_operand.vmem [shape: bf16[6144,128], index: 1, kind: input, shape index: {}]   ;;  %s2643_s2 = inlined_call_operand.vmem [shape: f32[1,128], index: 2, kind: input, shape index: {}]   ;;  %s2644_s3 = inlined_call_operand.vmem [shape: f32[128,128], index: 3, kind: input, shape index: {}]   ;;  %s2645_s4 = inlined_call_operand.vmem [shape: f32[4,2,128], index: 4, kind: output, shape index: {}]  }
   0x1 LB: > { %s2402_s16 = sadd.s32 4294967295, %s2364_s15   ;;  %p1823_p0 = scmp.ge.s32.totalorder %s2364_s15, 1  ;;  %s2364_s15 = sphi %s2396_s15, %s14_s15  }
   0x2   : > { %p167_p1 = scmp.lt.s32.totalorder %s2364_s15, 4 }
   0x4   : > { %p168_p2 = pnand %p1823_p0, %p167_p1 }
   0x5   : > { %p192_p3 = scmp.lt.s32.totalorder (!%p168_p2), %s2402_s16, 2  ;;  %s1825_s17 = sshll.u32 (!%p168_p2), %s2402_s16, 8 }
   0x6   : > { %171 = sbr.rel (%p168_p2) target bundleno = 598 (0x256), region = 36  ;;  %p197_p4 = scmp.lt.s32.totalorder (!%p168_p2), %s1825_s17, 767 }
   0x7   : > { %p1827_p5 = scmp.ne.s32.totalorder (!%p168_p2), %s2402_s16, 0 }
   0xd   : > { %s193_s18 = scalar_select %p192_p3, %s2402_s16, 2 }
   0xe   : > { %s2647_s17 = smov (!%p197_p4, %s1825_s17), 767  ;;  %206 = sbr.rel (%p1827_p5) target bundleno = 21 (0x15), region = 40 }
   0xf   : > { %s1824_s19 = sshll.u32 %s193_s18, 4  ;;  %s1826_s23 = sshll.u32 %s2647_s17, 2  ;;  %v2366_v0 = vmov (!%p1827_p5), 0.0  }
  0x10   : > { %s2412_s22 = scalar_lea.vmem %s2641_s0, %s1824_s19  ;;  %s2417_s26 = scalar_lea.vmem %s2642_s1, %s1826_s23  ;;  %207 = vst [vmem:[#allocation2] sm:$0x3] (!%p1827_p5), %v2366_v0 }
  0x15 PF: > { %v2228_v1 = vld [vmem:[%s2417_s26 + $0x40] sm:$0xff]   ;;  %v2232_v5 = vld [vmem:[%s2417_s26 + $0x48] sm:$0xff]   ;;  %v2236_v9 = vld [vmem:[%s2417_s26 + $0x50] sm:$0xff]   ;;  %v473_v29 = vlaneseq  ;;  %v2367_v37 = vmov 1966171168   ;;  %p1956_p6 = scmp.ne.s32.totalorder %s2402_s16, 2 }
  0x16   : > { %v2229_v2 = vld [vmem:[%s2417_s26 + $0xc0] sm:$0xff]   ;;  %1963 = vmatprep.subr.bf16.mxu0 %v2228_v1  ;;  %v2233_v6 = vld [vmem:[%s2417_s26 + $0xc8] sm:$0xff]   ;;  %v2237_v10 = vld [vmem:[%s2417_s26 + $0xd0] sm:$0xff]   ;;  %v471_v38 = vunpack.c.l.s4 %v2367_v37  ;;  %vm2369_vm0 = vmmov (!%p1956_p6), 0  }
  0x17   : > { %v2230_v3 = vld [vmem:[%s2417_s26] sm:$0xff]   ;;  %1985 = vmatprep.subr.bf16.mxu1 %v2229_v2  ;;  %v2234_v7 = vld [vmem:[%s2417_s26 + $0x8] sm:$0xff]   ;;  %v2238_v11 = vld [vmem:[%s2417_s26 + $0x10] sm:$0xff]   ;;  %v474_v34 = vshrl.u32 %v473_v29, 7 }
  0x18   : > { %v2231_v4 = vld [vmem:[%s2417_s26 + $0x80] sm:$0xff]   ;;  %1964 = vmatpush3.bf16.msra.mxu0 %v2230_v3  ;;  %v2235_v8 = vld [vmem:[%s2417_s26 + $0x88] sm:$0xff]   ;;  %v2239_v12 = vld [vmem:[%s2417_s26 + $0x90] sm:$0xff]   ;;  %v472_v41 = vunpack.c.0.s8 %v471_v38 }
  0x19   : > { %1986 = vmatpush3.bf16.msra.mxu1 %v2231_v4  ;;  %1965 = vmatprep.subr.bf16.mxu0 %v2232_v5  ;;  %v2240_v13 = vld [vmem:[%s2417_s26 + $0x58] sm:$0xff]   ;;  %v2244_v17 = vld [vmem:[%s2417_s26 + $0x60] sm:$0xff]   ;;  %v2248_v21 = vld [vmem:[%s2417_s26 + $0x68] sm:$0xff]  }
  0x1a   : > { %1987 = vmatprep.subr.bf16.mxu1 %v2233_v6  ;;  %v2241_v14 = vld [vmem:[%s2417_s26 + $0xd8] sm:$0xff]   ;;  %v2245_v18 = vld [vmem:[%s2417_s26 + $0xe0] sm:$0xff]   ;;  %v2249_v22 = vld [vmem:[%s2417_s26 + $0xe8] sm:$0xff]   ;;  %v2455_v42 = vsub.s32 %v472_v41, %v474_v34 }
  0x1b   : > { %v2242_v15 = vld [vmem:[%s2417_s26 + $0x18] sm:$0xff]   ;;  %v2246_v19 = vld [vmem:[%s2417_s26 + $0x20] sm:$0xff]   ;;  %v2250_v23 = vld [vmem:[%s2417_s26 + $0x28] sm:$0xff]  }
  0x1c   : > { %1966 = vmatpush3.bf16.msra.mxu0 %v2234_v7  ;;  %v2243_v16 = vld [vmem:[%s2417_s26 + $0x98] sm:$0xff]   ;;  %v2247_v20 = vld [vmem:[%s2417_s26 + $0xa0] sm:$0xff]   ;;  %v2251_v24 = vld [vmem:[%s2417_s26 + $0xa8] sm:$0xff]  }
  0x1d   : > { %1988 = vmatpush3.bf16.msra.mxu1 %v2235_v8  ;;  %1967 = vmatprep.subr.bf16.mxu0 %v2236_v9  ;;  %v2252_v25 = vld [vmem:[%s2417_s26 + $0x70] sm:$0xff]   ;;  %v2256_v30 = vld [vmem:[%s2417_s26 + $0x78] sm:$0xff]   ;;  %v209_v35 = vld [vmem:[%s2412_s22] sm:$0xff] }
  0x1e   : > { %1989 = vmatprep.subr.bf16.mxu1 %v2237_v10  ;;  %v2253_v26 = vld [vmem:[%s2417_s26 + $0xf0] sm:$0xff]   ;;  %v2257_v31 = vld [vmem:[%s2417_s26 + $0xf8] sm:$0xff]   ;;  %v2261_v36 = vld [vmem:[%s2417_s26 + $0x140] sm:$0xff]   ;;  %v469_v40 = vcombine.high %v209_v35, %v209_v35  ;;  %v476_v43 = vrot.slane %v209_v35, %v2455_v42 }
  0x1f   : > { %v2254_v27 = vld [vmem:[%s2417_s26 + $0x30] sm:$0xff]   ;;  %v2258_v32 = vld [vmem:[%s2417_s26 + $0x38] sm:$0xff]   ;;  %v2262_v39 = vld [vmem:[%s2417_s26 + $0x1c0] sm:$0xff]  }
  0x20   : > { %1968 = vmatpush3.bf16.msra.mxu0 %v2238_v11  ;;  %v2255_v28 = vld [vmem:[%s2417_s26 + $0xb0] sm:$0xff]   ;;  %v2259_v33 = vld [vmem:[%s2417_s26 + $0xb8] sm:$0xff]   ;;  %v2459_v44 = vrot.slane %v469_v40, %v2455_v42  ;;  %v484_v45 = vcombine.high %v476_v43, %v476_v43  ;;  %v492_v46 = vrot.slane %v476_v43, %v2455_v42  ;;  %v2263_v49 = vld [vmem:[%s2417_s26 + $0x100] sm:$0xff]  }
  0x21   : > { %1990 = vmatpush3.bf16.msra.mxu1 %v2239_v12  ;;  %1969 = vmatprep.subr.bf16.mxu0 %v2240_v13  ;;  %v2265_v52 = vld [vmem:[%s2417_s26 + $0x148] sm:$0xff]   ;;  %v2264_v54 = vld [vmem:[%s2417_s26 + $0x180] sm:$0xff]   ;;  %v2269_v58 = vld [vmem:[%s2417_s26 + $0x150] sm:$0xff]  }
  0x22   : > { %1991 = vmatprep.subr.bf16.mxu1 %v2241_v14  ;;  %v485_v47 = vcombine.high %v2459_v44, %v2459_v44  ;;  %v506_v48 = vrot.slane %v484_v45, %v2455_v42  ;;  %v514_v51 = vcombine.high %v492_v46, %v492_v46  ;;  %v2266_v55 = vld [vmem:[%s2417_s26 + $0x1c8] sm:$0xff]   ;;  %v2270_v60 = vld [vmem:[%s2417_s26 + $0x1d0] sm:$0xff]   ;;  %v2273_v62 = vld [vmem:[%s2417_s26 + $0x158] sm:$0xff]  }
  0x23   : > { %v2267_v57 = vld [vmem:[%s2417_s26 + $0x108] sm:$0xff]   ;;  %v2271_v61 = vld [vmem:[%s2417_s26 + $0x110] sm:$0xff]   ;;  %v2274_v0 = vld [vmem:[%s2417_s26 + $0x1d8] sm:$0xff]  }
  0x24   : > { %1970 = vmatpush3.bf16.msra.mxu0 %v2242_v15  ;;  %v513_v50 = vrot.slane %v485_v47, %v2455_v42  ;;  %1383 = vmatprep.mubr.bf16.mxu0 %v506_v48  ;;  %v516_v53 = vcombine.high %v506_v48, %v506_v48  ;;  %v2268_v59 = vld [vmem:[%s2417_s26 + $0x188] sm:$0xff]   ;;  %v2272_v63 = vld [vmem:[%s2417_s26 + $0x190] sm:$0xff]   ;;  %v2275_v1 = vld [vmem:[%s2417_s26 + $0x118] sm:$0xff]  }
  0x25   : > { %1992 = vmatpush3.bf16.msra.mxu1 %v2243_v16  ;;  %1971 = vmatprep.subr.bf16.mxu0 %v2244_v17  ;;  %v2277_v2 = vld [vmem:[%s2417_s26 + $0x160] sm:$0xff]   ;;  %v2276_v3 = vld [vmem:[%s2417_s26 + $0x198] sm:$0xff]   ;;  %v2281_v6 = vld [vmem:[%s2417_s26 + $0x168] sm:$0xff]  }
  0x26   : > { %1993 = vmatprep.subr.bf16.mxu1 %v2245_v18  ;;  %v517_v56 = vcombine.high %v513_v50, %v513_v50  ;;  %1423 = vmatprep.mubr.bf16.mxu1 %v516_v53  ;;  %v2278_v4 = vld [vmem:[%s2417_s26 + $0x1e0] sm:$0xff]   ;;  %v2282_v8 = vld [vmem:[%s2417_s26 + $0x1e8] sm:$0xff]   ;;  %v2285_v10 = vld [vmem:[%s2417_s26 + $0x170] sm:$0xff]   ;;  %v499_v18 = vrot.slane %v2459_v44, %v2455_v42 }
  0x27   : > { %v2279_v5 = vld [vmem:[%s2417_s26 + $0x120] sm:$0xff]   ;;  %v2283_v9 = vld [vmem:[%s2417_s26 + $0x128] sm:$0xff]   ;;  %v2286_v12 = vld [vmem:[%s2417_s26 + $0x1f0] sm:$0xff]  }
  0x28   : > { %1972 = vmatpush3.bf16.msra.mxu0 %v2246_v19  ;;  %v2280_v7 = vld [vmem:[%s2417_s26 + $0x1a0] sm:$0xff]   ;;  %v2284_v11 = vld [vmem:[%s2417_s26 + $0x1a8] sm:$0xff]   ;;  %v2287_v13 = vld [vmem:[%s2417_s26 + $0x130] sm:$0xff]  }
  0x29   : > { %1994 = vmatpush3.bf16.msra.mxu1 %v2247_v20  ;;  %1973 = vmatprep.subr.bf16.mxu0 %v2248_v21  ;;  %v2289_v14 = vld [vmem:[%s2417_s26 + $0x178] sm:$0xff]   ;;  %v2288_v15 = vld [vmem:[%s2417_s26 + $0x1b0] sm:$0xff]   ;;  %v2293_v19 = vld [vmem:[%s2417_s26 + $0x240] sm:$0xff]  }
  0x2a   : > { %1995 = vmatprep.subr.bf16.mxu1 %v2249_v22  ;;  %v2290_v16 = vld [vmem:[%s2417_s26 + $0x1f8] sm:$0xff]   ;;  %v2294_v21 = vld [vmem:[%s2417_s26 + $0x2c0] sm:$0xff]   ;;  %v2300_v29 = vld [vmem:[%s2417_s26 + $0x288] sm:$0xff]  }
  0x2b   : > { %v2291_v17 = vld [vmem:[%s2417_s26 + $0x138] sm:$0xff]   ;;  %v2295_v22 = vld [vmem:[%s2417_s26 + $0x200] sm:$0xff]   ;;  %v2313_v40 = vld [vmem:[%s2417_s26 + $0x268] sm:$0xff]  }
  0x2c   : > { %1974 = vmatpush3.bf16.msra.mxu0 %v2250_v23  ;;  %v2292_v20 = vld [vmem:[%s2417_s26 + $0x1b8] sm:$0xff]   ;;  %v515_v23 = vcombine.high %v499_v18, %v499_v18  ;;  %v2310_v38 = vld [vmem:[%s2417_s26 + $0x2e0] sm:$0xff]   ;;  %v2314_v43 = vld [vmem:[%s2417_s26 + $0x2e8] sm:$0xff]  }
  0x2d   : > { %1996 = vmatpush3.bf16.msra.mxu1 %v2251_v24  ;;  %1975 = vmatprep.subr.bf16.mxu0 %v2252_v25  ;;  %v2297_v24 = vld [vmem:[%s2417_s26 + $0x248] sm:$0xff]   ;;  %v2296_v25 = vld [vmem:[%s2417_s26 + $0x280] sm:$0xff]   ;;  %v2306_v34 = vld [vmem:[%s2417_s26 + $0x2d8] sm:$0xff]  }
  0x2e   : > { %1997 = vmatprep.subr.bf16.mxu1 %v2253_v26  ;;  %v2298_v26 = vld [vmem:[%s2417_s26 + $0x2c8] sm:$0xff]   ;;  %v2307_v35 = vld [vmem:[%s2417_s26 + $0x218] sm:$0xff]   ;;  %v2312_v41 = vld [vmem:[%s2417_s26 + $0x2a0] sm:$0xff]  }
  0x2f   : > { %v2308_v37 = vld [vmem:[%s2417_s26 + $0x298] sm:$0xff]   ;;  %v2315_v44 = vld [vmem:[%s2417_s26 + $0x228] sm:$0xff]   ;;  %v2317_v45 = vld [vmem:[%s2417_s26 + $0x270] sm:$0xff]  }
  0x30   : > { %1976 = vmatpush3.bf16.msra.mxu0 %v2254_v27  ;;  %v2299_v27 = vld [vmem:[%s2417_s26 + $0x208] sm:$0xff]  }
  0x31   : > { %1998 = vmatpush3.bf16.msra.mxu1 %v2255_v28  ;;  %1977 = vmatprep.subr.bf16.mxu0 %v2256_v30  ;;  %v2301_v28 = vld [vmem:[%s2417_s26 + $0x250] sm:$0xff]   ;;  %v2316_v47 = vld [vmem:[%s2417_s26 + $0x2a8] sm:$0xff]  }
  0x32   : > { %1999 = vmatprep.subr.bf16.mxu1 %v2257_v31  ;;  %v2302_v30 = vld [vmem:[%s2417_s26 + $0x2d0] sm:$0xff]  }
  0x33   : > { %v2303_v31 = vld [vmem:[%s2417_s26 + $0x210] sm:$0xff]  }
  0x34   : > { %1978 = vmatpush3.bf16.msra.mxu0 %v2258_v32  ;;  %v2305_v32 = vld [vmem:[%s2417_s26 + $0x258] sm:$0xff]  }
  0x35   : > { %2000 = vmatpush3.bf16.msra.mxu1 %v2259_v33  ;;  %2007 = vmatprep.subr.bf16.mxu0 %v2261_v36  ;;  %v2304_v33 = vld [vmem:[%s2417_s26 + $0x290] sm:$0xff]   ;;  %v2309_v36 = vld [vmem:[%s2417_s26 + $0x260] sm:$0xff]  }
  0x36   : > { %2029 = vmatprep.subr.bf16.mxu1 %v2262_v39  ;;  %v2311_v39 = vld [vmem:[%s2417_s26 + $0x220] sm:$0xff]  }
  0x37   : > { %1384 = vmatmul.mubr.bf16.vlgmr.msra.gmra.mrb[0].mxu0 %v492_v46  ;;  %v210_v46 = vld [vmem:[%s2412_s22 + $0x8] sm:$0xff] }
  0x38   : > { %2008 = vmatpush3.bf16.msra.mxu0 %v2263_v49  ;;  %1424 = vmatmul.mubr.bf16.vlgmr.msra.gmra.mrb[0].mxu1 %v514_v51  ;;  %v525_v48 = vrot.slane %v210_v46, %v2455_v42  ;;  %v518_v49 = vcombine.high %v210_v46, %v210_v46  ;;  %v2319_v51 = vld [vmem:[%s2417_s26 + $0x230] sm:$0xff]  }
  0x39   : > { %2009 = vmatprep.subr.bf16.mxu0 %v2265_v52  ;;  %2030 = vmatpush3.bf16.msra.mxu1 %v2264_v54  ;;  %v2321_v54 = vld [vmem:[%s2417_s26 + $0x278] sm:$0xff]  }
  0x3a   : > { %1463 = vmatprep.mubr.bf16.mxu0 %v513_v50  ;;  %2031 = vmatprep.subr.bf16.mxu1 %v2266_v55  ;;  %v2318_v50 = vld [vmem:[%s2417_s26 + $0x2f0] sm:$0xff]   ;;  %v533_v52 = vcombine.high %v525_v48, %v525_v48  ;;  %v2528_v53 = vrot.slane %v518_v49, %v2455_v42 }
  0x3b   : > { %1503 = vmatprep.mubr.bf16.mxu1 %v517_v56  ;;  %v2320_v55 = vld [vmem:[%s2417_s26 + $0x2b0] sm:$0xff]  }
  0x3c   : > { %2010 = vmatpush3.bf16.msra.mxu0 %v2267_v57  ;;  %v555_v56 = vrot.slane %v533_v52, %v2455_v42  ;;  %v534_v57 = vcombine.high %v2528_v53, %v2528_v53 }
  0x3d   : > { %2011 = vmatprep.subr.bf16.mxu0 %v2269_v58  ;;  %2032 = vmatpush3.bf16.msra.mxu1 %v2268_v59  ;;  %v2322_v58 = vld [vmem:[%s2417_s26 + $0x2f8] sm:$0xff]  }
  0x3e   : > { %2033 = vmatprep.subr.bf16.mxu1 %v2270_v60  ;;  %v2323_v59 = vld [vmem:[%s2417_s26 + $0x238] sm:$0xff]   ;;  %v565_v60 = vcombine.high %v555_v56, %v555_v56 }
  0x40   : > { %2012 = vmatpush3.bf16.msra.mxu0 %v2271_v61  ;;  %v541_v61 = vrot.slane %v525_v48, %v2455_v42 }
  0x41   : > { %2013 = vmatprep.subr.bf16.mxu0 %v2273_v62  ;;  %2034 = vmatpush3.bf16.msra.mxu1 %v2272_v63  ;;  %v2325_v62 = vld [vmem:[%s2417_s26 + $0x340] sm:$0xff]   ;;  %v2324_v63 = vld [vmem:[%s2417_s26 + $0x2b8] sm:$0xff]  }
  0x42   : > { %2035 = vmatprep.subr.bf16.mxu1 %v2274_v0  ;;  %v562_v0 = vrot.slane %v534_v57, %v2455_v42 }
  0x44   : > { %2014 = vmatpush3.bf16.msra.mxu0 %v2275_v1  ;;  %v2326_v1 = vld [vmem:[%s2417_s26 + $0x3c0] sm:$0xff]  }
  0x45   : > { %2015 = vmatprep.subr.bf16.mxu0 %v2277_v2  ;;  %2036 = vmatpush3.bf16.msra.mxu1 %v2276_v3  ;;  %v2327_v2 = vld [vmem:[%s2417_s26 + $0x300] sm:$0xff]   ;;  %v563_v3 = vcombine.high %v541_v61, %v541_v61 }
  0x46   : > { %2037 = vmatprep.subr.bf16.mxu1 %v2278_v4  ;;  %v2329_v4 = vld [vmem:[%s2417_s26 + $0x348] sm:$0xff]  }
  0x48   : > { %2016 = vmatpush3.bf16.msra.mxu0 %v2279_v5  ;;  %v2328_v5 = vld [vmem:[%s2417_s26 + $0x380] sm:$0xff]  }
  0x49   : > { %2017 = vmatprep.subr.bf16.mxu0 %v2281_v6  ;;  %2038 = vmatpush3.bf16.msra.mxu1 %v2280_v7  ;;  %v566_v6 = vcombine.high %v562_v0, %v562_v0  ;;  %v2330_v7 = vld [vmem:[%s2417_s26 + $0x3c8] sm:$0xff]  }
  0x4a   : > { %2039 = vmatprep.subr.bf16.mxu1 %v2282_v8  ;;  %v2331_v8 = vld [vmem:[%s2417_s26 + $0x308] sm:$0xff]  }
  0x4c   : > { %2018 = vmatpush3.bf16.msra.mxu0 %v2283_v9  ;;  %v2333_v9 = vld [vmem:[%s2417_s26 + $0x350] sm:$0xff]  }
  0x4d   : > { %2019 = vmatprep.subr.bf16.mxu0 %v2285_v10  ;;  %2040 = vmatpush3.bf16.msra.mxu1 %v2284_v11  ;;  %v2332_v10 = vld [vmem:[%s2417_s26 + $0x388] sm:$0xff]   ;;  %v2334_v11 = vld [vmem:[%s2417_s26 + $0x3d0] sm:$0xff]  }
  0x4e   : > { %2041 = vmatprep.subr.bf16.mxu1 %v2286_v12  ;;  %v2335_v12 = vld [vmem:[%s2417_s26 + $0x310] sm:$0xff]  }
  0x50   : > { %2020 = vmatpush3.bf16.msra.mxu0 %v2287_v13  ;;  %v2337_v13 = vld [vmem:[%s2417_s26 + $0x358] sm:$0xff]  }
  0x51   : > { %2021 = vmatprep.subr.bf16.mxu0 %v2289_v14  ;;  %2042 = vmatpush3.bf16.msra.mxu1 %v2288_v15  ;;  %v2336_v14 = vld [vmem:[%s2417_s26 + $0x390] sm:$0xff]   ;;  %v2338_v15 = vld [vmem:[%s2417_s26 + $0x3d8] sm:$0xff]  }
  0x52   : > { %2043 = vmatprep.subr.bf16.mxu1 %v2290_v16  ;;  %v2339_v16 = vld [vmem:[%s2417_s26 + $0x318] sm:$0xff]  }
  0x54   : > { %2022 = vmatpush3.bf16.msra.mxu0 %v2291_v17  ;;  %v2341_v17 = vld [vmem:[%s2417_s26 + $0x360] sm:$0xff]  }
  0x55   : > { %2051 = vmatprep.subr.bf16.mxu0 %v2293_v19  ;;  %2044 = vmatpush3.bf16.msra.mxu1 %v2292_v20  ;;  %v2342_v19 = vld [vmem:[%s2417_s26 + $0x3e0] sm:$0xff]  }
  0x56   : > { %2073 = vmatprep.subr.bf16.mxu1 %v2294_v21  ;;  %v2343_v20 = vld [vmem:[%s2417_s26 + $0x320] sm:$0xff]   ;;  %v2345_v21 = vld [vmem:[%s2417_s26 + $0x368] sm:$0xff]  }
  0x57   : > { %1464 = vmatmul.mubr.bf16.vlgmr.msra.gmra.mrb[4].mxu0 %v499_v18  ;;  %v2340_v18 = vld [vmem:[%s2417_s26 + $0x398] sm:$0xff]  }
  0x58   : > { %2052 = vmatpush3.bf16.msra.mxu0 %v2295_v22  ;;  %1504 = vmatmul.mubr.bf16.vlgmr.msra.gmra.mrb[4].mxu1 %v515_v23  ;;  %v2344_v22 = vld [vmem:[%s2417_s26 + $0x3a0] sm:$0xff]   ;;  %v2346_v23 = vld [vmem:[%s2417_s26 + $0x3e8] sm:$0xff]  }
  0x59   : > { %2053 = vmatprep.subr.bf16.mxu0 %v2297_v24  ;;  %2074 = vmatpush3.bf16.msra.mxu1 %v2296_v25  ;;  %v2347_v24 = vld [vmem:[%s2417_s26 + $0x328] sm:$0xff]   ;;  %v2349_v25 = vld [vmem:[%s2417_s26 + $0x370] sm:$0xff]  }
  0x5a   : > { %2075 = vmatprep.subr.bf16.mxu1 %v2298_v26  ;;  %1543 = vmatprep.mubr.bf16.mxu0 %v555_v56  ;;  %v2348_v26 = vld [vmem:[%s2417_s26 + $0x3a8] sm:$0xff]  }
  0x5b   : > { %1583 = vmatprep.mubr.bf16.mxu1 %v565_v60 }
  0x5c   : > { %2054 = vmatpush3.bf16.msra.mxu0 %v2299_v27  ;;  %v2350_v27 = vld [vmem:[%s2417_s26 + $0x3f0] sm:$0xff]  }
  0x5d   : > { %2055 = vmatprep.subr.bf16.mxu0 %v2301_v28  ;;  %2076 = vmatpush3.bf16.msra.mxu1 %v2300_v29  ;;  %v2351_v28 = vld [vmem:[%s2417_s26 + $0x330] sm:$0xff]   ;;  %v2353_v29 = vld [vmem:[%s2417_s26 + $0x378] sm:$0xff]  }
  0x5e   : > { %2077 = vmatprep.subr.bf16.mxu1 %v2302_v30  ;;  %v2352_v30 = vld [vmem:[%s2417_s26 + $0x3b0] sm:$0xff]  }
  0x60   : > { %2056 = vmatpush3.bf16.msra.mxu0 %v2303_v31  ;;  %v2354_v31 = vld [vmem:[%s2417_s26 + $0x3f8] sm:$0xff]  }
  0x61   : > { %2057 = vmatprep.subr.bf16.mxu0 %v2305_v32  ;;  %2078 = vmatpush3.bf16.msra.mxu1 %v2304_v33  ;;  %v2355_v32 = vld [vmem:[%s2417_s26 + $0x338] sm:$0xff]   ;;  %v548_v33 = vrot.slane %v2528_v53, %v2455_v42 }
  0x62   : > { %2079 = vmatprep.subr.bf16.mxu1 %v2306_v34  ;;  %v2356_v34 = vld [vmem:[%s2417_s26 + $0x3b8] sm:$0xff]  }
  0x64   : > { %2058 = vmatpush3.bf16.msra.mxu0 %v2307_v35  ;;  %v564_v35 = vcombine.high %v548_v33, %v548_v33 }
  0x65   : > { %2059 = vmatprep.subr.bf16.mxu0 %v2309_v36  ;;  %2080 = vmatpush3.bf16.msra.mxu1 %v2308_v37 }
  0x66   : > { %2081 = vmatprep.subr.bf16.mxu1 %v2310_v38 }
  0x68   : > { %2060 = vmatpush3.bf16.msra.mxu0 %v2311_v39 }
  0x69   : > { %2061 = vmatprep.subr.bf16.mxu0 %v2313_v40  ;;  %2082 = vmatpush3.bf16.msra.mxu1 %v2312_v41 }
  0x6a   : > { %2083 = vmatprep.subr.bf16.mxu1 %v2314_v43 }
  0x6c   : > { %2062 = vmatpush3.bf16.msra.mxu0 %v2315_v44 }
  0x6d   : > { %2063 = vmatprep.subr.bf16.mxu0 %v2317_v45  ;;  %2084 = vmatpush3.bf16.msra.mxu1 %v2316_v47 }
  0x6e   : > { %2085 = vmatprep.subr.bf16.mxu1 %v2318_v50 }
  0x70   : > { %2064 = vmatpush3.bf16.msra.mxu0 %v2319_v51 }
  0x71   : > { %2065 = vmatprep.subr.bf16.mxu0 %v2321_v54  ;;  %2086 = vmatpush3.bf16.msra.mxu1 %v2320_v55 }
  0x72   : > { %2087 = vmatprep.subr.bf16.mxu1 %v2322_v58 }
  0x74   : > { %2066 = vmatpush3.bf16.msra.mxu0 %v2323_v59 }
  0x75   : > { %2095 = vmatprep.subr.bf16.mxu0 %v2325_v62  ;;  %2088 = vmatpush3.bf16.msra.mxu1 %v2324_v63 }
  0x76   : > { %2117 = vmatprep.subr.bf16.mxu1 %v2326_v1 }
  0x77   : > { %1544 = vmatmul.mubr.bf16.vlgmr.msra.gmra.mrb[8].mxu0 %v541_v61 }
  0x78   : > { %2096 = vmatpush3.bf16.msra.mxu0 %v2327_v2  ;;  %1623 = vmatprep.mubr.bf16.mxu0 %v562_v0 }
  0x79   : > { %1584 = vmatmul.mubr.bf16.vlgmr.msra.gmra.mrb[8].mxu1 %v563_v3  ;;  %2097 = vmatprep.subr.bf16.mxu0 %v2329_v4 }
  0x7a   : > { %2118 = vmatpush3.bf16.msra.mxu1 %v2328_v5  ;;  %1663 = vmatprep.mubr.bf16.mxu1 %v566_v6 }
  0x7b   : > { %2119 = vmatprep.subr.bf16.mxu1 %v2330_v7 }
  0x7c   : > { %2098 = vmatpush3.bf16.msra.mxu0 %v2331_v8 }
  0x7d   : > { %2099 = vmatprep.subr.bf16.mxu0 %v2333_v9 }
  0x7e   : > { %2120 = vmatpush3.bf16.msra.mxu1 %v2332_v10 }
  0x7f   : > { %2121 = vmatprep.subr.bf16.mxu1 %v2334_v11 }
  0x80   : > { %2100 = vmatpush3.bf16.msra.mxu0 %v2335_v12 }
  0x81   : > { %2101 = vmatprep.subr.bf16.mxu0 %v2337_v13 }
  0x82   : > { %2122 = vmatpush3.bf16.msra.mxu1 %v2336_v14 }
  0x83   : > { %2123 = vmatprep.subr.bf16.mxu1 %v2338_v15 }
  0x84   : > { %2102 = vmatpush3.bf16.msra.mxu0 %v2339_v16 }
  0x85   : > { %2103 = vmatprep.subr.bf16.mxu0 %v2341_v17  ;;  %v208_v17 = vld [vmem:[#allocation2] sm:$0x3] }
  0x86   : > { %2124 = vmatpush3.bf16.msra.mxu1 %v2340_v18 }
  0x87   : > { %2125 = vmatprep.subr.bf16.mxu1 %v2342_v19 }
  0x88   : > { %2104 = vmatpush3.bf16.msra.mxu0 %v2343_v20 }
  0x89   : > { %2105 = vmatprep.subr.bf16.mxu0 %v2345_v21  ;;  %v1687_v21 = vld [vmem:[%s2644_s3] sm:$0xff] (!%p1956_p6) }
  0x8a   : > { %2126 = vmatpush3.bf16.msra.mxu1 %v2344_v22  ;;  %v1688_v22 = vld [vmem:[%s2644_s3 + $0x8] sm:$0xff] (!%p1956_p6) }
  0x8b   : > { %2127 = vmatprep.subr.bf16.mxu1 %v2346_v23  ;;  %v1689_v23 = vld [vmem:[%s2644_s3 + $0x10] sm:$0xff] (!%p1956_p6) }
  0x8c   : > { %2106 = vmatpush3.bf16.msra.mxu0 %v2347_v24  ;;  %v2368_v24 = vmov (!%p1956_p6), 0.0|0.0  }
  0x8d   : > { %2107 = vmatprep.subr.bf16.mxu0 %v2349_v25  ;;  %v2192_v25 = vpack.c.bf16 (!%p1956_p6), %v1688_v22, %v1687_v21 }
  0x8e   : > { %2128 = vmatpush3.bf16.msra.mxu1 %v2348_v26  ;;  %v1690_v26 = vld [vmem:[%s2644_s3 + $0x18] sm:$0xff] (!%p1956_p6) }
  0x8f   : > { %2129 = vmatprep.subr.bf16.mxu1 %v2350_v27  ;;  %v2370_v27 = vmov (!%p1956_p6), 0.0  }
  0x90   : > { %2108 = vmatpush3.bf16.msra.mxu0 %v2351_v28  ;;  %v2195_v28 = vpack.c.bf16 (!%p1956_p6), %v1690_v26, %v1689_v23 }
  0x91   : > { %2109 = vmatprep.subr.bf16.mxu0 %v2353_v29  ;;  %v1691_v29 = vld [vmem:[%s2644_s3 + $0x20] sm:$0xff] (!%p1956_p6) }
  0x92   : > { %2130 = vmatpush3.bf16.msra.mxu1 %v2352_v30  ;;  %v1692_v30 = vld [vmem:[%s2644_s3 + $0x28] sm:$0xff] (!%p1956_p6) }
  0x93   : > { %2131 = vmatprep.subr.bf16.mxu1 %v2354_v31  ;;  %v2198_v31 = vpack.c.bf16 (!%p1956_p6), %v1692_v30, %v1691_v29 }
  0x94   : > { %2110 = vmatpush3.bf16.msra.mxu0 %v2355_v32  ;;  %v1693_v32 = vld [vmem:[%s2644_s3 + $0x30] sm:$0xff] (!%p1956_p6) }
  0x95   : > { %2191 = vmatprep.subr.bf16.mxu0 (!%p1956_p6), %v2368_v24 }
  0x96   : > { %2132 = vmatpush3.bf16.msra.mxu1 %v2356_v34 }
  0x97   : > { %1624 = vmatmul.mubr.bf16.vlgmr.msra.gmra.mrb[12].mxu0 %v548_v33  ;;  %v1694_v33 = vld [vmem:[%s2644_s3 + $0x38] sm:$0xff] (!%p1956_p6) }
  0x98   : > { %2188 = vmatprep.mubr.msk.f32.mxu0 (!%p1956_p6), %vm2369_vm0, %v2370_v27  ;;  %2193 = vmatpush3.bf16.msra.mxu0 (!%p1956_p6), %v2192_v25  ;;  %v2201_v34 = vpack.c.bf16 (!%p1956_p6), %v1694_v33, %v1693_v32 }
  0x99   : > { %1664 = vmatmul.mubr.bf16.vlgmr.msra.gmra.mrb[12].mxu1 %v564_v35  ;;  %2194 = vmatprep.subr.bf16.mxu0 (!%p1956_p6), %v2368_v24  ;;  %v1695_v35 = vld [vmem:[%s2644_s3 + $0x40] sm:$0xff] (!%p1956_p6) }
  0x9c   : > { %2196 = vmatpush3.bf16.msra.mxu0 (!%p1956_p6), %v2195_v28 }
  0x9d   : > { %2197 = vmatprep.subr.bf16.mxu0 (!%p1956_p6), %v2368_v24 }
  0xa0   : > { %2199 = vmatpush3.bf16.msra.mxu0 (!%p1956_p6), %v2198_v31 }
  0xa1   : > { %2200 = vmatprep.subr.bf16.mxu0 (!%p1956_p6), %v2368_v24 }
  0xa4   : > { %2202 = vmatpush3.bf16.msra.mxu0 (!%p1956_p6), %v2201_v34 }
  0xa5   : > { %2203 = vmatprep.subr.bf16.mxu0 (!%p1956_p6), %v2368_v24 }
 0x10a   : > { %v1979_v36 = vpop.f32.mrb[0].mxu0 }
 0x10b   : > { %v1980_v37 = vpop.f32.mrb[1].mxu0  ;;  %v2001_v38 = vpop.f32.mrb[0].mxu1 }
 0x10c   : > { %v1981_v39 = vadd.f32 %v1980_v37, %v1979_v36  ;;  %v1982_v40 = vpop.f32.mrb[2].mxu0  ;;  %v2002_v41 = vpop.f32.mrb[1].mxu1  ;;  %v1696_v36 = vld [vmem:[%s2644_s3 + $0x48] sm:$0xff] (!%p1956_p6) }
 0x10d   : > { %v1983_v43 = vpop.f32.mrb[3].mxu0  ;;  %v2003_v44 = vadd.f32 %v2002_v41, %v2001_v38  ;;  %v2004_v45 = vpop.f32.mrb[2].mxu1  ;;  %v2204_v37 = vpack.c.bf16 (!%p1956_p6), %v1696_v36, %v1695_v35  ;;  %v1697_v38 = vld [vmem:[%s2644_s3 + $0x50] sm:$0xff] (!%p1956_p6)  ;;  %v1699_v41 = vld [vmem:[%s2644_s3 + $0x60] sm:$0xff] (!%p1956_p6) }
 0x10e   : > { %v2005_v46 = vpop.f32.mrb[3].mxu1  ;;  %v1700_v43 = vld [vmem:[%s2644_s3 + $0x68] sm:$0xff] (!%p1956_p6) }
 0x10f   : > { %v1426_v47 = vadd.f32 %v2003_v44, %v1981_v39  ;;  %v1698_v39 = vld [vmem:[%s2644_s3 + $0x58] sm:$0xff] (!%p1956_p6)  ;;  %2205 = vmatpush3.bf16.msra.mxu0 (!%p1956_p6), %v2204_v37  ;;  %v2210_v44 = vpack.c.bf16 (!%p1956_p6), %v1700_v43, %v1699_v41  ;;  %v1957_v46 = vld [vmem:[%s2643_s2] ss:$0 sm:$0xff] (!%p1956_p6) }
 0x110   : > { %v2207_v40 = vpack.c.bf16 (!%p1956_p6), %v1698_v39, %v1697_v38  ;;  %2206 = vmatprep.subr.bf16.mxu0 (!%p1956_p6), %v2368_v24 }
 0x113   : > { %2208 = vmatpush3.bf16.msra.mxu0 (!%p1956_p6), %v2207_v40 }
 0x114   : > { %2209 = vmatprep.subr.bf16.mxu0 (!%p1956_p6), %v2368_v24 }
 0x117   : > { %2211 = vmatpush3.bf16.msra.mxu0 (!%p1956_p6), %v2210_v44 }
 0x118   : > { %2212 = vmatprep.subr.bf16.mxu0 (!%p1956_p6), %v2368_v24 }
 0x12a   : > { %v2023_v42 = vpop.f32.mrb[4].mxu0 }
 0x12b   : > { %v2024_v48 = vpop.f32.mrb[5].mxu0  ;;  %v2045_v49 = vpop.f32.mrb[4].mxu1 }
 0x12c   : > { %v2025_v50 = vadd.f32 %v2024_v48, %v2023_v42  ;;  %v2026_v51 = vpop.f32.mrb[6].mxu0  ;;  %v2046_v52 = vpop.f32.mrb[5].mxu1  ;;  %v1702_v42 = vld [vmem:[%s2644_s3 + $0x78] sm:$0xff] (!%p1956_p6) }
 0x12d   : > { %v2027_v53 = vpop.f32.mrb[7].mxu0  ;;  %v2047_v55 = vadd.f32 %v2046_v52, %v2045_v49  ;;  %v2048_v56 = vpop.f32.mrb[6].mxu1 }
 0x12e   : > { %v1466_v54 = vadd.f32 %v2025_v50, %v1426_v47  ;;  %v2049_v57 = vpop.f32.mrb[7].mxu1  ;;  %v1701_v47 = vld [vmem:[%s2644_s3 + $0x70] sm:$0xff] (!%p1956_p6) }
 0x12f   : > { %v2213_v49 = vpack.c.bf16 (!%p1956_p6), %v1702_v42, %v1701_v47 }
 0x130   : > { %v1506_v58 = vadd.f32 %v2047_v55, %v1466_v54 }
 0x131   : > { %2214 = vmatpush3.bf16.msra.mxu0 (!%p1956_p6), %v2213_v49 }
 0x14a   : > { %v2067_v59 = vpop.f32.mrb[8].mxu0 }
 0x14b   : > { %v2068_v60 = vpop.f32.mrb[9].mxu0 }
 0x14c   : > { %v2089_v61 = vpop.f32.mrb[8].mxu1  ;;  %v2069_v62 = vadd.f32 %v2068_v60, %v2067_v59  ;;  %v2070_v63 = vpop.f32.mrb[10].mxu0 }
 0x14d   : > { %v2090_v0 = vpop.f32.mrb[9].mxu1  ;;  %v2071_v1 = vpop.f32.mrb[11].mxu0 }
 0x14e   : > { %v1546_v2 = vadd.f32 %v2069_v62, %v1506_v58  ;;  %v2091_v3 = vadd.f32 %v2090_v0, %v2089_v61  ;;  %v2092_v4 = vpop.f32.mrb[10].mxu1 }
 0x14f   : > { %v2093_v5 = vpop.f32.mrb[11].mxu1 }
 0x150   : > { %v1586_v6 = vadd.f32 %v2091_v3, %v1546_v2 }
 0x16a   : > { %v2111_v7 = vpop.f32.mrb[12].mxu0 }
 0x16b   : > { %v2112_v8 = vpop.f32.mrb[13].mxu0 }
 0x16c   : > { %v2133_v9 = vpop.f32.mrb[12].mxu1  ;;  %v2113_v10 = vadd.f32 %v2112_v8, %v2111_v7  ;;  %v2114_v11 = vpop.f32.mrb[14].mxu0 }
 0x16d   : > { %v2134_v12 = vpop.f32.mrb[13].mxu1  ;;  %v2115_v13 = vpop.f32.mrb[15].mxu0 }
 0x16e   : > { %v1626_v14 = vadd.f32 %v2113_v10, %v1586_v6  ;;  %v2135_v15 = vadd.f32 %v2134_v12, %v2133_v9  ;;  %v2136_v16 = vpop.f32.mrb[14].mxu1  ;;  %1676 = sbr.rel (%p1956_p6) target bundleno = 598 (0x256), region = 44 }
 0x16f   : > { %v2137_v18 = vpop.f32.mrb[15].mxu1 }
 0x170   : > { %v1666_v19 = vadd.f32 %v2135_v15, %v1626_v14 }
 0x172   : > { %v1671_v20 = vadd.f32 %v1666_v19, %v208_v17 }
 0x174   : > { %1672 = vst [vmem:[#allocation2] sm:$0x3] %v1671_v20 }
 0x17b   : > { %v1677_v45 = vld [vmem:[#allocation2] sm:$0x3] }
 0x17c   : > { %v1685_v48 = vadd.f32 %v1957_v46, %v1677_v45 }
 0x17e   : > { %v1686_v50 = vmax.f32 %v1685_v48, 0.0 }
 0x180   : > { %2189 = vmatmul.mubr.f32.vlgmr.msra.gmra.mrb[0].mxu0 %v1686_v50 }
 0x253   : > { %v1769_v51 = vpop.f32.mrb[0].mxu0 }
 0x254   : > { %1773 = vst [vmem:[%s2645_s4] sm:$0x3] %v1769_v51  ;;  %1958 = vst [vmem:[%s2645_s4 + $0x2] sm:$0x3] %v1769_v51  ;;  %v2190_v52 = vpop.f32.mrb[1].mxu0 }
 0x255   : > { %1959 = vst [vmem:[%s2645_s4 + $0x4] sm:$0x3] %v1769_v51  ;;  %1960 = vst [vmem:[%s2645_s4 + $0x6] sm:$0x3] %v1769_v51 }
 0x256 PF: > { %s14_s15 = sadd.s32 1, %s2364_s15  }
 0x257   : > { %p11_p7 = scmp.ge.s32.totalorder %s14_s15, 5  }
 0x259   :  { %13 = sbr.rel (!%p11_p7) target bundleno = 1 (0x1), region = 76 }

// kernel: three2i_forward.3
= control target key start
LH: loop header
LB: loop body
LE: loop exit
PB: predicated region body
PF: predicated region fallthrough
CT: control target
= control target key end

     0   :  { %v4615_v3 = vmov 0   ;;  %vm216_vm0 = vcmask 261120   ;;  %s5707_s1 = inlined_call_operand.vmem [shape: bf16[7,32,2048], index: 1, kind: input, shape index: {}]   ;;  %s5708_s0 = inlined_call_operand.vmem [shape: bf16[7,8,32], index: 0, kind: input, shape index: {}]   ;;  %s5709_s2 = inlined_call_operand.vmem [shape: f32[7,8,1], index: 2, kind: input, shape index: {}]   ;;  %s5710_s3 = inlined_call_operand.vmem [shape: bf16[3,2,8,256], index: 3, kind: output, shape index: {0}]   ;;  %s5711_s4 = inlined_call_operand.vmem [shape: bf16[4,2,8,256], index: 4, kind: output, shape index: {1}]  }
   0x1   :  { %v18_v0 = vld [vmem:[%s5707_s1] sm:$0xff]  ;;  %v19_v2 = vld [vmem:[%s5707_s1 + $0x8] sm:$0xff]  ;;  %252 = vmatprep.mubr.bf16.mxu0 %v4615_v3  ;;  %293 = vmatprep.mubr.bf16.mxu1 %v4615_v3  ;;  %v20_v15 = vld [vmem:[%s5707_s1 + $0x10] sm:$0xff] }
   0x2   :  { %v26_v1 = vld [vmem:[%s5707_s1 + $0x40] sm:$0xff]  ;;  %v27_v5 = vld [vmem:[%s5707_s1 + $0x48] sm:$0xff]  ;;  %4613 = vset.pattern.permute.xlu0 %v4615_v3  ;;  %4614 = vset.pattern.permute.xlu1 %v4615_v3  ;;  %v28_v16 = vld [vmem:[%s5707_s1 + $0x50] sm:$0xff] }
   0x3   :  { %v4089_v4 = vcombine.high %v18_v0, %v26_v1  ;;  %v4088_v6 = vcombine.low %v18_v0, %v26_v1  ;;  %v34_v7 = vld [vmem:[%s5707_s1 + $0x80] sm:$0xff]  ;;  %v4091_v9 = vcombine.high %v19_v2, %v27_v5  ;;  %v4090_v10 = vcombine.low %v19_v2, %v27_v5  ;;  %v35_v12 = vld [vmem:[%s5707_s1 + $0x88] sm:$0xff]  ;;  %v21_v17 = vld [vmem:[%s5707_s1 + $0x18] sm:$0xff] }
   0x4   :  { %v42_v8 = vld [vmem:[%s5707_s1 + $0xc0] sm:$0xff]  ;;  %v43_v13 = vld [vmem:[%s5707_s1 + $0xc8] sm:$0xff]  ;;  %v29_v19 = vld [vmem:[%s5707_s1 + $0x58] sm:$0xff]  ;;  %v4093_v21 = vcombine.high %v20_v15, %v28_v16  ;;  %v4092_v28 = vcombine.low %v20_v15, %v28_v16 }
   0x5   :  { %v4105_v11 = vcombine.high %v34_v7, %v42_v8  ;;  %220 = vmatprep.subr.bf16.mxu0 %v4089_v4  ;;  %v4107_v14 = vcombine.high %v35_v12, %v43_v13  ;;  %261 = vmatprep.subr.bf16.mxu1 %v4091_v9  ;;  %v4104_v18 = vcombine.low %v34_v7, %v42_v8  ;;  %v36_v23 = vld [vmem:[%s5707_s1 + $0x90] sm:$0xff]  ;;  %v37_v25 = vld [vmem:[%s5707_s1 + $0x98] sm:$0xff]  ;;  %v4696_v27 = vld [vmem:[%s5708_s0] sm:$0xf] }
   0x6   :  { %221 = vmatpush1.bf16.msra.mxu0 %v4088_v6  ;;  %262 = vmatpush1.bf16.msra.mxu1 %v4090_v10  ;;  %v4106_v20 = vcombine.low %v35_v12, %v43_v13  ;;  %v4095_v22 = vcombine.high %v21_v17, %v29_v19  ;;  %v44_v24 = vld [vmem:[%s5707_s1 + $0xd0] sm:$0xff]  ;;  %v45_v26 = vld [vmem:[%s5707_s1 + $0xd8] sm:$0xff]  ;;  %v4094_v29 = vcombine.low %v21_v17, %v29_v19  ;;  %v22_v32 = vld [vmem:[%s5707_s1 + $0x20] sm:$0xff] }
   0x7   :  { %222 = vmatprep.subr.bf16.mxu0 %v4105_v11  ;;  %263 = vmatprep.subr.bf16.mxu1 %v4107_v14  ;;  %v4109_v30 = vcombine.high %v36_v23, %v44_v24  ;;  %v4111_v31 = vcombine.high %v37_v25, %v45_v26  ;;  %v30_v33 = vld [vmem:[%s5707_s1 + $0x60] sm:$0xff]  ;;  %v23_v34 = vld [vmem:[%s5707_s1 + $0x28] sm:$0xff]  ;;  %v4108_v36 = vcombine.low %v36_v23, %v44_v24  ;;  %v24_v48 = vld [vmem:[%s5707_s1 + $0x30] sm:$0xff] }
   0x8   :  { %v31_v35 = vld [vmem:[%s5707_s1 + $0x68] sm:$0xff]  ;;  %v4110_v37 = vcombine.low %v37_v25, %v45_v26  ;;  %v4097_v38 = vcombine.high %v22_v32, %v30_v33  ;;  %v38_v40 = vld [vmem:[%s5707_s1 + $0xa0] sm:$0xff]  ;;  %v4096_v44 = vcombine.low %v22_v32, %v30_v33  ;;  %v32_v49 = vld [vmem:[%s5707_s1 + $0x70] sm:$0xff] }
   0x9   :  { %v4099_v39 = vcombine.high %v23_v34, %v31_v35  ;;  %v46_v41 = vld [vmem:[%s5707_s1 + $0xe0] sm:$0xff]  ;;  %v39_v42 = vld [vmem:[%s5707_s1 + $0xa8] sm:$0xff]  ;;  %v4098_v45 = vcombine.low %v23_v34, %v31_v35  ;;  %v25_v50 = vld [vmem:[%s5707_s1 + $0x38] sm:$0xff]  ;;  %v4101_v54 = vcombine.high %v24_v48, %v32_v49  ;;  %v4100_v60 = vcombine.low %v24_v48, %v32_v49 }
   0xa   :  { %223 = vmatpush1.bf16.msra.mxu0 %v4104_v18  ;;  %264 = vmatpush1.bf16.msra.mxu1 %v4106_v20  ;;  %v47_v43 = vld [vmem:[%s5707_s1 + $0xe8] sm:$0xff]  ;;  %v4113_v46 = vcombine.high %v38_v40, %v46_v41  ;;  %v33_v51 = vld [vmem:[%s5707_s1 + $0x78] sm:$0xff]  ;;  %v4112_v52 = vcombine.low %v38_v40, %v46_v41  ;;  %v40_v56 = vld [vmem:[%s5707_s1 + $0xb0] sm:$0xff] }
   0xb   :  { %302 = vmatprep.subr.bf16.mxu0 %v4093_v21  ;;  %343 = vmatprep.subr.bf16.mxu1 %v4095_v22  ;;  %v4115_v47 = vcombine.high %v39_v42, %v47_v43  ;;  %v4114_v53 = vcombine.low %v39_v42, %v47_v43  ;;  %v4103_v55 = vcombine.high %v25_v50, %v33_v51  ;;  %v48_v57 = vld [vmem:[%s5707_s1 + $0xf0] sm:$0xff]  ;;  %v41_v58 = vld [vmem:[%s5707_s1 + $0xb8] sm:$0xff]  ;;  %v4132_v0 = vld [vmem:[%s5707_s1 + $0x100] sm:$0xff] }
   0xc   :  { %v49_v59 = vld [vmem:[%s5707_s1 + $0xf8] sm:$0xff]  ;;  %v4102_v61 = vcombine.low %v25_v50, %v33_v51  ;;  %v4117_v62 = vcombine.high %v40_v56, %v48_v57  ;;  %v4140_v1 = vld [vmem:[%s5707_s1 + $0x140] sm:$0xff]  ;;  %v4133_v2 = vld [vmem:[%s5707_s1 + $0x108] sm:$0xff]  ;;  %v4116_v5 = vcombine.low %v40_v56, %v48_v57 }
   0xd   :  { %4120 = vmatmul.mubr.msk.bf16.vlgmr.msra.gmra.mrb[0].mxu0 %vm216_vm0, %v4696_v27  ;;  %4121 = vmatmul.mubr.msk.bf16.vlgmr.msra.gmra.mrb[0].mxu1 %vm216_vm0, %v4696_v27  ;;  %v4119_v63 = vcombine.high %v41_v58, %v49_v59  ;;  %v4141_v4 = vld [vmem:[%s5707_s1 + $0x148] sm:$0xff]  ;;  %v4118_v6 = vcombine.low %v41_v58, %v49_v59  ;;  %v4166_v7 = vcombine.high %v4132_v0, %v4140_v1  ;;  %v4148_v9 = vld [vmem:[%s5707_s1 + $0x180] sm:$0xff]  ;;  %v4134_v18 = vld [vmem:[%s5707_s1 + $0x110] sm:$0xff] }
   0xe   :  { %303 = vmatpush1.bf16.msra.mxu0 %v4092_v28  ;;  %344 = vmatpush1.bf16.msra.mxu1 %v4094_v29  ;;  %v4168_v8 = vcombine.high %v4133_v2, %v4141_v4  ;;  %v4156_v10 = vld [vmem:[%s5707_s1 + $0x1c0] sm:$0xff]  ;;  %v4149_v11 = vld [vmem:[%s5707_s1 + $0x188] sm:$0xff]  ;;  %v4165_v13 = vcombine.low %v4132_v0, %v4140_v1  ;;  %v4167_v14 = vcombine.low %v4133_v2, %v4141_v4  ;;  %v4142_v19 = vld [vmem:[%s5707_s1 + $0x150] sm:$0xff] }
   0xf   :  { %304 = vmatprep.subr.bf16.mxu0 %v4109_v30  ;;  %345 = vmatprep.subr.bf16.mxu1 %v4111_v31  ;;  %v4157_v12 = vld [vmem:[%s5707_s1 + $0x1c8] sm:$0xff]  ;;  %v4182_v15 = vcombine.high %v4148_v9, %v4156_v10  ;;  %v50_v16 = vld [vmem:[%s5709_s2] sm:$0xff]  ;;  %v4135_v20 = vld [vmem:[%s5707_s1 + $0x118] sm:$0xff]  ;;  %v4181_v22 = vcombine.low %v4148_v9, %v4156_v10  ;;  %v4170_v24 = vcombine.high %v4134_v18, %v4142_v19 }
  0x10   :  { %334 = vmatprep.mubr.bf16.mxu0 %v4615_v3  ;;  %375 = vmatprep.mubr.bf16.mxu1 %v4615_v3  ;;  %v4184_v17 = vcombine.high %v4149_v11, %v4157_v12  ;;  %v4143_v21 = vld [vmem:[%s5707_s1 + $0x158] sm:$0xff]  ;;  %v4183_v23 = vcombine.low %v4149_v11, %v4157_v12  ;;  %v4150_v26 = vld [vmem:[%s5707_s1 + $0x190] sm:$0xff]  ;;  %v4824_v30 = vld [vmem:[%s5708_s0 + $0x4] sm:$0xf]  ;;  %v4169_v31 = vcombine.low %v4134_v18, %v4142_v19 }
  0x11   :  { %53 = vperm.xlu0 %4613, %v50_v16   ;;  %v4172_v25 = vcombine.high %v4135_v20, %v4143_v21  ;;  %v4158_v28 = vld [vmem:[%s5707_s1 + $0x1d0] sm:$0xff]  ;;  %v4159_v29 = vld [vmem:[%s5707_s1 + $0x1d8] sm:$0xff]  ;;  %v4171_v32 = vcombine.low %v4135_v20, %v4143_v21  ;;  %v4136_v35 = vld [vmem:[%s5707_s1 + $0x120] sm:$0xff] }
  0x12   :  { %305 = vmatpush1.bf16.msra.mxu0 %v4108_v36  ;;  %346 = vmatpush1.bf16.msra.mxu1 %v4110_v37  ;;  %v4186_v33 = vcombine.high %v4150_v26, %v4158_v28  ;;  %v4144_v36 = vld [vmem:[%s5707_s1 + $0x160] sm:$0xff]  ;;  %v4137_v37 = vld [vmem:[%s5707_s1 + $0x128] sm:$0xff]  ;;  %v4242_v0 = vld [vmem:[%s5709_s2 + $0x10] sm:$0xff] }
  0x13   :  { %384 = vmatprep.subr.bf16.mxu0 %v4097_v38  ;;  %425 = vmatprep.subr.bf16.mxu1 %v4099_v39  ;;  %v4145_v38 = vld [vmem:[%s5707_s1 + $0x168] sm:$0xff]  ;;  %v4185_v39 = vcombine.low %v4150_v26, %v4158_v28  ;;  %v4174_v42 = vcombine.high %v4136_v35, %v4144_v36  ;;  %v4173_v48 = vcombine.low %v4136_v35, %v4144_v36  ;;  %v4320_v28 = vld [vmem:[%s5709_s2 + $0x18] sm:$0xff] }
  0x14   :  { %v4164_v40 = vld [vmem:[%s5709_s2 + $0x8] sm:$0xff]  ;;  %v4176_v43 = vcombine.high %v4137_v37, %v4145_v38  ;;  %v4175_v49 = vcombine.low %v4137_v37, %v4145_v38  ;;  %1215 = vperm.xlu1 %4614, %v4242_v0   ;;  %v4232_v0 = vld [vmem:[%s5707_s1 + $0x2b0] sm:$0xff] }
  0x15   :  { %4122 = vmatmul.mubr.msk.bf16.vlgmr.msra.gmra.mrb[4].mxu0 %vm216_vm0, %v4696_v27  ;;  %4123 = vmatmul.mubr.msk.bf16.vlgmr.msra.gmra.mrb[4].mxu1 %vm216_vm0, %v4696_v27  ;;  %v4219_v9 = vld [vmem:[%s5707_s1 + $0x248] sm:$0xff] }
  0x16   :  { %385 = vmatpush1.bf16.msra.mxu0 %v4096_v44  ;;  %426 = vmatpush1.bf16.msra.mxu1 %v4098_v45  ;;  %v4152_v44 = vld [vmem:[%s5707_s1 + $0x1a0] sm:$0xff]  ;;  %v4227_v16 = vld [vmem:[%s5707_s1 + $0x288] sm:$0xff] }
  0x17   :  { %386 = vmatprep.subr.bf16.mxu0 %v4113_v46  ;;  %427 = vmatprep.subr.bf16.mxu1 %v4115_v47  ;;  %v4160_v45 = vld [vmem:[%s5707_s1 + $0x1e0] sm:$0xff]  ;;  %v4153_v46 = vld [vmem:[%s5707_s1 + $0x1a8] sm:$0xff] }
  0x18   :  { %416 = vmatprep.mubr.bf16.mxu0 %v4615_v3  ;;  %457 = vmatprep.mubr.bf16.mxu1 %v4615_v3  ;;  %v4161_v47 = vld [vmem:[%s5707_s1 + $0x1e8] sm:$0xff]  ;;  %v4190_v50 = vcombine.high %v4152_v44, %v4160_v45  ;;  %v4189_v56 = vcombine.low %v4152_v44, %v4160_v45 }
  0x19   :  { %634 = vperm.xlu0 %4613, %v4164_v40   ;;  %v4192_v51 = vcombine.high %v4153_v46, %v4161_v47  ;;  %v4191_v57 = vcombine.low %v4153_v46, %v4161_v47  ;;  %1796 = vperm.xlu1 %4614, %v4320_v28   ;;  %v4958_v35 = vld [vmem:[%s5708_s0 + $0x8] sm:$0xf]  ;;  %v4214_v40 = vld [vmem:[%s5707_s1 + $0x220] sm:$0xff]  ;;  %v4298_v28 = vld [vmem:[%s5707_s1 + $0x350] sm:$0xff] }
  0x1a   :  { %387 = vmatpush1.bf16.msra.mxu0 %v4112_v52  ;;  %428 = vmatpush1.bf16.msra.mxu1 %v4114_v53  ;;  %v4138_v52 = vld [vmem:[%s5707_s1 + $0x130] sm:$0xff] }
  0x1b   :  { %466 = vmatprep.subr.bf16.mxu0 %v4101_v54  ;;  %507 = vmatprep.subr.bf16.mxu1 %v4103_v55  ;;  %v4146_v53 = vld [vmem:[%s5707_s1 + $0x170] sm:$0xff]  ;;  %v4139_v54 = vld [vmem:[%s5707_s1 + $0x138] sm:$0xff] }
  0x1c   :  { %v4147_v55 = vld [vmem:[%s5707_s1 + $0x178] sm:$0xff]  ;;  %v4178_v58 = vcombine.high %v4138_v52, %v4146_v53  ;;  %v4177_v1 = vcombine.low %v4138_v52, %v4146_v53 }
  0x1d   :  { %4124 = vmatmul.mubr.msk.bf16.vlgmr.msra.gmra.mrb[8].mxu0 %vm216_vm0, %v4696_v27  ;;  %4125 = vmatmul.mubr.msk.bf16.vlgmr.msra.gmra.mrb[8].mxu1 %vm216_vm0, %v4696_v27  ;;  %v4180_v59 = vcombine.high %v4139_v54, %v4147_v55  ;;  %v4179_v2 = vcombine.low %v4139_v54, %v4147_v55 }
  0x1e   :  { %467 = vmatpush1.bf16.msra.mxu0 %v4100_v60  ;;  %508 = vmatpush1.bf16.msra.mxu1 %v4102_v61  ;;  %v4154_v60 = vld [vmem:[%s5707_s1 + $0x1b0] sm:$0xff] }
  0x1f   :  { %468 = vmatprep.subr.bf16.mxu0 %v4117_v62  ;;  %509 = vmatprep.subr.bf16.mxu1 %v4119_v63  ;;  %v4162_v61 = vld [vmem:[%s5707_s1 + $0x1f0] sm:$0xff]  ;;  %v4155_v62 = vld [vmem:[%s5707_s1 + $0x1b8] sm:$0xff] }
  0x20   :  { %498 = vmatprep.mubr.bf16.mxu0 %v4615_v3  ;;  %539 = vmatprep.mubr.bf16.mxu1 %v4615_v3  ;;  %v4163_v63 = vld [vmem:[%s5707_s1 + $0x1f8] sm:$0xff]  ;;  %v4194_v4 = vcombine.high %v4154_v60, %v4162_v61  ;;  %v4193_v10 = vcombine.low %v4154_v60, %v4162_v61 }
  0x21   :  { %v4195_v11 = vcombine.low %v4155_v62, %v4163_v63 }
  0x22   :  { %469 = vmatpush1.bf16.msra.mxu0 %v4116_v5  ;;  %510 = vmatpush1.bf16.msra.mxu1 %v4118_v6  ;;  %v4196_v5 = vcombine.high %v4155_v62, %v4163_v63  ;;  %v4210_v6 = vld [vmem:[%s5707_s1 + $0x200] sm:$0xff] }
  0x23   :  { %800 = vmatprep.subr.bf16.mxu0 %v4166_v7  ;;  %841 = vmatprep.subr.bf16.mxu1 %v4168_v8  ;;  %v4218_v7 = vld [vmem:[%s5707_s1 + $0x240] sm:$0xff]  ;;  %v4211_v8 = vld [vmem:[%s5707_s1 + $0x208] sm:$0xff] }
  0x24   :  { %v4244_v12 = vcombine.high %v4210_v6, %v4218_v7  ;;  %v4243_v18 = vcombine.low %v4210_v6, %v4218_v7  ;;  %v4245_v19 = vcombine.low %v4211_v8, %v4219_v9 }
  0x25   :  { %4126 = vmatmul.mubr.msk.bf16.vlgmr.msra.gmra.mrb[12].mxu0 %vm216_vm0, %v4696_v27  ;;  %4127 = vmatmul.mubr.msk.bf16.vlgmr.msra.gmra.mrb[12].mxu1 %vm216_vm0, %v4696_v27  ;;  %v4151_v27 = vld [vmem:[%s5707_s1 + $0x198] sm:$0xff] }
  0x26   :  { %801 = vmatpush1.bf16.msra.mxu0 %v4165_v13  ;;  %842 = vmatpush1.bf16.msra.mxu1 %v4167_v14  ;;  %v4188_v34 = vcombine.high %v4151_v27, %v4159_v29  ;;  %v4187_v41 = vcombine.low %v4151_v27, %v4159_v29  ;;  %v4246_v13 = vcombine.high %v4211_v8, %v4219_v9  ;;  %v4226_v14 = vld [vmem:[%s5707_s1 + $0x280] sm:$0xff] }
  0x27   :  { %802 = vmatprep.subr.bf16.mxu0 %v4182_v15  ;;  %843 = vmatprep.subr.bf16.mxu1 %v4184_v17  ;;  %v4234_v15 = vld [vmem:[%s5707_s1 + $0x2c0] sm:$0xff]  ;;  %v4235_v17 = vld [vmem:[%s5707_s1 + $0x2c8] sm:$0xff] }
  0x28   :  { %832 = vmatprep.mubr.bf16.mxu0 %v4615_v3  ;;  %873 = vmatprep.mubr.bf16.mxu1 %v4615_v3  ;;  %v4260_v20 = vcombine.high %v4226_v14, %v4234_v15  ;;  %v4262_v21 = vcombine.high %v4227_v16, %v4235_v17  ;;  %v4259_v26 = vcombine.low %v4226_v14, %v4234_v15  ;;  %v4288_v9 = vld [vmem:[%s5707_s1 + $0x300] sm:$0xff] }
  0x29   :  { %v4261_v27 = vcombine.low %v4227_v16, %v4235_v17  ;;  %v4304_v17 = vld [vmem:[%s5707_s1 + $0x380] sm:$0xff] }
  0x2a   :  { %803 = vmatpush1.bf16.msra.mxu0 %v4181_v22  ;;  %844 = vmatpush1.bf16.msra.mxu1 %v4183_v23  ;;  %v4212_v22 = vld [vmem:[%s5707_s1 + $0x210] sm:$0xff] }
  0x2b   :  { %882 = vmatprep.subr.bf16.mxu0 %v4170_v24  ;;  %923 = vmatprep.subr.bf16.mxu1 %v4172_v25  ;;  %v4220_v23 = vld [vmem:[%s5707_s1 + $0x250] sm:$0xff]  ;;  %v4213_v24 = vld [vmem:[%s5707_s1 + $0x218] sm:$0xff] }
  0x2c   :  { %v4221_v25 = vld [vmem:[%s5707_s1 + $0x258] sm:$0xff]  ;;  %v4248_v29 = vcombine.high %v4212_v22, %v4220_v23  ;;  %v4247_v36 = vcombine.low %v4212_v22, %v4220_v23 }
  0x2d   :  { %4197 = vmatmul.mubr.msk.bf16.vlgmr.msra.gmra.mrb[16].mxu0 %vm216_vm0, %v4824_v30  ;;  %4198 = vmatmul.mubr.msk.bf16.vlgmr.msra.gmra.mrb[16].mxu1 %vm216_vm0, %v4824_v30  ;;  %v4249_v37 = vcombine.low %v4213_v24, %v4221_v25 }
  0x2e   :  { %883 = vmatpush1.bf16.msra.mxu0 %v4169_v31  ;;  %924 = vmatpush1.bf16.msra.mxu1 %v4171_v32  ;;  %v4250_v31 = vcombine.high %v4213_v24, %v4221_v25  ;;  %v4228_v32 = vld [vmem:[%s5707_s1 + $0x290] sm:$0xff] }
  0x2f   :  { %884 = vmatprep.subr.bf16.mxu0 %v4186_v33  ;;  %925 = vmatprep.subr.bf16.mxu1 %v4188_v34  ;;  %v4229_v33 = vld [vmem:[%s5707_s1 + $0x298] sm:$0xff] }
  0x30   :  { %914 = vmatprep.mubr.bf16.mxu0 %v4615_v3  ;;  %955 = vmatprep.mubr.bf16.mxu1 %v4615_v3  ;;  %v4237_v34 = vld [vmem:[%s5707_s1 + $0x2d8] sm:$0xff] }
  0x31   :  { %v4265_v45 = vcombine.low %v4229_v33, %v4237_v34 }
  0x32   :  { %885 = vmatpush1.bf16.msra.mxu0 %v4185_v39  ;;  %926 = vmatpush1.bf16.msra.mxu1 %v4187_v41  ;;  %v4266_v39 = vcombine.high %v4229_v33, %v4237_v34  ;;  %v4222_v41 = vld [vmem:[%s5707_s1 + $0x260] sm:$0xff]  ;;  %v4306_v34 = vld [vmem:[%s5707_s1 + $0x390] sm:$0xff] }
  0x33   :  { %964 = vmatprep.subr.bf16.mxu0 %v4174_v42  ;;  %1005 = vmatprep.subr.bf16.mxu1 %v4176_v43  ;;  %v4215_v42 = vld [vmem:[%s5707_s1 + $0x228] sm:$0xff]  ;;  %v4252_v46 = vcombine.high %v4214_v40, %v4222_v41  ;;  %v4251_v52 = vcombine.low %v4214_v40, %v4222_v41 }
  0x34   :  { %v4223_v43 = vld [vmem:[%s5707_s1 + $0x268] sm:$0xff] }
  0x35   :  { %4199 = vmatmul.mubr.msk.bf16.vlgmr.msra.gmra.mrb[20].mxu0 %vm216_vm0, %v4824_v30  ;;  %4200 = vmatmul.mubr.msk.bf16.vlgmr.msra.gmra.mrb[20].mxu1 %vm216_vm0, %v4824_v30  ;;  %v4254_v47 = vcombine.high %v4215_v42, %v4223_v43  ;;  %v4253_v53 = vcombine.low %v4215_v42, %v4223_v43  ;;  %v4292_v43 = vld [vmem:[%s5707_s1 + $0x320] sm:$0xff] }
  0x36   :  { %965 = vmatpush1.bf16.msra.mxu0 %v4173_v48  ;;  %1006 = vmatpush1.bf16.msra.mxu1 %v4175_v49  ;;  %v4230_v48 = vld [vmem:[%s5707_s1 + $0x2a0] sm:$0xff] }
  0x37   :  { %966 = vmatprep.subr.bf16.mxu0 %v4190_v50  ;;  %1007 = vmatprep.subr.bf16.mxu1 %v4192_v51  ;;  %v4238_v49 = vld [vmem:[%s5707_s1 + $0x2e0] sm:$0xff]  ;;  %v4231_v50 = vld [vmem:[%s5707_s1 + $0x2a8] sm:$0xff] }
  0x38   :  { %996 = vmatprep.mubr.bf16.mxu0 %v4615_v3  ;;  %1037 = vmatprep.mubr.bf16.mxu1 %v4615_v3  ;;  %v4239_v51 = vld [vmem:[%s5707_s1 + $0x2e8] sm:$0xff]  ;;  %v4268_v54 = vcombine.high %v4230_v48, %v4238_v49  ;;  %v4267_v60 = vcombine.low %v4230_v48, %v4238_v49 }
  0x39   :  { %v4270_v55 = vcombine.high %v4231_v50, %v4239_v51  ;;  %v4269_v61 = vcombine.low %v4231_v50, %v4239_v51  ;;  %v4308_v51 = vld [vmem:[%s5707_s1 + $0x3a0] sm:$0xff] }
  0x3a   :  { %967 = vmatpush1.bf16.msra.mxu0 %v4189_v56  ;;  %1008 = vmatpush1.bf16.msra.mxu1 %v4191_v57  ;;  %v4216_v56 = vld [vmem:[%s5707_s1 + $0x230] sm:$0xff] }
  0x3b   :  { %1046 = vmatprep.subr.bf16.mxu0 %v4178_v58  ;;  %1087 = vmatprep.subr.bf16.mxu1 %v4180_v59  ;;  %v4224_v57 = vld [vmem:[%s5707_s1 + $0x270] sm:$0xff]  ;;  %v4217_v58 = vld [vmem:[%s5707_s1 + $0x238] sm:$0xff] }
  0x3c   :  { %v4225_v59 = vld [vmem:[%s5707_s1 + $0x278] sm:$0xff]  ;;  %v4256_v62 = vcombine.high %v4216_v56, %v4224_v57 }
  0x3d   :  { %4201 = vmatmul.mubr.msk.bf16.vlgmr.msra.gmra.mrb[24].mxu0 %vm216_vm0, %v4824_v30  ;;  %4202 = vmatmul.mubr.msk.bf16.vlgmr.msra.gmra.mrb[24].mxu1 %vm216_vm0, %v4824_v30  ;;  %v4258_v63 = vcombine.high %v4217_v58, %v4225_v59  ;;  %v4257_v6 = vcombine.low %v4217_v58, %v4225_v59  ;;  %v4294_v59 = vld [vmem:[%s5707_s1 + $0x330] sm:$0xff] }
  0x3e   :  { %1047 = vmatpush1.bf16.msra.mxu0 %v4177_v1  ;;  %1088 = vmatpush1.bf16.msra.mxu1 %v4179_v2  ;;  %v4240_v1 = vld [vmem:[%s5707_s1 + $0x2f0] sm:$0xff]  ;;  %v4233_v2 = vld [vmem:[%s5707_s1 + $0x2b8] sm:$0xff] }
  0x3f   :  { %1048 = vmatprep.subr.bf16.mxu0 %v4194_v4  ;;  %1089 = vmatprep.subr.bf16.mxu1 %v4196_v5  ;;  %v4241_v4 = vld [vmem:[%s5707_s1 + $0x2f8] sm:$0xff]  ;;  %v4255_v5 = vcombine.low %v4216_v56, %v4224_v57  ;;  %v4272_v7 = vcombine.high %v4232_v0, %v4240_v1 }
  0x40   :  { %1078 = vmatprep.mubr.bf16.mxu0 %v4615_v3  ;;  %1119 = vmatprep.mubr.bf16.mxu1 %v4615_v3  ;;  %v4274_v8 = vcombine.high %v4233_v2, %v4241_v4  ;;  %v4273_v14 = vcombine.low %v4233_v2, %v4241_v4  ;;  %v4310_v4 = vld [vmem:[%s5707_s1 + $0x3b0] sm:$0xff] }
  0x42   :  { %1049 = vmatpush1.bf16.msra.mxu0 %v4193_v10  ;;  %1090 = vmatpush1.bf16.msra.mxu1 %v4195_v11  ;;  %v4296_v10 = vld [vmem:[%s5707_s1 + $0x340] sm:$0xff]  ;;  %v4289_v11 = vld [vmem:[%s5707_s1 + $0x308] sm:$0xff] }
  0x43   :  { %1381 = vmatprep.subr.bf16.mxu0 %v4244_v12  ;;  %1422 = vmatprep.subr.bf16.mxu1 %v4246_v13  ;;  %v4297_v12 = vld [vmem:[%s5707_s1 + $0x348] sm:$0xff]  ;;  %v4271_v13 = vcombine.low %v4232_v0, %v4240_v1  ;;  %v4322_v15 = vcombine.high %v4288_v9, %v4296_v10  ;;  %v4321_v22 = vcombine.low %v4288_v9, %v4296_v10 }
  0x44   :  { %v4324_v16 = vcombine.high %v4289_v11, %v4297_v12  ;;  %v4323_v23 = vcombine.low %v4289_v11, %v4297_v12  ;;  %v4365_v12 = vld [vmem:[%s5707_s1 + $0x400] sm:$0xff] }
  0x45   :  { %4203 = vmatmul.mubr.msk.bf16.vlgmr.msra.gmra.mrb[28].mxu0 %vm216_vm0, %v4824_v30  ;;  %4204 = vmatmul.mubr.msk.bf16.vlgmr.msra.gmra.mrb[28].mxu1 %vm216_vm0, %v4824_v30  ;;  %v4236_v30 = vld [vmem:[%s5707_s1 + $0x2d0] sm:$0xff] }
  0x46   :  { %1382 = vmatpush1.bf16.msra.mxu0 %v4243_v18  ;;  %1423 = vmatpush1.bf16.msra.mxu1 %v4245_v19  ;;  %v4264_v38 = vcombine.high %v4228_v32, %v4236_v30  ;;  %v4263_v44 = vcombine.low %v4228_v32, %v4236_v30  ;;  %v4312_v18 = vld [vmem:[%s5707_s1 + $0x3c0] sm:$0xff]  ;;  %v4305_v19 = vld [vmem:[%s5707_s1 + $0x388] sm:$0xff] }
  0x47   :  { %1383 = vmatprep.subr.bf16.mxu0 %v4260_v20  ;;  %1424 = vmatprep.subr.bf16.mxu1 %v4262_v21  ;;  %v4313_v20 = vld [vmem:[%s5707_s1 + $0x3c8] sm:$0xff]  ;;  %v4397_v21 = vld [vmem:[%s5709_s2 + $0x20] sm:$0xff]  ;;  %v4338_v24 = vcombine.high %v4304_v17, %v4312_v18 }
  0x48   :  { %1413 = vmatprep.mubr.bf16.mxu0 %v4615_v3  ;;  %1454 = vmatprep.mubr.bf16.mxu1 %v4615_v3  ;;  %v4340_v25 = vcombine.high %v4305_v19, %v4313_v20  ;;  %v4339_v32 = vcombine.low %v4305_v19, %v4313_v20  ;;  %v4381_v20 = vld [vmem:[%s5707_s1 + $0x480] sm:$0xff] }
  0x49   :  { %2376 = vperm.xlu0 %4613, %v4397_v21   ;;  %v4389_v21 = vld [vmem:[%s5707_s1 + $0x4c0] sm:$0xff] }
  0x4a   :  { %1384 = vmatpush1.bf16.msra.mxu0 %v4259_v26  ;;  %1425 = vmatpush1.bf16.msra.mxu1 %v4261_v27  ;;  %v4290_v26 = vld [vmem:[%s5707_s1 + $0x310] sm:$0xff]  ;;  %v4291_v27 = vld [vmem:[%s5707_s1 + $0x318] sm:$0xff] }
  0x4b   :  { %1463 = vmatprep.subr.bf16.mxu0 %v4248_v29  ;;  %1504 = vmatprep.subr.bf16.mxu1 %v4250_v31  ;;  %v4299_v29 = vld [vmem:[%s5707_s1 + $0x358] sm:$0xff]  ;;  %v4337_v31 = vcombine.low %v4304_v17, %v4312_v18  ;;  %v4326_v30 = vcombine.high %v4290_v26, %v4298_v28 }
  0x4c   :  { %v4328_v33 = vcombine.high %v4291_v27, %v4299_v29  ;;  %v4327_v40 = vcombine.low %v4291_v27, %v4299_v29  ;;  %v4367_v29 = vld [vmem:[%s5707_s1 + $0x410] sm:$0xff] }
  0x4d   :  { %4275 = vmatmul.mubr.msk.bf16.vlgmr.msra.gmra.mrb[32].mxu0 %vm216_vm0, %v4958_v35  ;;  %4276 = vmatmul.mubr.msk.bf16.vlgmr.msra.gmra.mrb[32].mxu1 %vm216_vm0, %v4958_v35 }
  0x4e   :  { %1464 = vmatpush1.bf16.msra.mxu0 %v4247_v36  ;;  %1505 = vmatpush1.bf16.msra.mxu1 %v4249_v37  ;;  %v4314_v36 = vld [vmem:[%s5707_s1 + $0x3d0] sm:$0xff]  ;;  %v4315_v37 = vld [vmem:[%s5707_s1 + $0x3d8] sm:$0xff] }
  0x4f   :  { %1465 = vmatprep.subr.bf16.mxu0 %v4264_v38  ;;  %1506 = vmatprep.subr.bf16.mxu1 %v4266_v39  ;;  %v5086_v38 = vld [vmem:[%s5708_s0 + $0xc] sm:$0xf]  ;;  %v4325_v39 = vcombine.low %v4290_v26, %v4298_v28  ;;  %v4342_v41 = vcombine.high %v4306_v34, %v4314_v36  ;;  %v4415_v28 = vcombine.high %v4381_v20, %v4389_v21 }
  0x50   :  { %1495 = vmatprep.mubr.bf16.mxu0 %v4615_v3  ;;  %1536 = vmatprep.mubr.bf16.mxu1 %v4615_v3 }
  0x52   :  { %1466 = vmatpush1.bf16.msra.mxu0 %v4263_v44  ;;  %1507 = vmatpush1.bf16.msra.mxu1 %v4265_v45  ;;  %v4300_v44 = vld [vmem:[%s5707_s1 + $0x360] sm:$0xff]  ;;  %v4293_v45 = vld [vmem:[%s5707_s1 + $0x328] sm:$0xff] }
  0x53   :  { %1545 = vmatprep.subr.bf16.mxu0 %v4252_v46  ;;  %1586 = vmatprep.subr.bf16.mxu1 %v4254_v47  ;;  %v4301_v46 = vld [vmem:[%s5707_s1 + $0x368] sm:$0xff]  ;;  %v4341_v47 = vcombine.low %v4306_v34, %v4314_v36  ;;  %v4330_v49 = vcombine.high %v4292_v43, %v4300_v44 }
  0x54   :  { %v4332_v50 = vcombine.high %v4293_v45, %v4301_v46  ;;  %v4331_v56 = vcombine.low %v4293_v45, %v4301_v46  ;;  %v4369_v46 = vld [vmem:[%s5707_s1 + $0x420] sm:$0xff] }
  0x55   :  { %4277 = vmatmul.mubr.msk.bf16.vlgmr.msra.gmra.mrb[36].mxu0 %vm216_vm0, %v4958_v35  ;;  %4278 = vmatmul.mubr.msk.bf16.vlgmr.msra.gmra.mrb[36].mxu1 %vm216_vm0, %v4958_v35 }
  0x56   :  { %1546 = vmatpush1.bf16.msra.mxu0 %v4251_v52  ;;  %1587 = vmatpush1.bf16.msra.mxu1 %v4253_v53  ;;  %v4316_v52 = vld [vmem:[%s5707_s1 + $0x3e0] sm:$0xff]  ;;  %v4309_v53 = vld [vmem:[%s5707_s1 + $0x3a8] sm:$0xff] }
  0x57   :  { %1547 = vmatprep.subr.bf16.mxu0 %v4268_v54  ;;  %1588 = vmatprep.subr.bf16.mxu1 %v4270_v55  ;;  %v4317_v54 = vld [vmem:[%s5707_s1 + $0x3e8] sm:$0xff]  ;;  %v4329_v55 = vcombine.low %v4292_v43, %v4300_v44  ;;  %v4346_v57 = vcombine.high %v4308_v51, %v4316_v52 }
  0x58   :  { %1577 = vmatprep.mubr.bf16.mxu0 %v4615_v3  ;;  %1618 = vmatprep.mubr.bf16.mxu1 %v4615_v3  ;;  %v4348_v58 = vcombine.high %v4309_v53, %v4317_v54  ;;  %v4347_v0 = vcombine.low %v4309_v53, %v4317_v54  ;;  %v4385_v54 = vld [vmem:[%s5707_s1 + $0x4a0] sm:$0xff] }
  0x5a   :  { %1548 = vmatpush1.bf16.msra.mxu0 %v4267_v60  ;;  %1589 = vmatpush1.bf16.msra.mxu1 %v4269_v61  ;;  %v4302_v60 = vld [vmem:[%s5707_s1 + $0x370] sm:$0xff]  ;;  %v4295_v61 = vld [vmem:[%s5707_s1 + $0x338] sm:$0xff] }
  0x5b   :  { %1627 = vmatprep.subr.bf16.mxu0 %v4256_v62  ;;  %1668 = vmatprep.subr.bf16.mxu1 %v4258_v63  ;;  %v4303_v62 = vld [vmem:[%s5707_s1 + $0x378] sm:$0xff]  ;;  %v4345_v63 = vcombine.low %v4308_v51, %v4316_v52  ;;  %v4334_v1 = vcombine.high %v4294_v59, %v4302_v60 }
  0x5c   :  { %v4336_v2 = vcombine.high %v4295_v61, %v4303_v62  ;;  %v4335_v9 = vcombine.low %v4295_v61, %v4303_v62  ;;  %v4371_v62 = vld [vmem:[%s5707_s1 + $0x430] sm:$0xff] }
  0x5d   :  { %4279 = vmatmul.mubr.msk.bf16.vlgmr.msra.gmra.mrb[40].mxu0 %vm216_vm0, %v4958_v35  ;;  %4280 = vmatmul.mubr.msk.bf16.vlgmr.msra.gmra.mrb[40].mxu1 %vm216_vm0, %v4958_v35 }
  0x5e   :  { %1628 = vmatpush1.bf16.msra.mxu0 %v4255_v5  ;;  %1669 = vmatpush1.bf16.msra.mxu1 %v4257_v6  ;;  %v4318_v5 = vld [vmem:[%s5707_s1 + $0x3f0] sm:$0xff]  ;;  %v4311_v6 = vld [vmem:[%s5707_s1 + $0x3b8] sm:$0xff] }
  0x5f   :  { %1629 = vmatprep.subr.bf16.mxu0 %v4272_v7  ;;  %1670 = vmatprep.subr.bf16.mxu1 %v4274_v8  ;;  %v4319_v7 = vld [vmem:[%s5707_s1 + $0x3f8] sm:$0xff]  ;;  %v4333_v8 = vcombine.low %v4294_v59, %v4302_v60  ;;  %v4350_v10 = vcombine.high %v4310_v4, %v4318_v5 }
  0x60   :  { %1659 = vmatprep.mubr.bf16.mxu0 %v4615_v3  ;;  %1700 = vmatprep.mubr.bf16.mxu1 %v4615_v3  ;;  %v4352_v11 = vcombine.high %v4311_v6, %v4319_v7  ;;  %v4351_v17 = vcombine.low %v4311_v6, %v4319_v7  ;;  %v4387_v7 = vld [vmem:[%s5707_s1 + $0x4b0] sm:$0xff] }
  0x62   :  { %1630 = vmatpush1.bf16.msra.mxu0 %v4271_v13  ;;  %1671 = vmatpush1.bf16.msra.mxu1 %v4273_v14  ;;  %v4373_v13 = vld [vmem:[%s5707_s1 + $0x440] sm:$0xff]  ;;  %v4366_v14 = vld [vmem:[%s5707_s1 + $0x408] sm:$0xff] }
  0x63   :  { %1962 = vmatprep.subr.bf16.mxu0 %v4322_v15  ;;  %2003 = vmatprep.subr.bf16.mxu1 %v4324_v16  ;;  %v4374_v15 = vld [vmem:[%s5707_s1 + $0x448] sm:$0xff]  ;;  %v4349_v16 = vcombine.low %v4310_v4, %v4318_v5  ;;  %v4399_v18 = vcombine.high %v4365_v12, %v4373_v13 }
  0x64   :  { %v4401_v19 = vcombine.high %v4366_v14, %v4374_v15  ;;  %v4400_v26 = vcombine.low %v4366_v14, %v4374_v15  ;;  %v4443_v15 = vld [vmem:[%s5707_s1 + $0x500] sm:$0xff] }
  0x65   :  { %4281 = vmatmul.mubr.msk.bf16.vlgmr.msra.gmra.mrb[44].mxu0 %vm216_vm0, %v4958_v35  ;;  %4282 = vmatmul.mubr.msk.bf16.vlgmr.msra.gmra.mrb[44].mxu1 %vm216_vm0, %v4958_v35  ;;  %v4307_v35 = vld [vmem:[%s5707_s1 + $0x398] sm:$0xff] }
  0x66   :  { %1963 = vmatpush1.bf16.msra.mxu0 %v4321_v22  ;;  %2004 = vmatpush1.bf16.msra.mxu1 %v4323_v23  ;;  %v4344_v42 = vcombine.high %v4307_v35, %v4315_v37  ;;  %v4343_v48 = vcombine.low %v4307_v35, %v4315_v37  ;;  %v4382_v22 = vld [vmem:[%s5707_s1 + $0x488] sm:$0xff]  ;;  %v4383_v37 = vld [vmem:[%s5707_s1 + $0x490] sm:$0xff] }
  0x67   :  { %1964 = vmatprep.subr.bf16.mxu0 %v4338_v24  ;;  %2005 = vmatprep.subr.bf16.mxu1 %v4340_v25  ;;  %v4390_v23 = vld [vmem:[%s5707_s1 + $0x4c8] sm:$0xff]  ;;  %v4398_v25 = vcombine.low %v4365_v12, %v4373_v13 }
  0x68   :  { %1994 = vmatprep.mubr.bf16.mxu0 %v4615_v3  ;;  %2035 = vmatprep.mubr.bf16.mxu1 %v4615_v3  ;;  %v4475_v24 = vld [vmem:[%s5709_s2 + $0x28] sm:$0xff]  ;;  %v4417_v27 = vcombine.high %v4382_v22, %v4390_v23  ;;  %v4416_v34 = vcombine.low %v4382_v22, %v4390_v23  ;;  %v4459_v23 = vld [vmem:[%s5707_s1 + $0x580] sm:$0xff] }
  0x69   :  { %2957 = vperm.xlu1 %4614, %v4475_v24   ;;  %v4467_v24 = vld [vmem:[%s5707_s1 + $0x5c0] sm:$0xff] }
  0x6a   :  { %1965 = vmatpush1.bf16.msra.mxu0 %v4337_v31  ;;  %2006 = vmatpush1.bf16.msra.mxu1 %v4339_v32  ;;  %v4375_v31 = vld [vmem:[%s5707_s1 + $0x450] sm:$0xff]  ;;  %v4368_v32 = vld [vmem:[%s5707_s1 + $0x418] sm:$0xff] }
  0x6b   :  { %2044 = vmatprep.subr.bf16.mxu0 %v4326_v30  ;;  %2085 = vmatprep.subr.bf16.mxu1 %v4328_v33  ;;  %v4376_v30 = vld [vmem:[%s5707_s1 + $0x458] sm:$0xff]  ;;  %v4414_v33 = vcombine.low %v4381_v20, %v4389_v21  ;;  %v4403_v36 = vcombine.high %v4367_v29, %v4375_v31 }
  0x6c   :  { %v4405_v35 = vcombine.high %v4368_v32, %v4376_v30  ;;  %v4404_v43 = vcombine.low %v4368_v32, %v4376_v30  ;;  %v4445_v30 = vld [vmem:[%s5707_s1 + $0x510] sm:$0xff] }
  0x6d   :  { %4353 = vmatmul.mubr.msk.bf16.vlgmr.msra.gmra.mrb[48].mxu0 %vm216_vm0, %v5086_v38  ;;  %4354 = vmatmul.mubr.msk.bf16.vlgmr.msra.gmra.mrb[48].mxu1 %vm216_vm0, %v5086_v38 }
  0x6e   :  { %2045 = vmatpush1.bf16.msra.mxu0 %v4325_v39  ;;  %2086 = vmatpush1.bf16.msra.mxu1 %v4327_v40  ;;  %v4391_v39 = vld [vmem:[%s5707_s1 + $0x4d0] sm:$0xff]  ;;  %v4392_v40 = vld [vmem:[%s5707_s1 + $0x4d8] sm:$0xff] }
  0x6f   :  { %2046 = vmatprep.subr.bf16.mxu0 %v4342_v41  ;;  %2087 = vmatprep.subr.bf16.mxu1 %v4344_v42  ;;  %v5214_v41 = vld [vmem:[%s5708_s0 + $0x10] sm:$0xf]  ;;  %v4402_v42 = vcombine.low %v4367_v29, %v4375_v31  ;;  %v4419_v44 = vcombine.high %v4383_v37, %v4391_v39  ;;  %v4493_v31 = vcombine.high %v4459_v23, %v4467_v24 }
  0x70   :  { %2076 = vmatprep.mubr.bf16.mxu0 %v4615_v3  ;;  %2117 = vmatprep.mubr.bf16.mxu1 %v4615_v3 }
  0x72   :  { %2047 = vmatpush1.bf16.msra.mxu0 %v4341_v47  ;;  %2088 = vmatpush1.bf16.msra.mxu1 %v4343_v48  ;;  %v4377_v47 = vld [vmem:[%s5707_s1 + $0x460] sm:$0xff]  ;;  %v4370_v48 = vld [vmem:[%s5707_s1 + $0x428] sm:$0xff] }
  0x73   :  { %2126 = vmatprep.subr.bf16.mxu0 %v4330_v49  ;;  %2167 = vmatprep.subr.bf16.mxu1 %v4332_v50  ;;  %v4378_v49 = vld [vmem:[%s5707_s1 + $0x468] sm:$0xff]  ;;  %v4418_v50 = vcombine.low %v4383_v37, %v4391_v39  ;;  %v4407_v52 = vcombine.high %v4369_v46, %v4377_v47 }
  0x74   :  { %v4409_v53 = vcombine.high %v4370_v48, %v4378_v49  ;;  %v4408_v59 = vcombine.low %v4370_v48, %v4378_v49  ;;  %v4447_v49 = vld [vmem:[%s5707_s1 + $0x520] sm:$0xff] }
  0x75   :  { %4355 = vmatmul.mubr.msk.bf16.vlgmr.msra.gmra.mrb[52].mxu0 %vm216_vm0, %v5086_v38  ;;  %4356 = vmatmul.mubr.msk.bf16.vlgmr.msra.gmra.mrb[52].mxu1 %vm216_vm0, %v5086_v38 }
  0x76   :  { %2127 = vmatpush1.bf16.msra.mxu0 %v4329_v55  ;;  %2168 = vmatpush1.bf16.msra.mxu1 %v4331_v56  ;;  %v4393_v55 = vld [vmem:[%s5707_s1 + $0x4e0] sm:$0xff]  ;;  %v4386_v56 = vld [vmem:[%s5707_s1 + $0x4a8] sm:$0xff] }
  0x77   :  { %2128 = vmatprep.subr.bf16.mxu0 %v4346_v57  ;;  %2169 = vmatprep.subr.bf16.mxu1 %v4348_v58  ;;  %v4394_v57 = vld [vmem:[%s5707_s1 + $0x4e8] sm:$0xff]  ;;  %v4406_v58 = vcombine.low %v4369_v46, %v4377_v47  ;;  %v4423_v60 = vcombine.high %v4385_v54, %v4393_v55 }
  0x78   :  { %2158 = vmatprep.mubr.bf16.mxu0 %v4615_v3  ;;  %2199 = vmatprep.mubr.bf16.mxu1 %v4615_v3  ;;  %v4425_v61 = vcombine.high %v4386_v56, %v4394_v57  ;;  %v4424_v4 = vcombine.low %v4386_v56, %v4394_v57  ;;  %v4463_v57 = vld [vmem:[%s5707_s1 + $0x5a0] sm:$0xff] }
  0x7a   :  { %2129 = vmatpush1.bf16.msra.mxu0 %v4345_v63  ;;  %2170 = vmatpush1.bf16.msra.mxu1 %v4347_v0  ;;  %v4379_v63 = vld [vmem:[%s5707_s1 + $0x470] sm:$0xff]  ;;  %v4372_v0 = vld [vmem:[%s5707_s1 + $0x438] sm:$0xff] }
  0x7b   :  { %2208 = vmatprep.subr.bf16.mxu0 %v4334_v1  ;;  %2249 = vmatprep.subr.bf16.mxu1 %v4336_v2  ;;  %v4380_v1 = vld [vmem:[%s5707_s1 + $0x478] sm:$0xff]  ;;  %v4422_v2 = vcombine.low %v4385_v54, %v4393_v55  ;;  %v4411_v5 = vcombine.high %v4371_v62, %v4379_v63 }
  0x7c   :  { %v4413_v6 = vcombine.high %v4372_v0, %v4380_v1  ;;  %v4412_v12 = vcombine.low %v4372_v0, %v4380_v1  ;;  %v4449_v1 = vld [vmem:[%s5707_s1 + $0x530] sm:$0xff] }
  0x7d   :  { %4357 = vmatmul.mubr.msk.bf16.vlgmr.msra.gmra.mrb[56].mxu0 %vm216_vm0, %v5086_v38  ;;  %4358 = vmatmul.mubr.msk.bf16.vlgmr.msra.gmra.mrb[56].mxu1 %vm216_vm0, %v5086_v38 }
  0x7e   :  { %2209 = vmatpush1.bf16.msra.mxu0 %v4333_v8  ;;  %2250 = vmatpush1.bf16.msra.mxu1 %v4335_v9  ;;  %v4395_v8 = vld [vmem:[%s5707_s1 + $0x4f0] sm:$0xff]  ;;  %v4388_v9 = vld [vmem:[%s5707_s1 + $0x4b8] sm:$0xff] }
  0x7f   :  { %2210 = vmatprep.subr.bf16.mxu0 %v4350_v10  ;;  %2251 = vmatprep.subr.bf16.mxu1 %v4352_v11  ;;  %v4396_v10 = vld [vmem:[%s5707_s1 + $0x4f8] sm:$0xff]  ;;  %v4410_v11 = vcombine.low %v4371_v62, %v4379_v63  ;;  %v4427_v13 = vcombine.high %v4387_v7, %v4395_v8 }
  0x80   :  { %2240 = vmatprep.mubr.bf16.mxu0 %v4615_v3  ;;  %2281 = vmatprep.mubr.bf16.mxu1 %v4615_v3  ;;  %v4429_v14 = vcombine.high %v4388_v9, %v4396_v10  ;;  %v4428_v20 = vcombine.low %v4388_v9, %v4396_v10  ;;  %v4465_v10 = vld [vmem:[%s5707_s1 + $0x5b0] sm:$0xff] }
  0x82   :  { %2211 = vmatpush1.bf16.msra.mxu0 %v4349_v16  ;;  %2252 = vmatpush1.bf16.msra.mxu1 %v4351_v17  ;;  %v4451_v16 = vld [vmem:[%s5707_s1 + $0x540] sm:$0xff]  ;;  %v4444_v17 = vld [vmem:[%s5707_s1 + $0x508] sm:$0xff] }
  0x83   :  { %2542 = vmatprep.subr.bf16.mxu0 %v4399_v18  ;;  %2583 = vmatprep.subr.bf16.mxu1 %v4401_v19  ;;  %v4452_v18 = vld [vmem:[%s5707_s1 + $0x548] sm:$0xff]  ;;  %v4426_v19 = vcombine.low %v4387_v7, %v4395_v8  ;;  %v4477_v21 = vcombine.high %v4443_v15, %v4451_v16 }
  0x84   :  { %v4479_v22 = vcombine.high %v4444_v17, %v4452_v18  ;;  %v4478_v29 = vcombine.low %v4444_v17, %v4452_v18  ;;  %v4521_v18 = vld [vmem:[%s5707_s1 + $0x600] sm:$0xff] }
  0x85   :  { %4359 = vmatmul.mubr.msk.bf16.vlgmr.msra.gmra.mrb[60].mxu0 %vm216_vm0, %v5086_v38  ;;  %4360 = vmatmul.mubr.msk.bf16.vlgmr.msra.gmra.mrb[60].mxu1 %vm216_vm0, %v5086_v38  ;;  %v4384_v38 = vld [vmem:[%s5707_s1 + $0x498] sm:$0xff] }
  0x86   :  { %2543 = vmatpush1.bf16.msra.mxu0 %v4398_v25  ;;  %2584 = vmatpush1.bf16.msra.mxu1 %v4400_v26  ;;  %v4421_v45 = vcombine.high %v4384_v38, %v4392_v40  ;;  %v4420_v51 = vcombine.low %v4384_v38, %v4392_v40  ;;  %v4460_v25 = vld [vmem:[%s5707_s1 + $0x588] sm:$0xff]  ;;  %v4461_v40 = vld [vmem:[%s5707_s1 + $0x590] sm:$0xff] }
  0x87   :  { %2544 = vmatprep.subr.bf16.mxu0 %v4415_v28  ;;  %2585 = vmatprep.subr.bf16.mxu1 %v4417_v27  ;;  %v4468_v26 = vld [vmem:[%s5707_s1 + $0x5c8] sm:$0xff]  ;;  %v4553_v28 = vld [vmem:[%s5709_s2 + $0x30] sm:$0xff]  ;;  %v4476_v27 = vcombine.low %v4443_v15, %v4451_v16 }
  0x88   :  { %2574 = vmatprep.mubr.bf16.mxu0 %v4615_v3  ;;  %2615 = vmatprep.mubr.bf16.mxu1 %v4615_v3  ;;  %v4495_v32 = vcombine.high %v4460_v25, %v4468_v26  ;;  %v4494_v37 = vcombine.low %v4460_v25, %v4468_v26  ;;  %v4537_v26 = vld [vmem:[%s5707_s1 + $0x680] sm:$0xff] }
  0x89   :  { %3538 = vperm.xlu0 %4613, %v4553_v28   ;;  %v4545_v28 = vld [vmem:[%s5707_s1 + $0x6c0] sm:$0xff] }
  0x8a   :  { %2545 = vmatpush1.bf16.msra.mxu0 %v4414_v33  ;;  %2586 = vmatpush1.bf16.msra.mxu1 %v4416_v34  ;;  %v4453_v33 = vld [vmem:[%s5707_s1 + $0x550] sm:$0xff]  ;;  %v4446_v34 = vld [vmem:[%s5707_s1 + $0x518] sm:$0xff] }
  0x8b   :  { %2624 = vmatprep.subr.bf16.mxu0 %v4403_v36  ;;  %2665 = vmatprep.subr.bf16.mxu1 %v4405_v35  ;;  %v4454_v36 = vld [vmem:[%s5707_s1 + $0x558] sm:$0xff]  ;;  %v4492_v35 = vcombine.low %v4459_v23, %v4467_v24  ;;  %v4481_v39 = vcombine.high %v4445_v30, %v4453_v33 }
  0x8c   :  { %v4483_v38 = vcombine.high %v4446_v34, %v4454_v36  ;;  %v4482_v46 = vcombine.low %v4446_v34, %v4454_v36  ;;  %v4523_v34 = vld [vmem:[%s5707_s1 + $0x610] sm:$0xff] }
  0x8d   :  { %4430 = vmatmul.mubr.msk.bf16.vlgmr.msra.gmra.mrb[64].mxu0 %vm216_vm0, %v5214_v41  ;;  %4431 = vmatmul.mubr.msk.bf16.vlgmr.msra.gmra.mrb[64].mxu1 %vm216_vm0, %v5214_v41  ;;  %v4531_v36 = vld [vmem:[%s5707_s1 + $0x650] sm:$0xff] }
  0x8e   :  { %2625 = vmatpush1.bf16.msra.mxu0 %v4402_v42  ;;  %2666 = vmatpush1.bf16.msra.mxu1 %v4404_v43  ;;  %v4469_v42 = vld [vmem:[%s5707_s1 + $0x5d0] sm:$0xff]  ;;  %v4470_v43 = vld [vmem:[%s5707_s1 + $0x5d8] sm:$0xff] }
  0x8f   :  { %2626 = vmatprep.subr.bf16.mxu0 %v4419_v44  ;;  %2667 = vmatprep.subr.bf16.mxu1 %v4421_v45  ;;  %v5342_v44 = vld [vmem:[%s5708_s0 + $0x14] sm:$0xf]  ;;  %v4480_v45 = vcombine.low %v4445_v30, %v4453_v33  ;;  %v4497_v47 = vcombine.high %v4461_v40, %v4469_v42  ;;  %v4571_v30 = vcombine.high %v4537_v26, %v4545_v28 }
  0x90   :  { %2656 = vmatprep.mubr.bf16.mxu0 %v4615_v3  ;;  %2697 = vmatprep.mubr.bf16.mxu1 %v4615_v3 }
  0x92   :  { %2627 = vmatpush1.bf16.msra.mxu0 %v4418_v50  ;;  %2668 = vmatpush1.bf16.msra.mxu1 %v4420_v51  ;;  %v4455_v50 = vld [vmem:[%s5707_s1 + $0x560] sm:$0xff]  ;;  %v4448_v51 = vld [vmem:[%s5707_s1 + $0x528] sm:$0xff] }
  0x93   :  { %2706 = vmatprep.subr.bf16.mxu0 %v4407_v52  ;;  %2747 = vmatprep.subr.bf16.mxu1 %v4409_v53  ;;  %v4456_v52 = vld [vmem:[%s5707_s1 + $0x568] sm:$0xff]  ;;  %v4496_v53 = vcombine.low %v4461_v40, %v4469_v42  ;;  %v4485_v55 = vcombine.high %v4447_v49, %v4455_v50  ;;  %v4559_v40 = vcombine.high %v4523_v34, %v4531_v36 }
  0x94   :  { %v4487_v56 = vcombine.high %v4448_v51, %v4456_v52  ;;  %v4486_v62 = vcombine.low %v4448_v51, %v4456_v52  ;;  %v4525_v51 = vld [vmem:[%s5707_s1 + $0x620] sm:$0xff] }
  0x95   :  { %4432 = vmatmul.mubr.msk.bf16.vlgmr.msra.gmra.mrb[68].mxu0 %vm216_vm0, %v5214_v41  ;;  %4433 = vmatmul.mubr.msk.bf16.vlgmr.msra.gmra.mrb[68].mxu1 %vm216_vm0, %v5214_v41  ;;  %v4533_v52 = vld [vmem:[%s5707_s1 + $0x660] sm:$0xff] }
  0x96   :  { %2707 = vmatpush1.bf16.msra.mxu0 %v4406_v58  ;;  %2748 = vmatpush1.bf16.msra.mxu1 %v4408_v59  ;;  %v4471_v58 = vld [vmem:[%s5707_s1 + $0x5e0] sm:$0xff]  ;;  %v4464_v59 = vld [vmem:[%s5707_s1 + $0x5a8] sm:$0xff] }
  0x97   :  { %2708 = vmatprep.subr.bf16.mxu0 %v4423_v60  ;;  %2749 = vmatprep.subr.bf16.mxu1 %v4425_v61  ;;  %v4472_v60 = vld [vmem:[%s5707_s1 + $0x5e8] sm:$0xff]  ;;  %v4484_v61 = vcombine.low %v4447_v49, %v4455_v50  ;;  %v4501_v63 = vcombine.high %v4463_v57, %v4471_v58 }
  0x98   :  { %2738 = vmatprep.mubr.bf16.mxu0 %v4615_v3  ;;  %2779 = vmatprep.mubr.bf16.mxu1 %v4615_v3  ;;  %v4503_v0 = vcombine.high %v4464_v59, %v4472_v60  ;;  %v4502_v7 = vcombine.low %v4464_v59, %v4472_v60  ;;  %v4541_v59 = vld [vmem:[%s5707_s1 + $0x6a0] sm:$0xff] }
  0x99   :  { %v4549_v60 = vld [vmem:[%s5707_s1 + $0x6e0] sm:$0xff] }
  0x9a   :  { %2709 = vmatpush1.bf16.msra.mxu0 %v4422_v2  ;;  %2750 = vmatpush1.bf16.msra.mxu1 %v4424_v4  ;;  %v4457_v2 = vld [vmem:[%s5707_s1 + $0x570] sm:$0xff]  ;;  %v4450_v4 = vld [vmem:[%s5707_s1 + $0x538] sm:$0xff] }
  0x9b   :  { %2788 = vmatprep.subr.bf16.mxu0 %v4411_v5  ;;  %2829 = vmatprep.subr.bf16.mxu1 %v4413_v6  ;;  %v4458_v5 = vld [vmem:[%s5707_s1 + $0x578] sm:$0xff]  ;;  %v4500_v6 = vcombine.low %v4463_v57, %v4471_v58  ;;  %v4489_v8 = vcombine.high %v4449_v1, %v4457_v2  ;;  %v4563_v57 = vcombine.high %v4525_v51, %v4533_v52 }
  0x9c   :  { %v4491_v9 = vcombine.high %v4450_v4, %v4458_v5  ;;  %v4490_v15 = vcombine.low %v4450_v4, %v4458_v5  ;;  %v4527_v4 = vld [vmem:[%s5707_s1 + $0x630] sm:$0xff] }
  0x9d   :  { %4434 = vmatmul.mubr.msk.bf16.vlgmr.msra.gmra.mrb[72].mxu0 %vm216_vm0, %v5214_v41  ;;  %4435 = vmatmul.mubr.msk.bf16.vlgmr.msra.gmra.mrb[72].mxu1 %vm216_vm0, %v5214_v41  ;;  %v4535_v5 = vld [vmem:[%s5707_s1 + $0x670] sm:$0xff] }
  0x9e   :  { %2789 = vmatpush1.bf16.msra.mxu0 %v4410_v11  ;;  %2830 = vmatpush1.bf16.msra.mxu1 %v4412_v12  ;;  %v4473_v11 = vld [vmem:[%s5707_s1 + $0x5f0] sm:$0xff]  ;;  %v4466_v12 = vld [vmem:[%s5707_s1 + $0x5b8] sm:$0xff] }
  0x9f   :  { %2790 = vmatprep.subr.bf16.mxu0 %v4427_v13  ;;  %2831 = vmatprep.subr.bf16.mxu1 %v4429_v14  ;;  %v4474_v13 = vld [vmem:[%s5707_s1 + $0x5f8] sm:$0xff]  ;;  %v4488_v14 = vcombine.low %v4449_v1, %v4457_v2  ;;  %v4505_v16 = vcombine.high %v4465_v10, %v4473_v11  ;;  %v4579_v1 = vcombine.high %v4541_v59, %v4549_v60 }
  0xa0   :  { %2820 = vmatprep.mubr.bf16.mxu0 %v4615_v3  ;;  %2861 = vmatprep.mubr.bf16.mxu1 %v4615_v3  ;;  %v4507_v17 = vcombine.high %v4466_v12, %v4474_v13  ;;  %v4506_v23 = vcombine.low %v4466_v12, %v4474_v13  ;;  %v4543_v12 = vld [vmem:[%s5707_s1 + $0x6b0] sm:$0xff] }
  0xa1   :  { %v4551_v13 = vld [vmem:[%s5707_s1 + $0x6f0] sm:$0xff] }
  0xa2   :  { %2791 = vmatpush1.bf16.msra.mxu0 %v4426_v19  ;;  %2832 = vmatpush1.bf16.msra.mxu1 %v4428_v20  ;;  %v4529_v19 = vld [vmem:[%s5707_s1 + $0x640] sm:$0xff]  ;;  %v4522_v20 = vld [vmem:[%s5707_s1 + $0x608] sm:$0xff] }
  0xa3   :  { %3123 = vmatprep.subr.bf16.mxu0 %v4477_v21  ;;  %3164 = vmatprep.subr.bf16.mxu1 %v4479_v22  ;;  %v4530_v21 = vld [vmem:[%s5707_s1 + $0x648] sm:$0xff]  ;;  %v4504_v22 = vcombine.low %v4465_v10, %v4473_v11  ;;  %v4555_v24 = vcombine.high %v4521_v18, %v4529_v19  ;;  %v4567_v10 = vcombine.high %v4527_v4, %v4535_v5 }
  0xa4   :  { %v4557_v25 = vcombine.high %v4522_v20, %v4530_v21 }
  0xa5   :  { %4436 = vmatmul.mubr.msk.bf16.vlgmr.msra.gmra.mrb[76].mxu0 %vm216_vm0, %v5214_v41  ;;  %4437 = vmatmul.mubr.msk.bf16.vlgmr.msra.gmra.mrb[76].mxu1 %vm216_vm0, %v5214_v41  ;;  %v4462_v41 = vld [vmem:[%s5707_s1 + $0x598] sm:$0xff] }
  0xa6   :  { %3124 = vmatpush1.bf16.msra.mxu0 %v4476_v27  ;;  %3165 = vmatpush1.bf16.msra.mxu1 %v4478_v29  ;;  %v4499_v48 = vcombine.high %v4462_v41, %v4470_v43  ;;  %v4498_v54 = vcombine.low %v4462_v41, %v4470_v43  ;;  %v4538_v27 = vld [vmem:[%s5707_s1 + $0x688] sm:$0xff]  ;;  %v4539_v41 = vld [vmem:[%s5707_s1 + $0x690] sm:$0xff] }
  0xa7   :  { %3125 = vmatprep.subr.bf16.mxu0 %v4493_v31  ;;  %3166 = vmatprep.subr.bf16.mxu1 %v4495_v32  ;;  %v4546_v29 = vld [vmem:[%s5707_s1 + $0x6c8] sm:$0xff]  ;;  %v4554_v31 = vcombine.low %v4521_v18, %v4529_v19  ;;  %v4556_v32 = vcombine.low %v4522_v20, %v4530_v21  ;;  %v4547_v43 = vld [vmem:[%s5707_s1 + $0x6d0] sm:$0xff]  ;;  %v4583_v18 = vcombine.high %v4543_v12, %v4551_v13  ;;  %v5533_v20 = vpop.permute.xlu0 %53 }
  0xa8   :  { %3155 = vmatprep.mubr.bf16.mxu0 %v4615_v3  ;;  %3196 = vmatprep.mubr.bf16.mxu1 %v4615_v3  ;;  %v4573_v33 = vcombine.high %v4538_v27, %v4546_v29  ;;  %v4575_v49 = vcombine.high %v4539_v41, %v4547_v43  ;;  %v4582_v21 = vcombine.low %v4543_v12, %v4551_v13 }
  0xaa   :  { %3126 = vmatpush1.bf16.msra.mxu0 %v4492_v35  ;;  %3167 = vmatpush1.bf16.msra.mxu1 %v4494_v37  ;;  %v4524_v35 = vld [vmem:[%s5707_s1 + $0x618] sm:$0xff] }
  0xab   :  { %3205 = vmatprep.subr.bf16.mxu0 %v4481_v39  ;;  %3246 = vmatprep.subr.bf16.mxu1 %v4483_v38  ;;  %v4532_v37 = vld [vmem:[%s5707_s1 + $0x658] sm:$0xff]  ;;  %v4570_v39 = vcombine.low %v4537_v26, %v4545_v28  ;;  %v4572_v38 = vcombine.low %v4538_v27, %v4546_v29 }
  0xac   :  { %v4561_v42 = vcombine.high %v4524_v35, %v4532_v37 }
  0xad   :  { %4508 = vmatmul.mubr.msk.bf16.vlgmr.msra.gmra.mrb[80].mxu0 %vm216_vm0, %v5342_v44  ;;  %4509 = vmatmul.mubr.msk.bf16.vlgmr.msra.gmra.mrb[80].mxu1 %vm216_vm0, %v5342_v44 }
  0xae   :  { %3206 = vmatpush1.bf16.msra.mxu0 %v4480_v45  ;;  %3247 = vmatpush1.bf16.msra.mxu1 %v4482_v46  ;;  %v4548_v45 = vld [vmem:[%s5707_s1 + $0x6d8] sm:$0xff] }
  0xaf   :  { %3207 = vmatprep.subr.bf16.mxu0 %v4497_v47  ;;  %3248 = vmatprep.subr.bf16.mxu1 %v4499_v48  ;;  %v5467_v46 = vld [vmem:[%s5708_s0 + $0x18] sm:$0xf]  ;;  %v4558_v47 = vcombine.low %v4523_v34, %v4531_v36  ;;  %v4560_v48 = vcombine.low %v4524_v35, %v4532_v37 }
  0xb0   :  { %3237 = vmatprep.mubr.bf16.mxu0 %v4615_v3  ;;  %3278 = vmatprep.mubr.bf16.mxu1 %v4615_v3 }
  0xb2   :  { %3208 = vmatpush1.bf16.msra.mxu0 %v4496_v53  ;;  %3249 = vmatpush1.bf16.msra.mxu1 %v4498_v54  ;;  %v4526_v53 = vld [vmem:[%s5707_s1 + $0x628] sm:$0xff] }
  0xb3   :  { %3287 = vmatprep.subr.bf16.mxu0 %v4485_v55  ;;  %3328 = vmatprep.subr.bf16.mxu1 %v4487_v56  ;;  %v4534_v54 = vld [vmem:[%s5707_s1 + $0x668] sm:$0xff]  ;;  %v4574_v55 = vcombine.low %v4539_v41, %v4547_v43 }
  0xb4   :  { %v4565_v58 = vcombine.high %v4526_v53, %v4534_v54 }
  0xb5   :  { %4510 = vmatmul.mubr.msk.bf16.vlgmr.msra.gmra.mrb[84].mxu0 %vm216_vm0, %v5342_v44  ;;  %4511 = vmatmul.mubr.msk.bf16.vlgmr.msra.gmra.mrb[84].mxu1 %vm216_vm0, %v5342_v44 }
  0xb6   :  { %3288 = vmatpush1.bf16.msra.mxu0 %v4484_v61  ;;  %3329 = vmatpush1.bf16.msra.mxu1 %v4486_v62  ;;  %v4542_v61 = vld [vmem:[%s5707_s1 + $0x6a8] sm:$0xff] }
  0xb7   :  { %3289 = vmatprep.subr.bf16.mxu0 %v4501_v63  ;;  %3330 = vmatprep.subr.bf16.mxu1 %v4503_v0  ;;  %v4550_v62 = vld [vmem:[%s5707_s1 + $0x6e8] sm:$0xff]  ;;  %v4562_v63 = vcombine.low %v4525_v51, %v4533_v52  ;;  %v4564_v0 = vcombine.low %v4526_v53, %v4534_v54 }
  0xb8   :  { %3319 = vmatprep.mubr.bf16.mxu0 %v4615_v3  ;;  %3360 = vmatprep.mubr.bf16.mxu1 %v4615_v3  ;;  %v4581_v2 = vcombine.high %v4542_v61, %v4550_v62 }
  0xba   :  { %3290 = vmatpush1.bf16.msra.mxu0 %v4500_v6  ;;  %3331 = vmatpush1.bf16.msra.mxu1 %v4502_v7  ;;  %v4528_v6 = vld [vmem:[%s5707_s1 + $0x638] sm:$0xff] }
  0xbb   :  { %3369 = vmatprep.subr.bf16.mxu0 %v4489_v8  ;;  %3410 = vmatprep.subr.bf16.mxu1 %v4491_v9  ;;  %v4536_v7 = vld [vmem:[%s5707_s1 + $0x678] sm:$0xff]  ;;  %v4578_v8 = vcombine.low %v4541_v59, %v4549_v60  ;;  %v4580_v9 = vcombine.low %v4542_v61, %v4550_v62 }
  0xbc   :  { %v4569_v11 = vcombine.high %v4528_v6, %v4536_v7 }
  0xbd   :  { %4512 = vmatmul.mubr.msk.bf16.vlgmr.msra.gmra.mrb[88].mxu0 %vm216_vm0, %v5342_v44  ;;  %4513 = vmatmul.mubr.msk.bf16.vlgmr.msra.gmra.mrb[88].mxu1 %vm216_vm0, %v5342_v44 }
  0xbe   :  { %3370 = vmatpush1.bf16.msra.mxu0 %v4488_v14  ;;  %3411 = vmatpush1.bf16.msra.mxu1 %v4490_v15  ;;  %v4544_v14 = vld [vmem:[%s5707_s1 + $0x6b8] sm:$0xff] }
  0xbf   :  { %3371 = vmatprep.subr.bf16.mxu0 %v4505_v16  ;;  %3412 = vmatprep.subr.bf16.mxu1 %v4507_v17  ;;  %v4552_v15 = vld [vmem:[%s5707_s1 + $0x6f8] sm:$0xff]  ;;  %v4566_v16 = vcombine.low %v4527_v4, %v4535_v5  ;;  %v4568_v17 = vcombine.low %v4528_v6, %v4536_v7 }
  0xc0   :  { %3401 = vmatprep.mubr.bf16.mxu0 %v4615_v3  ;;  %3442 = vmatprep.mubr.bf16.mxu1 %v4615_v3  ;;  %v4585_v19 = vcombine.high %v4544_v14, %v4552_v15 }
  0xc2   :  { %3372 = vmatpush1.bf16.msra.mxu0 %v4504_v22  ;;  %3413 = vmatpush1.bf16.msra.mxu1 %v4506_v23  ;;  %v4584_v22 = vcombine.low %v4544_v14, %v4552_v15 }
  0xc3   :  { %3704 = vmatprep.subr.bf16.mxu0 %v4555_v24  ;;  %3745 = vmatprep.subr.bf16.mxu1 %v4557_v25 }
  0xc5   :  { %4514 = vmatmul.mubr.msk.bf16.vlgmr.msra.gmra.mrb[92].mxu0 %vm216_vm0, %v5342_v44  ;;  %4515 = vmatmul.mubr.msk.bf16.vlgmr.msra.gmra.mrb[92].mxu1 %vm216_vm0, %v5342_v44  ;;  %v4540_v44 = vld [vmem:[%s5707_s1 + $0x698] sm:$0xff] }
  0xc6   :  { %3705 = vmatpush1.bf16.msra.mxu0 %v4554_v31  ;;  %3746 = vmatpush1.bf16.msra.mxu1 %v4556_v32  ;;  %v4577_v50 = vcombine.high %v4540_v44, %v4548_v45  ;;  %v4576_v56 = vcombine.low %v4540_v44, %v4548_v45 }
  0xc7   :  { %3706 = vmatprep.subr.bf16.mxu0 %v4571_v30  ;;  %3747 = vmatprep.subr.bf16.mxu1 %v4573_v33 }
  0xc8   :  { %3736 = vmatprep.mubr.bf16.mxu0 %v4615_v3  ;;  %3777 = vmatprep.mubr.bf16.mxu1 %v4615_v3 }
  0xca   :  { %3707 = vmatpush1.bf16.msra.mxu0 %v4570_v39  ;;  %3748 = vmatpush1.bf16.msra.mxu1 %v4572_v38 }
  0xcb   :  { %3786 = vmatprep.subr.bf16.mxu0 %v4559_v40  ;;  %3827 = vmatprep.subr.bf16.mxu1 %v4561_v42 }
  0xcd   :  { %4586 = vmatmul.mubr.msk.bf16.vlgmr.msra.gmra.mrb[96].mxu0 %vm216_vm0, %v5467_v46  ;;  %4587 = vmatmul.mubr.msk.bf16.vlgmr.msra.gmra.mrb[96].mxu1 %vm216_vm0, %v5467_v46 }
  0xce   :  { %3787 = vmatpush1.bf16.msra.mxu0 %v4558_v47  ;;  %3828 = vmatpush1.bf16.msra.mxu1 %v4560_v48 }
  0xcf   :  { %3788 = vmatprep.subr.bf16.mxu0 %v4575_v49  ;;  %3829 = vmatprep.subr.bf16.mxu1 %v4577_v50 }
  0xd0   :  { %3818 = vmatprep.mubr.bf16.mxu0 %v4615_v3  ;;  %3859 = vmatprep.mubr.bf16.mxu1 %v4615_v3 }
  0xd2   :  { %3789 = vmatpush1.bf16.msra.mxu0 %v4574_v55  ;;  %3830 = vmatpush1.bf16.msra.mxu1 %v4576_v56 }
  0xd3   :  { %3868 = vmatprep.subr.bf16.mxu0 %v4563_v57  ;;  %3909 = vmatprep.subr.bf16.mxu1 %v4565_v58 }
  0xd5   :  { %4588 = vmatmul.mubr.msk.bf16.vlgmr.msra.gmra.mrb[100].mxu0 %vm216_vm0, %v5467_v46  ;;  %4589 = vmatmul.mubr.msk.bf16.vlgmr.msra.gmra.mrb[100].mxu1 %vm216_vm0, %v5467_v46 }
  0xd6   :  { %3869 = vmatpush1.bf16.msra.mxu0 %v4562_v63  ;;  %3910 = vmatpush1.bf16.msra.mxu1 %v4564_v0 }
  0xd7   :  { %3870 = vmatprep.subr.bf16.mxu0 %v4579_v1  ;;  %3911 = vmatprep.subr.bf16.mxu1 %v4581_v2 }
  0xd8   :  { %3900 = vmatprep.mubr.bf16.mxu0 %v4615_v3  ;;  %3941 = vmatprep.mubr.bf16.mxu1 %v4615_v3 }
  0xda   :  { %3871 = vmatpush1.bf16.msra.mxu0 %v4578_v8  ;;  %3912 = vmatpush1.bf16.msra.mxu1 %v4580_v9 }
  0xdb   :  { %3950 = vmatprep.subr.bf16.mxu0 %v4567_v10  ;;  %3991 = vmatprep.subr.bf16.mxu1 %v4569_v11 }
  0xdd   :  { %4590 = vmatmul.mubr.msk.bf16.vlgmr.msra.gmra.mrb[104].mxu0 %vm216_vm0, %v5467_v46  ;;  %4591 = vmatmul.mubr.msk.bf16.vlgmr.msra.gmra.mrb[104].mxu1 %vm216_vm0, %v5467_v46 }
  0xde   :  { %3951 = vmatpush1.bf16.msra.mxu0 %v4566_v16  ;;  %3992 = vmatpush1.bf16.msra.mxu1 %v4568_v17 }
  0xdf   :  { %3952 = vmatprep.subr.bf16.mxu0 %v4583_v18  ;;  %3993 = vmatprep.subr.bf16.mxu1 %v4585_v19 }
  0xe0   :  { %v254_v23 = vpop.f32.mrb[0].mxu0  ;;  %3982 = vmatprep.mubr.bf16.mxu0 %v4615_v3  ;;  %v295_v24 = vpop.f32.mrb[0].mxu1  ;;  %4023 = vmatprep.mubr.bf16.mxu1 %v4615_v3 }
  0xe1   :  { %v256_v25 = vpop.f32.mrb[1].mxu0  ;;  %v255_v26 = vadd.f32 %v254_v23, %v5533_v20  ;;  %v297_v27 = vpop.f32.mrb[1].mxu1  ;;  %v296_v31 = vadd.f32 %v295_v24, %v5533_v20 }
  0xe2   :  { %v257_v28 = vadd.f32 %v256_v25, %v5533_v20  ;;  %v258_v29 = vpop.f32.mrb[2].mxu0  ;;  %3953 = vmatpush1.bf16.msra.mxu0 %v4582_v21  ;;  %v298_v32 = vadd.f32 %v297_v27, %v5533_v20  ;;  %v299_v30 = vpop.f32.mrb[2].mxu1  ;;  %3994 = vmatpush1.bf16.msra.mxu1 %v4584_v22 }
  0xe3   :  { %v259_v33 = vpop.f32.mrb[3].mxu0  ;;  %v548_v34 = vmax.f32 %v255_v26, 0.0  ;;  %v300_v35 = vpop.f32.mrb[3].mxu1  ;;  %v550_v37 = vmax.f32 %v296_v31, 0.0 }
  0xe4   :  { %v549_v36 = vmax.f32 %v257_v28, 0.0  ;;  %v551_v39 = vmax.f32 %v298_v32, 0.0 }
  0xe5   :  { %4592 = vmatmul.mubr.msk.bf16.vlgmr.msra.gmra.mrb[108].mxu0 %vm216_vm0, %v5467_v46  ;;  %4593 = vmatmul.mubr.msk.bf16.vlgmr.msra.gmra.mrb[108].mxu1 %vm216_vm0, %v5467_v46  ;;  %v564_v3 = vmax.f32 %v548_v34, %v550_v37  ;;  %v5560_v34 = vpop.permute.xlu0 %634 }
  0xe6   :  { %v565_v38 = vmax.f32 %v549_v36, %v551_v39 }
  0xe8   :  { %v336_v40 = vpop.f32.mrb[4].mxu0  ;;  %v377_v41 = vpop.f32.mrb[4].mxu1 }
  0xe9   :  { %v337_v42 = vadd.f32 %v336_v40, %v5533_v20  ;;  %v338_v43 = vpop.f32.mrb[5].mxu0  ;;  %v378_v44 = vadd.f32 %v377_v41, %v5533_v20  ;;  %v379_v47 = vpop.f32.mrb[5].mxu1 }
  0xea   :  { %v339_v45 = vadd.f32 %v338_v43, %v5533_v20  ;;  %v340_v48 = vpop.f32.mrb[6].mxu0  ;;  %v380_v50 = vadd.f32 %v379_v47, %v5533_v20  ;;  %v381_v51 = vpop.f32.mrb[6].mxu1 }
  0xeb   :  { %v552_v49 = vmax.f32 %v337_v42, 0.0  ;;  %v341_v52 = vpop.f32.mrb[7].mxu0  ;;  %v554_v53 = vmax.f32 %v378_v44, 0.0  ;;  %v382_v54 = vpop.f32.mrb[7].mxu1 }
  0xec   :  { %v553_v46 = vmax.f32 %v339_v45, 0.0  ;;  %v555_v55 = vmax.f32 %v380_v50, 0.0 }
  0xed   :  { %v566_v56 = vmax.f32 %v552_v49, %v554_v53 }
  0xee   :  { %v567_v57 = vmax.f32 %v553_v46, %v555_v55 }
  0xef   :  { %v568_v58 = vmax.f32 %v564_v3, %v566_v56 }
  0xf0   :  { %v418_v59 = vpop.f32.mrb[8].mxu0  ;;  %v569_v60 = vmax.f32 %v565_v38, %v567_v57  ;;  %v459_v62 = vpop.f32.mrb[8].mxu1 }
  0xf1   :  { %v419_v61 = vadd.f32 %v418_v59, %v5533_v20  ;;  %v420_v63 = vpop.f32.mrb[9].mxu0  ;;  %v460_v0 = vadd.f32 %v459_v62, %v5533_v20  ;;  %v461_v2 = vpop.f32.mrb[9].mxu1 }
  0xf2   :  { %v421_v1 = vadd.f32 %v420_v63, %v5533_v20  ;;  %v422_v4 = vpop.f32.mrb[10].mxu0  ;;  %v4598_v5 = vpack.c.bf16 %v569_v60, %v568_v58  ;;  %v462_v7 = vadd.f32 %v461_v2, %v5533_v20  ;;  %v463_v8 = vpop.f32.mrb[10].mxu1 }
  0xf3   :  { %v556_v6 = vmax.f32 %v419_v61, 0.0  ;;  %v423_v9 = vpop.f32.mrb[11].mxu0  ;;  %v558_v10 = vmax.f32 %v460_v0, 0.0  ;;  %v464_v12 = vpop.f32.mrb[11].mxu1 }
  0xf4   :  { %v557_v11 = vmax.f32 %v421_v1, 0.0  ;;  %578 = vst [vmem:[%s5710_s3] sm:$0xff] %v4598_v5  ;;  %v559_v13 = vmax.f32 %v462_v7, 0.0 }
  0xf5   :  { %v579_v14 = vmax.f32 %v556_v6, %v558_v10 }
  0xf6   :  { %v580_v15 = vmax.f32 %v557_v11, %v559_v13 }
  0xf8   :  { %v500_v16 = vpop.f32.mrb[12].mxu0  ;;  %v541_v18 = vpop.f32.mrb[12].mxu1 }
  0xf9   :  { %v501_v17 = vadd.f32 %v500_v16, %v5533_v20  ;;  %v502_v19 = vpop.f32.mrb[13].mxu0  ;;  %v542_v21 = vadd.f32 %v541_v18, %v5533_v20  ;;  %v543_v23 = vpop.f32.mrb[13].mxu1 }
  0xfa   :  { %v503_v22 = vadd.f32 %v502_v19, %v5533_v20  ;;  %v504_v24 = vpop.f32.mrb[14].mxu0  ;;  %v544_v26 = vadd.f32 %v543_v23, %v5533_v20  ;;  %v545_v28 = vpop.f32.mrb[14].mxu1 }
  0xfb   :  { %v560_v25 = vmax.f32 %v501_v17, 0.0  ;;  %v505_v27 = vpop.f32.mrb[15].mxu0  ;;  %v562_v29 = vmax.f32 %v542_v21, 0.0  ;;  %v546_v32 = vpop.f32.mrb[15].mxu1 }
  0xfc   :  { %v561_v31 = vmax.f32 %v503_v22, 0.0  ;;  %v563_v30 = vmax.f32 %v544_v26, 0.0 }
  0xfd   :  { %v581_v33 = vmax.f32 %v560_v25, %v562_v29 }
  0xfe   :  { %v582_v36 = vmax.f32 %v561_v31, %v563_v30 }
  0xff   :  { %v583_v35 = vmax.f32 %v579_v14, %v581_v33 }
 0x100   :  { %v834_v37 = vpop.f32.mrb[16].mxu0  ;;  %v584_v39 = vmax.f32 %v580_v15, %v582_v36  ;;  %v875_v3 = vpop.f32.mrb[16].mxu1 }
 0x101   :  { %v836_v38 = vpop.f32.mrb[17].mxu0  ;;  %v835_v40 = vadd.f32 %v834_v37, %v5560_v34  ;;  %v877_v20 = vpop.f32.mrb[17].mxu1  ;;  %v876_v43 = vadd.f32 %v875_v3, %v5560_v34 }
 0x102   :  { %v837_v42 = vadd.f32 %v836_v38, %v5560_v34  ;;  %v838_v41 = vpop.f32.mrb[18].mxu0  ;;  %v4599_v44 = vpack.c.bf16 %v584_v39, %v583_v35  ;;  %v878_v45 = vadd.f32 %v877_v20, %v5560_v34  ;;  %v879_v47 = vpop.f32.mrb[18].mxu1 }
 0x103   :  { %v839_v48 = vpop.f32.mrb[19].mxu0  ;;  %v1128_v49 = vmax.f32 %v835_v40, 0.0  ;;  %v880_v51 = vpop.f32.mrb[19].mxu1  ;;  %v1130_v52 = vmax.f32 %v876_v43, 0.0 }
 0x104   :  { %v1129_v50 = vmax.f32 %v837_v42, 0.0  ;;  %4130 = vst [vmem:[%s5710_s3 + $0x8] sm:$0xff] %v4599_v44  ;;  %v1131_v53 = vmax.f32 %v878_v45, 0.0 }
 0x105   :  { %v1144_v46 = vmax.f32 %v1128_v49, %v1130_v52  ;;  %v5584_v49 = vpop.permute.xlu1 %1215 }
 0x106   :  { %v1145_v54 = vmax.f32 %v1129_v50, %v1131_v53 }
 0x108   :  { %v916_v55 = vpop.f32.mrb[20].mxu0  ;;  %v957_v57 = vpop.f32.mrb[20].mxu1 }
 0x109   :  { %v917_v56 = vadd.f32 %v916_v55, %v5560_v34  ;;  %v918_v58 = vpop.f32.mrb[21].mxu0  ;;  %v958_v59 = vadd.f32 %v957_v57, %v5560_v34  ;;  %v959_v61 = vpop.f32.mrb[21].mxu1 }
 0x10a   :  { %v919_v60 = vadd.f32 %v918_v58, %v5560_v34  ;;  %v920_v62 = vpop.f32.mrb[22].mxu0  ;;  %v960_v0 = vadd.f32 %v959_v61, %v5560_v34  ;;  %v961_v1 = vpop.f32.mrb[22].mxu1 }
 0x10b   :  { %v1132_v63 = vmax.f32 %v917_v56, 0.0  ;;  %v921_v2 = vpop.f32.mrb[23].mxu0  ;;  %v1134_v4 = vmax.f32 %v958_v59, 0.0  ;;  %v962_v6 = vpop.f32.mrb[23].mxu1 }
 0x10c   :  { %v1133_v5 = vmax.f32 %v919_v60, 0.0  ;;  %v1135_v7 = vmax.f32 %v960_v0, 0.0 }
 0x10d   :  { %v1146_v8 = vmax.f32 %v1132_v63, %v1134_v4 }
 0x10e   :  { %v1147_v9 = vmax.f32 %v1133_v5, %v1135_v7 }
 0x10f   :  { %v1148_v10 = vmax.f32 %v1144_v46, %v1146_v8 }
 0x110   :  { %v998_v11 = vpop.f32.mrb[24].mxu0  ;;  %v1149_v12 = vmax.f32 %v1145_v54, %v1147_v9  ;;  %v1039_v14 = vpop.f32.mrb[24].mxu1 }
 0x111   :  { %v999_v13 = vadd.f32 %v998_v11, %v5560_v34  ;;  %v1000_v15 = vpop.f32.mrb[25].mxu0  ;;  %v1040_v16 = vadd.f32 %v1039_v14, %v5560_v34  ;;  %v1041_v18 = vpop.f32.mrb[25].mxu1 }
 0x112   :  { %v1001_v17 = vadd.f32 %v1000_v15, %v5560_v34  ;;  %v1002_v19 = vpop.f32.mrb[26].mxu0  ;;  %v4600_v21 = vpack.c.bf16 %v1149_v12, %v1148_v10  ;;  %v1042_v23 = vadd.f32 %v1041_v18, %v5560_v34  ;;  %v1043_v24 = vpop.f32.mrb[26].mxu1 }
 0x113   :  { %v1136_v22 = vmax.f32 %v999_v13, 0.0  ;;  %v1003_v25 = vpop.f32.mrb[27].mxu0  ;;  %v1138_v26 = vmax.f32 %v1040_v16, 0.0  ;;  %v1044_v27 = vpop.f32.mrb[27].mxu1 }
 0x114   :  { %v1137_v28 = vmax.f32 %v1001_v17, 0.0  ;;  %4206 = vst [vmem:[%s5710_s3 + $0x10] sm:$0xff] %v4600_v21  ;;  %v1139_v29 = vmax.f32 %v1042_v23, 0.0 }
 0x115   :  { %v1160_v31 = vmax.f32 %v1136_v22, %v1138_v26 }
 0x116   :  { %v1161_v32 = vmax.f32 %v1137_v28, %v1139_v29 }
 0x118   :  { %v1080_v30 = vpop.f32.mrb[28].mxu0  ;;  %v1121_v36 = vpop.f32.mrb[28].mxu1 }
 0x119   :  { %v1081_v33 = vadd.f32 %v1080_v30, %v5560_v34  ;;  %v1082_v35 = vpop.f32.mrb[29].mxu0  ;;  %v1122_v37 = vadd.f32 %v1121_v36, %v5560_v34  ;;  %v1123_v3 = vpop.f32.mrb[29].mxu1 }
 0x11a   :  { %v1083_v39 = vadd.f32 %v1082_v35, %v5560_v34  ;;  %v1084_v38 = vpop.f32.mrb[30].mxu0  ;;  %v1124_v42 = vadd.f32 %v1123_v3, %v5560_v34  ;;  %v1125_v20 = vpop.f32.mrb[30].mxu1 }
 0x11b   :  { %v1140_v40 = vmax.f32 %v1081_v33, 0.0  ;;  %v1085_v41 = vpop.f32.mrb[31].mxu0  ;;  %v1142_v43 = vmax.f32 %v1122_v37, 0.0  ;;  %v1126_v45 = vpop.f32.mrb[31].mxu1 }
 0x11c   :  { %v1141_v44 = vmax.f32 %v1083_v39, 0.0  ;;  %v1143_v47 = vmax.f32 %v1124_v42, 0.0 }
 0x11d   :  { %v1162_v48 = vmax.f32 %v1140_v40, %v1142_v43 }
 0x11e   :  { %v1163_v50 = vmax.f32 %v1141_v44, %v1143_v47 }
 0x11f   :  { %v1164_v51 = vmax.f32 %v1160_v31, %v1162_v48 }
 0x120   :  { %v1415_v52 = vpop.f32.mrb[32].mxu0  ;;  %v1165_v53 = vmax.f32 %v1161_v32, %v1163_v50  ;;  %v1456_v46 = vpop.f32.mrb[32].mxu1 }
 0x121   :  { %v1417_v54 = vpop.f32.mrb[33].mxu0  ;;  %v1416_v55 = vadd.f32 %v1415_v52, %v5584_v49  ;;  %v1458_v34 = vpop.f32.mrb[33].mxu1  ;;  %v1457_v58 = vadd.f32 %v1456_v46, %v5584_v49 }
 0x122   :  { %v1418_v56 = vadd.f32 %v1417_v54, %v5584_v49  ;;  %v1419_v57 = vpop.f32.mrb[34].mxu0  ;;  %v4601_v59 = vpack.c.bf16 %v1165_v53, %v1164_v51  ;;  %v1459_v60 = vadd.f32 %v1458_v34, %v5584_v49  ;;  %v1460_v61 = vpop.f32.mrb[34].mxu1 }
 0x123   :  { %v1420_v62 = vpop.f32.mrb[35].mxu0  ;;  %v1709_v63 = vmax.f32 %v1416_v55, 0.0  ;;  %v1461_v1 = vpop.f32.mrb[35].mxu1  ;;  %v1711_v2 = vmax.f32 %v1457_v58, 0.0 }
 0x124   :  { %v1710_v0 = vmax.f32 %v1418_v56, 0.0  ;;  %4208 = vst [vmem:[%s5710_s3 + $0x18] sm:$0xff] %v4601_v59  ;;  %v1712_v4 = vmax.f32 %v1459_v60, 0.0 }
 0x125   :  { %v1725_v5 = vmax.f32 %v1709_v63, %v1711_v2  ;;  %v5608_v63 = vpop.permute.xlu1 %1796 }
 0x126   :  { %v1726_v6 = vmax.f32 %v1710_v0, %v1712_v4 }
 0x128   :  { %v1497_v7 = vpop.f32.mrb[36].mxu0  ;;  %v1538_v9 = vpop.f32.mrb[36].mxu1 }
 0x129   :  { %v1498_v8 = vadd.f32 %v1497_v7, %v5584_v49  ;;  %v1499_v10 = vpop.f32.mrb[37].mxu0  ;;  %v1539_v11 = vadd.f32 %v1538_v9, %v5584_v49  ;;  %v1540_v13 = vpop.f32.mrb[37].mxu1 }
 0x12a   :  { %v1500_v12 = vadd.f32 %v1499_v10, %v5584_v49  ;;  %v1501_v14 = vpop.f32.mrb[38].mxu0  ;;  %v1541_v16 = vadd.f32 %v1540_v13, %v5584_v49  ;;  %v1542_v17 = vpop.f32.mrb[38].mxu1 }
 0x12b   :  { %v1713_v15 = vmax.f32 %v1498_v8, 0.0  ;;  %v1502_v18 = vpop.f32.mrb[39].mxu0  ;;  %v1715_v19 = vmax.f32 %v1539_v11, 0.0  ;;  %v1543_v22 = vpop.f32.mrb[39].mxu1 }
 0x12c   :  { %v1714_v21 = vmax.f32 %v1500_v12, 0.0  ;;  %v1716_v23 = vmax.f32 %v1541_v16, 0.0 }
 0x12d   :  { %v1727_v24 = vmax.f32 %v1713_v15, %v1715_v19 }
 0x12e   :  { %v1728_v25 = vmax.f32 %v1714_v21, %v1716_v23 }
 0x12f   :  { %v1729_v26 = vmax.f32 %v1725_v5, %v1727_v24 }
 0x130   :  { %v1579_v28 = vpop.f32.mrb[40].mxu0  ;;  %v1730_v27 = vmax.f32 %v1726_v6, %v1728_v25  ;;  %v1620_v31 = vpop.f32.mrb[40].mxu1 }
 0x131   :  { %v1580_v29 = vadd.f32 %v1579_v28, %v5584_v49  ;;  %v1581_v32 = vpop.f32.mrb[41].mxu0  ;;  %v1621_v30 = vadd.f32 %v1620_v31, %v5584_v49  ;;  %v1622_v36 = vpop.f32.mrb[41].mxu1 }
 0x132   :  { %v1582_v33 = vadd.f32 %v1581_v32, %v5584_v49  ;;  %v1583_v35 = vpop.f32.mrb[42].mxu0  ;;  %v4602_v37 = vpack.c.bf16 %v1730_v27, %v1729_v26  ;;  %v1623_v3 = vadd.f32 %v1622_v36, %v5584_v49  ;;  %v1624_v38 = vpop.f32.mrb[42].mxu1 }
 0x133   :  { %v1717_v39 = vmax.f32 %v1580_v29, 0.0  ;;  %v1584_v40 = vpop.f32.mrb[43].mxu0  ;;  %v1719_v42 = vmax.f32 %v1621_v30, 0.0  ;;  %v1625_v41 = vpop.f32.mrb[43].mxu1 }
 0x134   :  { %v1718_v20 = vmax.f32 %v1582_v33, 0.0  ;;  %4284 = vst [vmem:[%s5710_s3 + $0x20] sm:$0xff] %v4602_v37  ;;  %v1720_v43 = vmax.f32 %v1623_v3, 0.0 }
 0x135   :  { %v1741_v44 = vmax.f32 %v1717_v39, %v1719_v42 }
 0x136   :  { %v1742_v45 = vmax.f32 %v1718_v20, %v1720_v43 }
 0x138   :  { %v1661_v47 = vpop.f32.mrb[44].mxu0  ;;  %v1702_v50 = vpop.f32.mrb[44].mxu1 }
 0x139   :  { %v1662_v48 = vadd.f32 %v1661_v47, %v5584_v49  ;;  %v1663_v51 = vpop.f32.mrb[45].mxu0  ;;  %v1703_v52 = vadd.f32 %v1702_v50, %v5584_v49  ;;  %v1704_v46 = vpop.f32.mrb[45].mxu1 }
 0x13a   :  { %v1664_v53 = vadd.f32 %v1663_v51, %v5584_v49  ;;  %v1665_v54 = vpop.f32.mrb[46].mxu0  ;;  %v1705_v56 = vadd.f32 %v1704_v46, %v5584_v49  ;;  %v1706_v34 = vpop.f32.mrb[46].mxu1 }
 0x13b   :  { %v1721_v55 = vmax.f32 %v1662_v48, 0.0  ;;  %v1666_v57 = vpop.f32.mrb[47].mxu0  ;;  %v1723_v58 = vmax.f32 %v1703_v52, 0.0  ;;  %v1707_v60 = vpop.f32.mrb[47].mxu1 }
 0x13c   :  { %v1722_v59 = vmax.f32 %v1664_v53, 0.0  ;;  %v1724_v61 = vmax.f32 %v1705_v56, 0.0 }
 0x13d   :  { %v1743_v62 = vmax.f32 %v1721_v55, %v1723_v58 }
 0x13e   :  { %v1744_v0 = vmax.f32 %v1722_v59, %v1724_v61 }
 0x13f   :  { %v1745_v1 = vmax.f32 %v1741_v44, %v1743_v62 }
 0x140   :  { %v1996_v2 = vpop.f32.mrb[48].mxu0  ;;  %v1746_v4 = vmax.f32 %v1742_v45, %v1744_v0  ;;  %v2037_v5 = vpop.f32.mrb[48].mxu1 }
 0x141   :  { %v1998_v6 = vpop.f32.mrb[49].mxu0  ;;  %v1997_v7 = vadd.f32 %v1996_v2, %v5608_v63  ;;  %v2039_v49 = vpop.f32.mrb[49].mxu1  ;;  %v2038_v10 = vadd.f32 %v2037_v5, %v5608_v63 }
 0x142   :  { %v1999_v8 = vadd.f32 %v1998_v6, %v5608_v63  ;;  %v2000_v9 = vpop.f32.mrb[50].mxu0  ;;  %v4603_v11 = vpack.c.bf16 %v1746_v4, %v1745_v1  ;;  %v2040_v12 = vadd.f32 %v2039_v49, %v5608_v63  ;;  %v2041_v13 = vpop.f32.mrb[50].mxu1 }
 0x143   :  { %v2001_v14 = vpop.f32.mrb[51].mxu0  ;;  %v2290_v15 = vmax.f32 %v1997_v7, 0.0  ;;  %v2042_v17 = vpop.f32.mrb[51].mxu1  ;;  %v2292_v18 = vmax.f32 %v2038_v10, 0.0 }
 0x144   :  { %v2291_v16 = vmax.f32 %v1999_v8, 0.0  ;;  %4286 = vst [vmem:[%s5710_s3 + $0x28] sm:$0xff] %v4603_v11  ;;  %v2293_v19 = vmax.f32 %v2040_v12, 0.0 }
 0x145   :  { %v2306_v21 = vmax.f32 %v2290_v15, %v2292_v18  ;;  %v5632_v15 = vpop.permute.xlu0 %2376 }
 0x146   :  { %v2307_v22 = vmax.f32 %v2291_v16, %v2293_v19 }
 0x148   :  { %v2078_v23 = vpop.f32.mrb[52].mxu0  ;;  %v2119_v25 = vpop.f32.mrb[52].mxu1 }
 0x149   :  { %v2079_v24 = vadd.f32 %v2078_v23, %v5608_v63  ;;  %v2080_v26 = vpop.f32.mrb[53].mxu0  ;;  %v2120_v28 = vadd.f32 %v2119_v25, %v5608_v63  ;;  %v2121_v29 = vpop.f32.mrb[53].mxu1 }
 0x14a   :  { %v2081_v27 = vadd.f32 %v2080_v26, %v5608_v63  ;;  %v2082_v31 = vpop.f32.mrb[54].mxu0  ;;  %v2122_v30 = vadd.f32 %v2121_v29, %v5608_v63  ;;  %v2123_v33 = vpop.f32.mrb[54].mxu1 }
 0x14b   :  { %v2294_v32 = vmax.f32 %v2079_v24, 0.0  ;;  %v2083_v36 = vpop.f32.mrb[55].mxu0  ;;  %v2296_v35 = vmax.f32 %v2120_v28, 0.0  ;;  %v2124_v39 = vpop.f32.mrb[55].mxu1 }
 0x14c   :  { %v2295_v37 = vmax.f32 %v2081_v27, 0.0  ;;  %v2297_v3 = vmax.f32 %v2122_v30, 0.0 }
 0x14d   :  { %v2308_v38 = vmax.f32 %v2294_v32, %v2296_v35 }
 0x14e   :  { %v2309_v40 = vmax.f32 %v2295_v37, %v2297_v3 }
 0x14f   :  { %v2310_v42 = vmax.f32 %v2306_v21, %v2308_v38 }
 0x150   :  { %v2160_v20 = vpop.f32.mrb[56].mxu0  ;;  %v2311_v41 = vmax.f32 %v2307_v22, %v2309_v40  ;;  %v2201_v44 = vpop.f32.mrb[56].mxu1 }
 0x151   :  { %v2161_v43 = vadd.f32 %v2160_v20, %v5608_v63  ;;  %v2162_v45 = vpop.f32.mrb[57].mxu0  ;;  %v2202_v47 = vadd.f32 %v2201_v44, %v5608_v63  ;;  %v2203_v50 = vpop.f32.mrb[57].mxu1 }
 0x152   :  { %v2163_v48 = vadd.f32 %v2162_v45, %v5608_v63  ;;  %v2164_v51 = vpop.f32.mrb[58].mxu0  ;;  %v4604_v52 = vpack.c.bf16 %v2311_v41, %v2310_v42  ;;  %v2204_v46 = vadd.f32 %v2203_v50, %v5608_v63  ;;  %v2205_v54 = vpop.f32.mrb[58].mxu1 }
 0x153   :  { %v2298_v53 = vmax.f32 %v2161_v43, 0.0  ;;  %v2165_v55 = vpop.f32.mrb[59].mxu0  ;;  %v2300_v56 = vmax.f32 %v2202_v47, 0.0  ;;  %v2206_v57 = vpop.f32.mrb[59].mxu1 }
 0x154   :  { %v2299_v34 = vmax.f32 %v2163_v48, 0.0  ;;  %2320 = vst [vmem:[%s5711_s4] sm:$0xff] %v4604_v52  ;;  %v2301_v58 = vmax.f32 %v2204_v46, 0.0 }
 0x155   :  { %v2321_v59 = vmax.f32 %v2298_v53, %v2300_v56 }
 0x156   :  { %v2322_v60 = vmax.f32 %v2299_v34, %v2301_v58 }
 0x158   :  { %v2242_v61 = vpop.f32.mrb[60].mxu0  ;;  %v2283_v0 = vpop.f32.mrb[60].mxu1 }
 0x159   :  { %v2243_v62 = vadd.f32 %v2242_v61, %v5608_v63  ;;  %v2244_v1 = vpop.f32.mrb[61].mxu0  ;;  %v2284_v2 = vadd.f32 %v2283_v0, %v5608_v63  ;;  %v2285_v5 = vpop.f32.mrb[61].mxu1 }
 0x15a   :  { %v2245_v4 = vadd.f32 %v2244_v1, %v5608_v63  ;;  %v2246_v6 = vpop.f32.mrb[62].mxu0  ;;  %v2286_v8 = vadd.f32 %v2285_v5, %v5608_v63  ;;  %v2287_v49 = vpop.f32.mrb[62].mxu1 }
 0x15b   :  { %v2302_v7 = vmax.f32 %v2243_v62, 0.0  ;;  %v2247_v9 = vpop.f32.mrb[63].mxu0  ;;  %v2304_v10 = vmax.f32 %v2284_v2, 0.0  ;;  %v2288_v12 = vpop.f32.mrb[63].mxu1 }
 0x15c   :  { %v2303_v11 = vmax.f32 %v2245_v4, 0.0  ;;  %v2305_v13 = vmax.f32 %v2286_v8, 0.0 }
 0x15d   :  { %v2323_v14 = vmax.f32 %v2302_v7, %v2304_v10 }
 0x15e   :  { %v2324_v16 = vmax.f32 %v2303_v11, %v2305_v13 }
 0x15f   :  { %v2325_v17 = vmax.f32 %v2321_v59, %v2323_v14 }
 0x160   :  { %v2576_v18 = vpop.f32.mrb[64].mxu0  ;;  %v2326_v19 = vmax.f32 %v2322_v60, %v2324_v16  ;;  %v2617_v21 = vpop.f32.mrb[64].mxu1 }
 0x161   :  { %v2578_v22 = vpop.f32.mrb[65].mxu0  ;;  %v2577_v23 = vadd.f32 %v2576_v18, %v5632_v15  ;;  %v2619_v63 = vpop.f32.mrb[65].mxu1  ;;  %v2618_v26 = vadd.f32 %v2617_v21, %v5632_v15 }
 0x162   :  { %v2579_v24 = vadd.f32 %v2578_v22, %v5632_v15  ;;  %v2580_v25 = vpop.f32.mrb[66].mxu0  ;;  %v4605_v28 = vpack.c.bf16 %v2326_v19, %v2325_v17  ;;  %v2620_v27 = vadd.f32 %v2619_v63, %v5632_v15  ;;  %v2621_v29 = vpop.f32.mrb[66].mxu1 }
 0x163   :  { %v2581_v31 = vpop.f32.mrb[67].mxu0  ;;  %v2870_v32 = vmax.f32 %v2577_v23, 0.0  ;;  %v2622_v33 = vpop.f32.mrb[67].mxu1  ;;  %v2872_v36 = vmax.f32 %v2618_v26, 0.0 }
 0x164   :  { %v2871_v30 = vmax.f32 %v2579_v24, 0.0  ;;  %4363 = vst [vmem:[%s5711_s4 + $0x8] sm:$0xff] %v4605_v28  ;;  %v2873_v35 = vmax.f32 %v2620_v27, 0.0 }
 0x165   :  { %v2886_v37 = vmax.f32 %v2870_v32, %v2872_v36  ;;  %v5656_v32 = vpop.permute.xlu1 %2957 }
 0x166   :  { %v2887_v39 = vmax.f32 %v2871_v30, %v2873_v35 }
 0x168   :  { %v2658_v3 = vpop.f32.mrb[68].mxu0  ;;  %v2699_v40 = vpop.f32.mrb[68].mxu1 }
 0x169   :  { %v2659_v38 = vadd.f32 %v2658_v3, %v5632_v15  ;;  %v2660_v42 = vpop.f32.mrb[69].mxu0  ;;  %v2700_v20 = vadd.f32 %v2699_v40, %v5632_v15  ;;  %v2701_v43 = vpop.f32.mrb[69].mxu1 }
 0x16a   :  { %v2661_v41 = vadd.f32 %v2660_v42, %v5632_v15  ;;  %v2662_v44 = vpop.f32.mrb[70].mxu0  ;;  %v2702_v47 = vadd.f32 %v2701_v43, %v5632_v15  ;;  %v2703_v48 = vpop.f32.mrb[70].mxu1 }
 0x16b   :  { %v2874_v45 = vmax.f32 %v2659_v38, 0.0  ;;  %v2663_v50 = vpop.f32.mrb[71].mxu0  ;;  %v2876_v51 = vmax.f32 %v2700_v20, 0.0  ;;  %v2704_v53 = vpop.f32.mrb[71].mxu1 }
 0x16c   :  { %v2875_v52 = vmax.f32 %v2661_v41, 0.0  ;;  %v2877_v46 = vmax.f32 %v2702_v47, 0.0 }
 0x16d   :  { %v2888_v54 = vmax.f32 %v2874_v45, %v2876_v51 }
 0x16e   :  { %v2889_v55 = vmax.f32 %v2875_v52, %v2877_v46 }
 0x16f   :  { %v2890_v56 = vmax.f32 %v2886_v37, %v2888_v54 }
 0x170   :  { %v2740_v34 = vpop.f32.mrb[72].mxu0  ;;  %v2891_v57 = vmax.f32 %v2887_v39, %v2889_v55  ;;  %v2781_v59 = vpop.f32.mrb[72].mxu1 }
 0x171   :  { %v2741_v58 = vadd.f32 %v2740_v34, %v5632_v15  ;;  %v2742_v60 = vpop.f32.mrb[73].mxu0  ;;  %v2782_v61 = vadd.f32 %v2781_v59, %v5632_v15  ;;  %v2783_v0 = vpop.f32.mrb[73].mxu1 }
 0x172   :  { %v2743_v62 = vadd.f32 %v2742_v60, %v5632_v15  ;;  %v2744_v1 = vpop.f32.mrb[74].mxu0  ;;  %v4606_v2 = vpack.c.bf16 %v2891_v57, %v2890_v56  ;;  %v2784_v5 = vadd.f32 %v2783_v0, %v5632_v15  ;;  %v2785_v6 = vpop.f32.mrb[74].mxu1 }
 0x173   :  { %v2878_v4 = vmax.f32 %v2741_v58, 0.0  ;;  %v2745_v7 = vpop.f32.mrb[75].mxu0  ;;  %v2880_v8 = vmax.f32 %v2782_v61, 0.0  ;;  %v2786_v9 = vpop.f32.mrb[75].mxu1 }
 0x174   :  { %v2879_v49 = vmax.f32 %v2743_v62, 0.0  ;;  %4439 = vst [vmem:[%s5711_s4 + $0x10] sm:$0xff] %v4606_v2  ;;  %v2881_v10 = vmax.f32 %v2784_v5, 0.0 }
 0x175   :  { %v2902_v11 = vmax.f32 %v2878_v4, %v2880_v8 }
 0x176   :  { %v2903_v12 = vmax.f32 %v2879_v49, %v2881_v10 }
 0x178   :  { %v2822_v13 = vpop.f32.mrb[76].mxu0  ;;  %v2863_v16 = vpop.f32.mrb[76].mxu1 }
 0x179   :  { %v2823_v14 = vadd.f32 %v2822_v13, %v5632_v15  ;;  %v2824_v17 = vpop.f32.mrb[77].mxu0  ;;  %v2864_v18 = vadd.f32 %v2863_v16, %v5632_v15  ;;  %v2865_v21 = vpop.f32.mrb[77].mxu1 }
 0x17a   :  { %v2825_v19 = vadd.f32 %v2824_v17, %v5632_v15  ;;  %v2826_v22 = vpop.f32.mrb[78].mxu0  ;;  %v2866_v24 = vadd.f32 %v2865_v21, %v5632_v15  ;;  %v2867_v63 = vpop.f32.mrb[78].mxu1 }
 0x17b   :  { %v2882_v23 = vmax.f32 %v2823_v14, 0.0  ;;  %v2827_v25 = vpop.f32.mrb[79].mxu0  ;;  %v2884_v26 = vmax.f32 %v2864_v18, 0.0  ;;  %v2868_v27 = vpop.f32.mrb[79].mxu1 }
 0x17c   :  { %v2883_v28 = vmax.f32 %v2825_v19, 0.0  ;;  %v2885_v29 = vmax.f32 %v2866_v24, 0.0 }
 0x17d   :  { %v2904_v31 = vmax.f32 %v2882_v23, %v2884_v26 }
 0x17e   :  { %v2905_v30 = vmax.f32 %v2883_v28, %v2885_v29 }
 0x17f   :  { %v2906_v33 = vmax.f32 %v2902_v11, %v2904_v31 }
 0x180   :  { %v3157_v36 = vpop.f32.mrb[80].mxu0  ;;  %v2907_v35 = vmax.f32 %v2903_v12, %v2905_v30  ;;  %v3198_v37 = vpop.f32.mrb[80].mxu1 }
 0x181   :  { %v3159_v39 = vpop.f32.mrb[81].mxu0  ;;  %v3158_v3 = vadd.f32 %v3157_v36, %v5656_v32  ;;  %v3200_v15 = vpop.f32.mrb[81].mxu1  ;;  %v3199_v42 = vadd.f32 %v3198_v37, %v5656_v32 }
 0x182   :  { %v3160_v38 = vadd.f32 %v3159_v39, %v5656_v32  ;;  %v3161_v40 = vpop.f32.mrb[82].mxu0  ;;  %v4607_v20 = vpack.c.bf16 %v2907_v35, %v2906_v33  ;;  %v3201_v41 = vadd.f32 %v3200_v15, %v5656_v32  ;;  %v3202_v43 = vpop.f32.mrb[82].mxu1 }
 0x183   :  { %v3162_v44 = vpop.f32.mrb[83].mxu0  ;;  %v3451_v45 = vmax.f32 %v3158_v3, 0.0  ;;  %v3203_v48 = vpop.f32.mrb[83].mxu1  ;;  %v3453_v50 = vmax.f32 %v3199_v42, 0.0 }
 0x184   :  { %v3452_v47 = vmax.f32 %v3160_v38, 0.0  ;;  %4441 = vst [vmem:[%s5711_s4 + $0x18] sm:$0xff] %v4607_v20  ;;  %v3454_v51 = vmax.f32 %v3201_v41, 0.0 }
 0x185   :  { %v3467_v52 = vmax.f32 %v3451_v45, %v3453_v50  ;;  %v5680_v45 = vpop.permute.xlu0 %3538 }
 0x186   :  { %v3468_v53 = vmax.f32 %v3452_v47, %v3454_v51 }
 0x188   :  { %v3239_v46 = vpop.f32.mrb[84].mxu0  ;;  %v3280_v55 = vpop.f32.mrb[84].mxu1 }
 0x189   :  { %v3240_v54 = vadd.f32 %v3239_v46, %v5656_v32  ;;  %v3241_v56 = vpop.f32.mrb[85].mxu0  ;;  %v3281_v34 = vadd.f32 %v3280_v55, %v5656_v32  ;;  %v3282_v58 = vpop.f32.mrb[85].mxu1 }
 0x18a   :  { %v3242_v57 = vadd.f32 %v3241_v56, %v5656_v32  ;;  %v3243_v59 = vpop.f32.mrb[86].mxu0  ;;  %v3283_v61 = vadd.f32 %v3282_v58, %v5656_v32  ;;  %v3284_v62 = vpop.f32.mrb[86].mxu1 }
 0x18b   :  { %v3455_v60 = vmax.f32 %v3240_v54, 0.0  ;;  %v3244_v0 = vpop.f32.mrb[87].mxu0  ;;  %v3457_v1 = vmax.f32 %v3281_v34, 0.0  ;;  %v3285_v4 = vpop.f32.mrb[87].mxu1 }
 0x18c   :  { %v3456_v2 = vmax.f32 %v3242_v57, 0.0  ;;  %v3458_v5 = vmax.f32 %v3283_v61, 0.0 }
 0x18d   :  { %v3469_v6 = vmax.f32 %v3455_v60, %v3457_v1 }
 0x18e   :  { %v3470_v7 = vmax.f32 %v3456_v2, %v3458_v5 }
 0x18f   :  { %v3471_v8 = vmax.f32 %v3467_v52, %v3469_v6 }
 0x190   :  { %v3321_v49 = vpop.f32.mrb[88].mxu0  ;;  %v3472_v9 = vmax.f32 %v3468_v53, %v3470_v7  ;;  %v3362_v11 = vpop.f32.mrb[88].mxu1 }
 0x191   :  { %v3322_v10 = vadd.f32 %v3321_v49, %v5656_v32  ;;  %v3323_v12 = vpop.f32.mrb[89].mxu0  ;;  %v3363_v13 = vadd.f32 %v3362_v11, %v5656_v32  ;;  %v3364_v16 = vpop.f32.mrb[89].mxu1 }
 0x192   :  { %v3324_v14 = vadd.f32 %v3323_v12, %v5656_v32  ;;  %v3325_v17 = vpop.f32.mrb[90].mxu0  ;;  %v4608_v18 = vpack.c.bf16 %v3472_v9, %v3471_v8  ;;  %v3365_v21 = vadd.f32 %v3364_v16, %v5656_v32  ;;  %v3366_v22 = vpop.f32.mrb[90].mxu1 }
 0x193   :  { %v3459_v19 = vmax.f32 %v3322_v10, 0.0  ;;  %v3326_v23 = vpop.f32.mrb[91].mxu0  ;;  %v3461_v24 = vmax.f32 %v3363_v13, 0.0  ;;  %v3367_v25 = vpop.f32.mrb[91].mxu1 }
 0x194   :  { %v3460_v63 = vmax.f32 %v3324_v14, 0.0  ;;  %4517 = vst [vmem:[%s5711_s4 + $0x20] sm:$0xff] %v4608_v18  ;;  %v3462_v26 = vmax.f32 %v3365_v21, 0.0 }
 0x195   :  { %v3483_v28 = vmax.f32 %v3459_v19, %v3461_v24 }
 0x196   :  { %v3484_v27 = vmax.f32 %v3460_v63, %v3462_v26 }
 0x198   :  { %v3403_v29 = vpop.f32.mrb[92].mxu0  ;;  %v3444_v30 = vpop.f32.mrb[92].mxu1 }
 0x199   :  { %v3404_v31 = vadd.f32 %v3403_v29, %v5656_v32  ;;  %v3405_v33 = vpop.f32.mrb[93].mxu0  ;;  %v3445_v36 = vadd.f32 %v3444_v30, %v5656_v32  ;;  %v3446_v37 = vpop.f32.mrb[93].mxu1 }
 0x19a   :  { %v3406_v35 = vadd.f32 %v3405_v33, %v5656_v32  ;;  %v3407_v39 = vpop.f32.mrb[94].mxu0  ;;  %v3447_v38 = vadd.f32 %v3446_v37, %v5656_v32  ;;  %v3448_v15 = vpop.f32.mrb[94].mxu1 }
 0x19b   :  { %v3463_v3 = vmax.f32 %v3404_v31, 0.0  ;;  %v3408_v40 = vpop.f32.mrb[95].mxu0  ;;  %v3465_v42 = vmax.f32 %v3445_v36, 0.0  ;;  %v3449_v41 = vpop.f32.mrb[95].mxu1 }
 0x19c   :  { %v3464_v20 = vmax.f32 %v3406_v35, 0.0  ;;  %v3466_v43 = vmax.f32 %v3447_v38, 0.0 }
 0x19d   :  { %v3485_v44 = vmax.f32 %v3463_v3, %v3465_v42 }
 0x19e   :  { %v3486_v47 = vmax.f32 %v3464_v20, %v3466_v43 }
 0x19f   :  { %v3487_v48 = vmax.f32 %v3483_v28, %v3485_v44 }
 0x1a0   :  { %v3738_v50 = vpop.f32.mrb[96].mxu0  ;;  %v3488_v51 = vmax.f32 %v3484_v27, %v3486_v47  ;;  %v3779_v52 = vpop.f32.mrb[96].mxu1 }
 0x1a1   :  { %v3740_v53 = vpop.f32.mrb[97].mxu0  ;;  %v3739_v46 = vadd.f32 %v3738_v50, %v5680_v45  ;;  %v3781_v32 = vpop.f32.mrb[97].mxu1  ;;  %v3780_v56 = vadd.f32 %v3779_v52, %v5680_v45 }
 0x1a2   :  { %v3741_v54 = vadd.f32 %v3740_v53, %v5680_v45  ;;  %v3742_v55 = vpop.f32.mrb[98].mxu0  ;;  %v4609_v34 = vpack.c.bf16 %v3488_v51, %v3487_v48  ;;  %v3782_v57 = vadd.f32 %v3781_v32, %v5680_v45  ;;  %v3783_v58 = vpop.f32.mrb[98].mxu1 }
 0x1a3   :  { %v3743_v59 = vpop.f32.mrb[99].mxu0  ;;  %v4032_v60 = vmax.f32 %v3739_v46, 0.0  ;;  %v3784_v62 = vpop.f32.mrb[99].mxu1  ;;  %v4034_v0 = vmax.f32 %v3780_v56, 0.0 }
 0x1a4   :  { %v4033_v61 = vmax.f32 %v3741_v54, 0.0  ;;  %4519 = vst [vmem:[%s5711_s4 + $0x28] sm:$0xff] %v4609_v34  ;;  %v4035_v1 = vmax.f32 %v3782_v57, 0.0 }
 0x1a5   :  { %v4048_v2 = vmax.f32 %v4032_v60, %v4034_v0 }
 0x1a6   :  { %v4049_v4 = vmax.f32 %v4033_v61, %v4035_v1 }
 0x1a8   :  { %v3820_v5 = vpop.f32.mrb[100].mxu0  ;;  %v3861_v7 = vpop.f32.mrb[100].mxu1 }
 0x1a9   :  { %v3821_v6 = vadd.f32 %v3820_v5, %v5680_v45  ;;  %v3822_v8 = vpop.f32.mrb[101].mxu0  ;;  %v3862_v49 = vadd.f32 %v3861_v7, %v5680_v45  ;;  %v3863_v10 = vpop.f32.mrb[101].mxu1 }
 0x1aa   :  { %v3823_v9 = vadd.f32 %v3822_v8, %v5680_v45  ;;  %v3824_v11 = vpop.f32.mrb[102].mxu0  ;;  %v3864_v13 = vadd.f32 %v3863_v10, %v5680_v45  ;;  %v3865_v14 = vpop.f32.mrb[102].mxu1 }
 0x1ab   :  { %v4036_v12 = vmax.f32 %v3821_v6, 0.0  ;;  %v3825_v16 = vpop.f32.mrb[103].mxu0  ;;  %v4038_v17 = vmax.f32 %v3862_v49, 0.0  ;;  %v3866_v19 = vpop.f32.mrb[103].mxu1 }
 0x1ac   :  { %v4037_v18 = vmax.f32 %v3823_v9, 0.0  ;;  %v4039_v21 = vmax.f32 %v3864_v13, 0.0 }
 0x1ad   :  { %v4050_v22 = vmax.f32 %v4036_v12, %v4038_v17 }
 0x1ae   :  { %v4051_v23 = vmax.f32 %v4037_v18, %v4039_v21 }
 0x1af   :  { %v4052_v24 = vmax.f32 %v4048_v2, %v4050_v22 }
 0x1b0   :  { %v3902_v63 = vpop.f32.mrb[104].mxu0  ;;  %v4053_v25 = vmax.f32 %v4049_v4, %v4051_v23  ;;  %v3943_v28 = vpop.f32.mrb[104].mxu1 }
 0x1b1   :  { %v3903_v26 = vadd.f32 %v3902_v63, %v5680_v45  ;;  %v3904_v27 = vpop.f32.mrb[105].mxu0  ;;  %v3944_v29 = vadd.f32 %v3943_v28, %v5680_v45  ;;  %v3945_v30 = vpop.f32.mrb[105].mxu1 }
 0x1b2   :  { %v3905_v31 = vadd.f32 %v3904_v27, %v5680_v45  ;;  %v3906_v33 = vpop.f32.mrb[106].mxu0  ;;  %v4610_v36 = vpack.c.bf16 %v4053_v25, %v4052_v24  ;;  %v3946_v37 = vadd.f32 %v3945_v30, %v5680_v45  ;;  %v3947_v39 = vpop.f32.mrb[106].mxu1 }
 0x1b3   :  { %v4040_v35 = vmax.f32 %v3903_v26, 0.0  ;;  %v3907_v3 = vpop.f32.mrb[107].mxu0  ;;  %v4042_v38 = vmax.f32 %v3944_v29, 0.0  ;;  %v3948_v40 = vpop.f32.mrb[107].mxu1 }
 0x1b4   :  { %v4041_v15 = vmax.f32 %v3905_v31, 0.0  ;;  %4595 = vst [vmem:[%s5711_s4 + $0x30] sm:$0xff] %v4610_v36  ;;  %v4043_v42 = vmax.f32 %v3946_v37, 0.0 }
 0x1b5   :  { %v4064_v20 = vmax.f32 %v4040_v35, %v4042_v38 }
 0x1b6   :  { %v4065_v41 = vmax.f32 %v4041_v15, %v4043_v42 }
 0x1b8   :  { %v3984_v43 = vpop.f32.mrb[108].mxu0  ;;  %v4025_v47 = vpop.f32.mrb[108].mxu1 }
 0x1b9   :  { %v3985_v44 = vadd.f32 %v3984_v43, %v5680_v45  ;;  %v3986_v48 = vpop.f32.mrb[109].mxu0  ;;  %v4026_v50 = vadd.f32 %v4025_v47, %v5680_v45  ;;  %v4027_v52 = vpop.f32.mrb[109].mxu1 }
 0x1ba   :  { %v3987_v51 = vadd.f32 %v3986_v48, %v5680_v45  ;;  %v3988_v53 = vpop.f32.mrb[110].mxu0  ;;  %v4028_v54 = vadd.f32 %v4027_v52, %v5680_v45  ;;  %v4029_v32 = vpop.f32.mrb[110].mxu1 }
 0x1bb   :  { %v4044_v46 = vmax.f32 %v3985_v44, 0.0  ;;  %v3989_v55 = vpop.f32.mrb[111].mxu0  ;;  %v4046_v56 = vmax.f32 %v4026_v50, 0.0  ;;  %v4030_v57 = vpop.f32.mrb[111].mxu1 }
 0x1bc   :  { %v4045_v34 = vmax.f32 %v3987_v51, 0.0  ;;  %v4047_v58 = vmax.f32 %v4028_v54, 0.0 }
 0x1bd   :  { %v4066_v59 = vmax.f32 %v4044_v46, %v4046_v56 }
 0x1be   :  { %v4067_v60 = vmax.f32 %v4045_v34, %v4047_v58 }
 0x1bf   :  { %v4068_v61 = vmax.f32 %v4064_v20, %v4066_v59 }
 0x1c0   :  { %v4069_v62 = vmax.f32 %v4065_v41, %v4067_v60 }
 0x1c2   :  { %v4611_v0 = vpack.c.bf16 %v4069_v62, %v4068_v61 }
 0x1c4   :  { %4597 = vst [vmem:[%s5711_s4 + $0x38] sm:$0xff] %v4611_v0 }

// kernel: three2i_forward.5
= control target key start
LH: loop header
LB: loop body
LE: loop exit
PB: predicated region body
PF: predicated region fallthrough
CT: control target
= control target key end

     0   :  { %s1596_s29 = smov 0   ;;  %s1754_s0 = inlined_call_operand.vmem [shape: bf16[8,2048], index: 0, kind: input, shape index: {}]   ;;  %s1755_s1 = inlined_call_operand.vmem [shape: bf16[2048,128], index: 1, kind: input, shape index: {}]   ;;  %s1756_s2 = inlined_call_operand.vmem [shape: f32[8,128], index: 2, kind: input, shape index: {}]   ;;  %s1757_s3 = inlined_call_operand.vmem [shape: f32[1,128], index: 3, kind: input, shape index: {}]   ;;  %s1758_s4 = inlined_call_operand.vmem [shape: f32[128,128], index: 4, kind: input, shape index: {}]   ;;  %s1759_s5 = inlined_call_operand.vmem [shape: f32[1,128], index: 5, kind: input, shape index: {}]   ;;  %s1760_s6 = inlined_call_operand.vmem [shape: f32[1,128], index: 6, kind: input, shape index: {}]   ;;  %s1761_s7 = inlined_call_operand.<no memory space> [shape: f32[1,1], index: 7, kind: input, shape index: {}]   ;;  %s1762_s8 = inlined_call_operand.vmem [shape: f32[8,1], index: 8, kind: output, shape index: {}]  }
   0x1   :  { %v13_v0 = vstv %s1761_s7 }
   0x2   :  { %14 = vst [vmem:[#allocation3] sm:$0x1] %v13_v0 }
   0x3 LB: > { %s1602_s30 = sadd.s32 4294967295, %s1542_s29   ;;  %p1203_p0 = scmp.ge.s32.totalorder %s1542_s29, 1  ;;  %s1542_s29 = sphi %s1596_s29, %s20_s29  }
   0x4   : > { %p271_p1 = scmp.lt.s32.totalorder %s1542_s29, 3 }
   0x6   : > { %p272_p2 = pnand %p1203_p0, %p271_p1 }
   0x7   : > { %s1204_s7 = sshll.u32 (!%p272_p2), %s1602_s30, 3  ;;  %s1206_s9 = sshll.u32 (!%p272_p2), %s1602_s30, 7 }
   0x8   : > { %275 = sbr.rel (%p272_p2) target bundleno = 689 (0x2b1), region = 52  ;;  %p306_p3 = scmp.lt.s32.totalorder (!%p272_p2), %s1204_s7, 15 }
   0x9   : > { %p312_p4 = scmp.lt.s32.totalorder (!%p272_p2), %s1206_s9, 255  ;;  %p1208_p5 = scmp.ne.s32.totalorder (!%p272_p2), %s1602_s30, 0 }
   0xf   : > { %s1764_s7 = smov (!%p306_p3, %s1204_s7), 15  ;;  %s1766_s9 = smov (!%p312_p4, %s1206_s9), 255 }
  0x10   : > { %s1205_s10 = sshll.u32 %s1764_s7, 2  ;;  %s1207_s14 = sshll.u32 %s1766_s9, 2  ;;  %v1544_v1 = vmov (!%p1208_p5), 0.0  }
  0x11   : > { %s1611_s13 = scalar_lea.vmem %s1754_s0, %s1205_s10  ;;  %s1616_s17 = scalar_lea.vmem %s1755_s1, %s1207_s14  ;;  %322 = vst [vmem:[#allocation2] sm:$0xff] (!%p1208_p5), %v1544_v1 }
  0x12   : > { %321 = sbr.rel (%p1208_p5) target bundleno = 25 (0x19), region = 56 }
  0x19 PF: > { %v1464_v2 = vld [vmem:[%s1616_s17 + $0x40] sm:$0xff]   ;;  %v1468_v6 = vld [vmem:[%s1616_s17 + $0x48] sm:$0xff]   ;;  %v1472_v10 = vld [vmem:[%s1616_s17 + $0x50] sm:$0xff]   ;;  %p1281_p6 = scmp.ne.s32.totalorder %s1602_s30, 1 }
  0x1a   : > { %v1465_v3 = vld [vmem:[%s1616_s17 + $0xc0] sm:$0xff]   ;;  %1288 = vmatprep.subr.bf16.mxu0 %v1464_v2  ;;  %v1469_v7 = vld [vmem:[%s1616_s17 + $0xc8] sm:$0xff]   ;;  %v1473_v11 = vld [vmem:[%s1616_s17 + $0xd0] sm:$0xff]   ;;  %vm1546_vm0 = vmmov (!%p1281_p6), 0   ;;  %vm1158_vm1 = vcmask (!%p1281_p6), 7168  }
  0x1b   : > { %v1466_v4 = vld [vmem:[%s1616_s17] sm:$0xff]   ;;  %1310 = vmatprep.subr.bf16.mxu1 %v1465_v3  ;;  %v1470_v8 = vld [vmem:[%s1616_s17 + $0x8] sm:$0xff]   ;;  %v1474_v12 = vld [vmem:[%s1616_s17 + $0x10] sm:$0xff]  }
  0x1c   : > { %v1467_v5 = vld [vmem:[%s1616_s17 + $0x80] sm:$0xff]   ;;  %1289 = vmatpush3.bf16.msra.mxu0 %v1466_v4  ;;  %v1471_v9 = vld [vmem:[%s1616_s17 + $0x88] sm:$0xff]   ;;  %v1475_v13 = vld [vmem:[%s1616_s17 + $0x90] sm:$0xff]  }
  0x1d   : > { %1311 = vmatpush3.bf16.msra.mxu1 %v1467_v5  ;;  %1290 = vmatprep.subr.bf16.mxu0 %v1468_v6  ;;  %v1476_v14 = vld [vmem:[%s1616_s17 + $0x58] sm:$0xff]   ;;  %v1480_v18 = vld [vmem:[%s1616_s17 + $0x60] sm:$0xff]   ;;  %v1484_v22 = vld [vmem:[%s1616_s17 + $0x68] sm:$0xff]  }
  0x1e   : > { %1312 = vmatprep.subr.bf16.mxu1 %v1469_v7  ;;  %v1477_v15 = vld [vmem:[%s1616_s17 + $0xd8] sm:$0xff]   ;;  %v1481_v19 = vld [vmem:[%s1616_s17 + $0xe0] sm:$0xff]   ;;  %v1485_v23 = vld [vmem:[%s1616_s17 + $0xe8] sm:$0xff]  }
  0x1f   : > { %v1478_v16 = vld [vmem:[%s1616_s17 + $0x18] sm:$0xff]   ;;  %v1482_v20 = vld [vmem:[%s1616_s17 + $0x20] sm:$0xff]   ;;  %v1486_v24 = vld [vmem:[%s1616_s17 + $0x28] sm:$0xff]  }
  0x20   : > { %1291 = vmatpush3.bf16.msra.mxu0 %v1470_v8  ;;  %v1479_v17 = vld [vmem:[%s1616_s17 + $0x98] sm:$0xff]   ;;  %v1483_v21 = vld [vmem:[%s1616_s17 + $0xa0] sm:$0xff]   ;;  %v1487_v25 = vld [vmem:[%s1616_s17 + $0xa8] sm:$0xff]  }
  0x21   : > { %1313 = vmatpush3.bf16.msra.mxu1 %v1471_v9  ;;  %1292 = vmatprep.subr.bf16.mxu0 %v1472_v10  ;;  %v1488_v26 = vld [vmem:[%s1616_s17 + $0x70] sm:$0xff]   ;;  %v1492_v30 = vld [vmem:[%s1616_s17 + $0x78] sm:$0xff]   ;;  %v324_v34 = vld [vmem:[%s1611_s13] sm:$0xff] }
  0x22   : > { %1314 = vmatprep.subr.bf16.mxu1 %v1473_v11  ;;  %v1489_v27 = vld [vmem:[%s1616_s17 + $0xf0] sm:$0xff]   ;;  %v1493_v31 = vld [vmem:[%s1616_s17 + $0xf8] sm:$0xff]   ;;  %v325_v35 = vld [vmem:[%s1611_s13 + $0x8] sm:$0xff]  ;;  %v1209_v36 = vcombine.low %v324_v34, %v324_v34  ;;  %v1210_v37 = vcombine.high %v324_v34, %v324_v34 }
  0x23   : > { %v1490_v28 = vld [vmem:[%s1616_s17 + $0x30] sm:$0xff]   ;;  %v1494_v32 = vld [vmem:[%s1616_s17 + $0x38] sm:$0xff]   ;;  %v1211_v38 = vcombine.low %v325_v35, %v325_v35  ;;  %v1212_v39 = vcombine.high %v325_v35, %v325_v35  ;;  %v1500_v40 = vld [vmem:[%s1616_s17 + $0x140] sm:$0xff]  }
  0x24   : > { %1293 = vmatpush3.bf16.msra.mxu0 %v1474_v12  ;;  %v1491_v29 = vld [vmem:[%s1616_s17 + $0xb0] sm:$0xff]   ;;  %v1495_v33 = vld [vmem:[%s1616_s17 + $0xb8] sm:$0xff]   ;;  %v1501_v41 = vld [vmem:[%s1616_s17 + $0x1c0] sm:$0xff]   ;;  %900 = vmatprep.mubr.bf16.mxu0 %v1210_v37 }
  0x25   : > { %1315 = vmatpush3.bf16.msra.mxu1 %v1475_v13  ;;  %1294 = vmatprep.subr.bf16.mxu0 %v1476_v14  ;;  %v1502_v42 = vld [vmem:[%s1616_s17 + $0x100] sm:$0xff]   ;;  %v1504_v44 = vld [vmem:[%s1616_s17 + $0x148] sm:$0xff]   ;;  %v1508_v48 = vld [vmem:[%s1616_s17 + $0x150] sm:$0xff]  }
  0x26   : > { %1316 = vmatprep.subr.bf16.mxu1 %v1477_v15  ;;  %940 = vmatprep.mubr.bf16.mxu1 %v1212_v39  ;;  %v1503_v43 = vld [vmem:[%s1616_s17 + $0x180] sm:$0xff]   ;;  %v1505_v45 = vld [vmem:[%s1616_s17 + $0x1c8] sm:$0xff]   ;;  %v1509_v49 = vld [vmem:[%s1616_s17 + $0x1d0] sm:$0xff]  }
  0x27   : > { %v1506_v46 = vld [vmem:[%s1616_s17 + $0x108] sm:$0xff]   ;;  %v1510_v50 = vld [vmem:[%s1616_s17 + $0x110] sm:$0xff]   ;;  %v1512_v52 = vld [vmem:[%s1616_s17 + $0x158] sm:$0xff]  }
  0x28   : > { %1295 = vmatpush3.bf16.msra.mxu0 %v1478_v16  ;;  %v1507_v47 = vld [vmem:[%s1616_s17 + $0x188] sm:$0xff]   ;;  %v1511_v51 = vld [vmem:[%s1616_s17 + $0x190] sm:$0xff]   ;;  %v1513_v53 = vld [vmem:[%s1616_s17 + $0x1d8] sm:$0xff]  }
  0x29   : > { %1317 = vmatpush3.bf16.msra.mxu1 %v1479_v17  ;;  %1296 = vmatprep.subr.bf16.mxu0 %v1480_v18  ;;  %v1514_v54 = vld [vmem:[%s1616_s17 + $0x118] sm:$0xff]   ;;  %v1516_v56 = vld [vmem:[%s1616_s17 + $0x160] sm:$0xff]   ;;  %v1520_v60 = vld [vmem:[%s1616_s17 + $0x168] sm:$0xff]  }
  0x2a   : > { %1318 = vmatprep.subr.bf16.mxu1 %v1481_v19  ;;  %v1515_v55 = vld [vmem:[%s1616_s17 + $0x198] sm:$0xff]   ;;  %v1517_v57 = vld [vmem:[%s1616_s17 + $0x1e0] sm:$0xff]   ;;  %v1521_v61 = vld [vmem:[%s1616_s17 + $0x1e8] sm:$0xff]  }
  0x2b   : > { %v1518_v58 = vld [vmem:[%s1616_s17 + $0x120] sm:$0xff]   ;;  %v1522_v62 = vld [vmem:[%s1616_s17 + $0x128] sm:$0xff]   ;;  %v1524_v0 = vld [vmem:[%s1616_s17 + $0x170] sm:$0xff]  }
  0x2c   : > { %1297 = vmatpush3.bf16.msra.mxu0 %v1482_v20  ;;  %v1519_v59 = vld [vmem:[%s1616_s17 + $0x1a0] sm:$0xff]   ;;  %v1523_v63 = vld [vmem:[%s1616_s17 + $0x1a8] sm:$0xff]   ;;  %v1525_v1 = vld [vmem:[%s1616_s17 + $0x1f0] sm:$0xff]  }
  0x2d   : > { %1319 = vmatpush3.bf16.msra.mxu1 %v1483_v21  ;;  %1298 = vmatprep.subr.bf16.mxu0 %v1484_v22  ;;  %v1526_v2 = vld [vmem:[%s1616_s17 + $0x130] sm:$0xff]   ;;  %v1528_v4 = vld [vmem:[%s1616_s17 + $0x178] sm:$0xff]   ;;  %v1044_v39 = vld [vmem:[%s1758_s4] sm:$0xff] (!%p1281_p6) }
  0x2e   : > { %1320 = vmatprep.subr.bf16.mxu1 %v1485_v23  ;;  %v1527_v3 = vld [vmem:[%s1616_s17 + $0x1b0] sm:$0xff]   ;;  %v1529_v5 = vld [vmem:[%s1616_s17 + $0x1f8] sm:$0xff]  }
  0x2f   : > { %v1530_v6 = vld [vmem:[%s1616_s17 + $0x138] sm:$0xff]   ;;  %v326_v8 = vld [vmem:[%s1611_s13 + $0x10] sm:$0xff] }
  0x30   : > { %1299 = vmatpush3.bf16.msra.mxu0 %v1486_v24  ;;  %v1531_v7 = vld [vmem:[%s1616_s17 + $0x1b8] sm:$0xff]   ;;  %v1213_v9 = vcombine.low %v326_v8, %v326_v8  ;;  %v1214_v10 = vcombine.high %v326_v8, %v326_v8 }
  0x31   : > { %1321 = vmatpush3.bf16.msra.mxu1 %v1487_v25  ;;  %1300 = vmatprep.subr.bf16.mxu0 %v1488_v26  ;;  %v327_v11 = vld [vmem:[%s1611_s13 + $0x18] sm:$0xff] }
  0x32   : > { %1322 = vmatprep.subr.bf16.mxu1 %v1489_v27  ;;  %v1215_v12 = vcombine.low %v327_v11, %v327_v11  ;;  %v1216_v13 = vcombine.high %v327_v11, %v327_v11  ;;  %v1284_v11 = vld [vmem:[%s1760_s6] ss:$0 sm:$0xff] (!%p1281_p6) }
  0x34   : > { %1301 = vmatpush3.bf16.msra.mxu0 %v1490_v28 }
  0x35   : > { %1323 = vmatpush3.bf16.msra.mxu1 %v1491_v29  ;;  %1302 = vmatprep.subr.bf16.mxu0 %v1492_v30 }
  0x36   : > { %1324 = vmatprep.subr.bf16.mxu1 %v1493_v31 }
  0x38   : > { %1303 = vmatpush3.bf16.msra.mxu0 %v1494_v32 }
  0x39   : > { %1325 = vmatpush3.bf16.msra.mxu1 %v1495_v33  ;;  %1332 = vmatprep.subr.bf16.mxu0 %v1500_v40  ;;  %v1045_v40 = vld [vmem:[%s1758_s4 + $0x8] sm:$0xff] (!%p1281_p6) }
  0x3a   : > { %1354 = vmatprep.subr.bf16.mxu1 %v1501_v41  ;;  %v1046_v41 = vld [vmem:[%s1758_s4 + $0x10] sm:$0xff] (!%p1281_p6) }
  0x3b   : > { %901 = vmatmul.mubr.bf16.vlgmr.msra.gmra.mrb[0].mxu0 %v1209_v36  ;;  %v323_v36 = vld [vmem:[#allocation2] sm:$0xff] }
  0x3c   : > { %941 = vmatmul.mubr.bf16.vlgmr.msra.gmra.mrb[0].mxu1 %v1211_v38  ;;  %1333 = vmatpush3.bf16.msra.mxu0 %v1502_v42  ;;  %v1545_v42 = vmov (!%p1281_p6), 0.0|0.0  }
  0x3d   : > { %1355 = vmatpush3.bf16.msra.mxu1 %v1503_v43  ;;  %1334 = vmatprep.subr.bf16.mxu0 %v1504_v44  ;;  %v1429_v43 = vpack.c.bf16 (!%p1281_p6), %v1045_v40, %v1044_v39  ;;  %v1047_v44 = vld [vmem:[%s1758_s4 + $0x18] sm:$0xff] (!%p1281_p6) }
  0x3e   : > { %1356 = vmatprep.subr.bf16.mxu1 %v1505_v45  ;;  %980 = vmatprep.mubr.bf16.mxu0 %v1214_v10  ;;  %v1547_v45 = vmov (!%p1281_p6), 0.0  }
  0x3f   : > { %1020 = vmatprep.mubr.bf16.mxu1 %v1216_v13 }
  0x40   : > { %1335 = vmatpush3.bf16.msra.mxu0 %v1506_v46  ;;  %v1432_v46 = vpack.c.bf16 (!%p1281_p6), %v1047_v44, %v1046_v41 }
  0x41   : > { %1357 = vmatpush3.bf16.msra.mxu1 %v1507_v47  ;;  %1336 = vmatprep.subr.bf16.mxu0 %v1508_v48  ;;  %v1048_v47 = vld [vmem:[%s1758_s4 + $0x20] sm:$0xff] (!%p1281_p6)  ;;  %v1049_v48 = vld [vmem:[%s1758_s4 + $0x28] sm:$0xff] (!%p1281_p6) }
  0x42   : > { %1358 = vmatprep.subr.bf16.mxu1 %v1509_v49  ;;  %v1435_v49 = vpack.c.bf16 (!%p1281_p6), %v1049_v48, %v1048_v47 }
  0x44   : > { %1337 = vmatpush3.bf16.msra.mxu0 %v1510_v50  ;;  %v1050_v50 = vld [vmem:[%s1758_s4 + $0x30] sm:$0xff] (!%p1281_p6) }
  0x45   : > { %1359 = vmatpush3.bf16.msra.mxu1 %v1511_v51  ;;  %1338 = vmatprep.subr.bf16.mxu0 %v1512_v52  ;;  %v1051_v51 = vld [vmem:[%s1758_s4 + $0x38] sm:$0xff] (!%p1281_p6) }
  0x46   : > { %1360 = vmatprep.subr.bf16.mxu1 %v1513_v53  ;;  %v1438_v52 = vpack.c.bf16 (!%p1281_p6), %v1051_v51, %v1050_v50  ;;  %v1052_v53 = vld [vmem:[%s1758_s4 + $0x40] sm:$0xff] (!%p1281_p6) }
  0x48   : > { %1339 = vmatpush3.bf16.msra.mxu0 %v1514_v54  ;;  %v1053_v54 = vld [vmem:[%s1758_s4 + $0x48] sm:$0xff] (!%p1281_p6) }
  0x49   : > { %1361 = vmatpush3.bf16.msra.mxu1 %v1515_v55  ;;  %1340 = vmatprep.subr.bf16.mxu0 %v1516_v56  ;;  %v1441_v55 = vpack.c.bf16 (!%p1281_p6), %v1053_v54, %v1052_v53  ;;  %v1054_v56 = vld [vmem:[%s1758_s4 + $0x50] sm:$0xff] (!%p1281_p6) }
  0x4a   : > { %1362 = vmatprep.subr.bf16.mxu1 %v1517_v57  ;;  %v1055_v57 = vld [vmem:[%s1758_s4 + $0x58] sm:$0xff] (!%p1281_p6) }
  0x4c   : > { %1341 = vmatpush3.bf16.msra.mxu0 %v1518_v58  ;;  %v1444_v58 = vpack.c.bf16 (!%p1281_p6), %v1055_v57, %v1054_v56 }
  0x4d   : > { %1363 = vmatpush3.bf16.msra.mxu1 %v1519_v59  ;;  %1342 = vmatprep.subr.bf16.mxu0 %v1520_v60  ;;  %v1056_v59 = vld [vmem:[%s1758_s4 + $0x60] sm:$0xff] (!%p1281_p6)  ;;  %v1057_v60 = vld [vmem:[%s1758_s4 + $0x68] sm:$0xff] (!%p1281_p6) }
  0x4e   : > { %1364 = vmatprep.subr.bf16.mxu1 %v1521_v61  ;;  %v1447_v61 = vpack.c.bf16 (!%p1281_p6), %v1057_v60, %v1056_v59 }
  0x50   : > { %1343 = vmatpush3.bf16.msra.mxu0 %v1522_v62 }
  0x51   : > { %1365 = vmatpush3.bf16.msra.mxu1 %v1523_v63  ;;  %1344 = vmatprep.subr.bf16.mxu0 %v1524_v0  ;;  %v1282_v63 = vld [vmem:[%s1757_s3] ss:$0 sm:$0xff] (!%p1281_p6)  ;;  %v1058_v0 = vld [vmem:[%s1758_s4 + $0x70] sm:$0xff] (!%p1281_p6) }
  0x52   : > { %1366 = vmatprep.subr.bf16.mxu1 %v1525_v1  ;;  %v1059_v1 = vld [vmem:[%s1758_s4 + $0x78] sm:$0xff] (!%p1281_p6) }
  0x54   : > { %1345 = vmatpush3.bf16.msra.mxu0 %v1526_v2 }
  0x55   : > { %1367 = vmatpush3.bf16.msra.mxu1 %v1527_v3  ;;  %1346 = vmatprep.subr.bf16.mxu0 %v1528_v4  ;;  %v1450_v3 = vpack.c.bf16 (!%p1281_p6), %v1059_v1, %v1058_v0 }
  0x56   : > { %1368 = vmatprep.subr.bf16.mxu1 %v1529_v5  ;;  %v1060_v5 = vld [vmem:[%s1756_s2] sm:$0xff] (!%p1281_p6) }
  0x58   : > { %1347 = vmatpush3.bf16.msra.mxu0 %v1530_v6 }
  0x59   : > { %1369 = vmatpush3.bf16.msra.mxu1 %v1531_v7  ;;  %1428 = vmatprep.subr.bf16.mxu0 (!%p1281_p6), %v1545_v42  ;;  %v1283_v7 = vld [vmem:[%s1759_s5] ss:$0 sm:$0xff] (!%p1281_p6) }
  0x5b   : > { %981 = vmatmul.mubr.bf16.vlgmr.msra.gmra.mrb[4].mxu0 %v1213_v9 }
  0x5c   : > { %1021 = vmatmul.mubr.bf16.vlgmr.msra.gmra.mrb[4].mxu1 %v1215_v12  ;;  %1425 = vmatprep.mubr.msk.f32.mxu0 (!%p1281_p6), %vm1546_vm0, %v1547_v45 }
  0x5d   : > { %1430 = vmatpush3.bf16.msra.mxu0 (!%p1281_p6), %v1429_v43 }
  0x5e   : > { %1431 = vmatprep.subr.bf16.mxu0 (!%p1281_p6), %v1545_v42 }
  0x61   : > { %1433 = vmatpush3.bf16.msra.mxu0 (!%p1281_p6), %v1432_v46 }
  0x62   : > { %1434 = vmatprep.subr.bf16.mxu0 (!%p1281_p6), %v1545_v42 }
  0x65   : > { %1436 = vmatpush3.bf16.msra.mxu0 (!%p1281_p6), %v1435_v49 }
  0x66   : > { %1437 = vmatprep.subr.bf16.mxu0 (!%p1281_p6), %v1545_v42 }
  0x69   : > { %1439 = vmatpush3.bf16.msra.mxu0 (!%p1281_p6), %v1438_v52 }
  0x6a   : > { %1440 = vmatprep.subr.bf16.mxu0 (!%p1281_p6), %v1545_v42 }
  0x6d   : > { %1442 = vmatpush3.bf16.msra.mxu0 (!%p1281_p6), %v1441_v55 }
  0x6e   : > { %1443 = vmatprep.subr.bf16.mxu0 (!%p1281_p6), %v1545_v42 }
  0x71   : > { %1445 = vmatpush3.bf16.msra.mxu0 (!%p1281_p6), %v1444_v58 }
  0x72   : > { %1446 = vmatprep.subr.bf16.mxu0 (!%p1281_p6), %v1545_v42 }
  0x75   : > { %1448 = vmatpush3.bf16.msra.mxu0 (!%p1281_p6), %v1447_v61 }
  0x76   : > { %1449 = vmatprep.subr.bf16.mxu0 (!%p1281_p6), %v1545_v42 }
  0x79   : > { %1451 = vmatpush3.bf16.msra.mxu0 (!%p1281_p6), %v1450_v3 }
 0x10e   : > { %v1304_v14 = vpop.f32.mrb[0].mxu0 }
 0x10f   : > { %v1326_v15 = vpop.f32.mrb[0].mxu1  ;;  %v1305_v16 = vpop.f32.mrb[1].mxu0 }
 0x110   : > { %v1327_v17 = vpop.f32.mrb[1].mxu1  ;;  %v1306_v18 = vadd.f32 %v1305_v16, %v1304_v14  ;;  %v1307_v20 = vpop.f32.mrb[2].mxu0  ;;  %v1285_v14 = vld [vmem:[#allocation3] ss:$0 sm:$0xff] (!%p1281_p6) }
 0x111   : > { %v1328_v19 = vadd.f32 %v1327_v17, %v1326_v15  ;;  %v1329_v21 = vpop.f32.mrb[2].mxu1  ;;  %v1308_v22 = vpop.f32.mrb[3].mxu0 }
 0x112   : > { %v1330_v23 = vpop.f32.mrb[3].mxu1 }
 0x113   : > { %v943_v24 = vadd.f32 %v1328_v19, %v1306_v18 }
 0x12e   : > { %v1348_v25 = vpop.f32.mrb[4].mxu0 }
 0x12f   : > { %v1370_v26 = vpop.f32.mrb[4].mxu1  ;;  %v1349_v27 = vpop.f32.mrb[5].mxu0 }
 0x130   : > { %v1371_v28 = vpop.f32.mrb[5].mxu1  ;;  %v1350_v29 = vadd.f32 %v1349_v27, %v1348_v25  ;;  %v1351_v31 = vpop.f32.mrb[6].mxu0 }
 0x131   : > { %v1372_v30 = vadd.f32 %v1371_v28, %v1370_v26  ;;  %v1373_v32 = vpop.f32.mrb[6].mxu1  ;;  %v1352_v33 = vpop.f32.mrb[7].mxu0 }
 0x132   : > { %v1374_v34 = vpop.f32.mrb[7].mxu1  ;;  %v983_v35 = vadd.f32 %v1350_v29, %v943_v24  ;;  %1033 = sbr.rel (%p1281_p6) target bundleno = 689 (0x2b1), region = 60 }
 0x134   : > { %v1023_v37 = vadd.f32 %v1372_v30, %v983_v35 }
 0x136   : > { %v1028_v38 = vadd.f32 %v1023_v37, %v323_v36 }
 0x138   : > { %1029 = vst [vmem:[#allocation2] sm:$0xff] %v1028_v38 }
 0x13f   : > { %v1034_v62 = vld [vmem:[#allocation2] sm:$0xff] }
 0x140   : > { %v1042_v2 = vadd.f32 %v1282_v63, %v1034_v62 }
 0x142   : > { %v1043_v4 = vmax.f32 %v1042_v2, 0.0 }
 0x144   : > { %1426 = vmatmul.mubr.f32.vlgmr.msra.gmra.mrb[0].mxu0 %v1043_v4 }
 0x217   : > { %v1127_v6 = vpop.f32.mrb[0].mxu0 }
 0x218   : > { %v1128_v8 = vadd.f32 %v1127_v6, %v1060_v5  ;;  %v1427_v9 = vpop.f32.mrb[1].mxu0 }
 0x21a   : > { %v1138_v10 = vadd.f32 %v1283_v7, %v1128_v8 }
 0x21c   : > { %v1139_v12 = vmax.f32 %v1138_v10, 0.0 }
 0x21e   : > { %v1147_v13 = vmul.f32 %v1284_v11, %v1139_v12 }
 0x220   : > { %1148 = vadd.xlane.f32.xlu0 %v1147_v13 }
 0x2ad   : > { %v1149_v15 = vpop.xlane.xlu0 %1148 }
 0x2ae   : > { %v1157_v16 = vadd.f32 %v1285_v14, %v1149_v15 }
 0x2b0   : > { %1159 = vst.msk [vmem:[%s1762_s8] sm:$0xff] %vm1158_vm1, %v1157_v16 }
 0x2b1 PF: > { %s20_s29 = sadd.s32 1, %s1542_s29  }
 0x2b2   : > { %p17_p7 = scmp.ge.s32.totalorder %s20_s29, 4  }
 0x2b4   :  { %19 = sbr.rel (!%p17_p7) target bundleno = 3 (0x3), region = 89 }

</bundles_post_ra>
